<compile_context>
chip_gen: v5e
topology: v5e:2x2
jax: 0.10.0
libtpu: 0.0.40
codegen_flags: <defaults>
</compile_context>

<pallas_src>
import functools

import jax
import jax.numpy as jnp
from jax.experimental import pallas as pl
from jax.experimental.pallas import tpu as pltpu


# ---------------------------------------------------------------------------
# Helpers
# ---------------------------------------------------------------------------
def _round_up(x, m):
    return (x + m - 1) // m * m


def _clamp_tile(want, n):
    """Shrink a power-of-two multiple-of-128 tile so it is not larger than needed."""
    t = want
    limit = _round_up(n, 128)
    while t > 128 and t > limit:
        t //= 2
    return t


def _largest_divisor_tile(n_pad, max_tile):
    """Largest power-of-two multiple of 128 that divides n_pad and is <= max_tile."""
    best, t = 128, 128
    while t <= max_tile:
        if n_pad % t == 0:
            best = t
        t *= 2
    return best


def _pad2d(x, rows, cols, value=0):
    r, c = x.shape
    return jnp.pad(x, ((0, rows - r), (0, cols - c)), constant_values=value)


# ---------------------------------------------------------------------------
# Kernel 1: fused projection  [S | Hn] = H @ [W_self | W_neigh]
#   S  (f32)  -> added at aggregation finalize
#   Hn (bf16) -> streamed operand of the O(N^2) aggregation
# ---------------------------------------------------------------------------
def _proj_kernel(h_ref, w_ref, s_ref, hn_ref, *, d_out):
    p = jnp.dot(h_ref[...], w_ref[...], preferred_element_type=jnp.float32)
    s_ref[...] = p[:, :d_out].astype(s_ref.dtype)
    hn_ref[...] = p[:, d_out:].astype(hn_ref.dtype)


def fused_projection(h, w_cat, *, d_out, tile, hn_dtype):
    n_pad, d_in = h.shape
    kernel = functools.partial(_proj_kernel, d_out=d_out)
    return pl.pallas_call(
        kernel,
        out_shape=(jax.ShapeDtypeStruct((n_pad, d_out), jnp.float32),
                   jax.ShapeDtypeStruct((n_pad, d_out), hn_dtype)),
        grid_spec=pltpu.PrefetchScalarGridSpec(
            num_scalar_prefetch=0,
            grid=(n_pad // tile,),
            in_specs=[
                pl.BlockSpec((tile, d_in), lambda i: (i, 0)),        # H row block
                pl.BlockSpec((d_in, 2 * d_out), lambda i: (0, 0)),   # [W_self | W_neigh]
            ],
            out_specs=[
                pl.BlockSpec((tile, d_out), lambda i: (i, 0)),       # S
                pl.BlockSpec((tile, d_out), lambda i: (i, 0)),       # Hn
            ],
        ),
        compiler_params=pltpu.CompilerParams(
            dimension_semantics=("parallel",),
            vmem_limit_bytes=32 * 1024 * 1024),
    )(h, w_cat)


# ---------------------------------------------------------------------------
# Kernel 2: aggregation + deferred normalization + self path + folded BN/bias + ReLU
#   grid = (row tiles, K tiles); acc += (int8 A block -> bf16) @ Hn block   (f32 acc)
#   finalize: out = (acc * inv_deg + S) * scale + shift; ReLU; row mask
# ---------------------------------------------------------------------------
def _sage_agg_kernel(a_ref, hn_ref, s_ref, invdeg_ref, mask_ref, scale_ref, shift_ref,
                     o_ref, acc_ref, *, apply_relu):
    k = pl.program_id(1)

    @pl.when(k == 0)
    def _():
        acc_ref[...] = jnp.zeros_like(acc_ref)

    a = a_ref[...].astype(hn_ref.dtype)          # 0/1 int8 -> bf16 (exact)
    acc_ref[...] += jnp.dot(a, hn_ref[...], preferred_element_type=jnp.float32)

    @pl.when(k == pl.num_programs(1) - 1)
    def _():
        out = acc_ref[...] * invdeg_ref[...] + s_ref[...]
        out = out * scale_ref[...] + shift_ref[...]
        if apply_relu:
            out = jnp.maximum(out, 0.0)
        o_ref[...] = (out * mask_ref[...]).astype(o_ref.dtype)


def sage_layer(a_i8, hn, s, inv_deg, mask, bn_scale, bn_shift, *,
               apply_relu, tile_n, tile_k, out_dtype):
    n_pad = a_i8.shape[0]
    d_out = hn.shape[1]
    kernel = functools.partial(_sage_agg_kernel, apply_relu=apply_relu)
    return pl.pallas_call(
        kernel,
        out_shape=jax.ShapeDtypeStruct((n_pad, d_out), out_dtype),
        grid_spec=pltpu.PrefetchScalarGridSpec(
            num_scalar_prefetch=0,
            grid=(n_pad // tile_n, n_pad // tile_k),
            in_specs=[
                pl.BlockSpec((tile_n, tile_k), lambda i, k: (i, k)),   # A block (int8, streams along k)
                pl.BlockSpec((tile_k, d_out), lambda i, k: (k, 0)),    # Hn block (streams along k)
                pl.BlockSpec((tile_n, d_out), lambda i, k: (i, 0)),    # S row block (self path)
                pl.BlockSpec((tile_n, 1), lambda i, k: (i, 0)),        # 1/deg (f32, exact)
                pl.BlockSpec((tile_n, 1), lambda i, k: (i, 0)),        # row validity mask
                pl.BlockSpec((1, d_out), lambda i, k: (0, 0)),         # folded BN scale
                pl.BlockSpec((1, d_out), lambda i, k: (0, 0)),         # folded BN shift (+bias)
            ],
            out_specs=pl.BlockSpec((tile_n, d_out), lambda i, k: (i, 0)),
            scratch_shapes=[pltpu.VMEM((tile_n, d_out), jnp.float32)],
        ),
        compiler_params=pltpu.CompilerParams(
            dimension_semantics=("parallel", "arbitrary"),
            vmem_limit_bytes=32 * 1024 * 1024),
    )(a_i8, hn, s, inv_deg, mask, bn_scale, bn_shift)


# ---------------------------------------------------------------------------
# Parameters (shapes match dglnn.SAGEConv + BatchNorm1d, eval mode)
# ---------------------------------------------------------------------------
def init_params(key, in_feats, n_hidden, n_classes, n_layers):
    params = []
    for i in range(n_layers):
        d_in = n_hidden if i > 0 else in_feats
        d_out = n_hidden if i < n_layers - 1 else n_classes
        key, k1, k2, k3 = jax.random.split(key, 4)
        scale = (2.0 / (d_in + d_out)) ** 0.5
        layer = {
            "w_self": jax.random.normal(k1, (d_in, d_out), jnp.float32) * scale,
            "w_neigh": jax.random.normal(k2, (d_in, d_out), jnp.float32) * scale,
            "bias": jax.random.normal(k3, (1, d_out), jnp.float32) * 0.01,
        }
        if i < n_layers - 1:
            # BatchNorm1d fresh init: gamma=1, beta=0, running_mean=0, running_var=1.
            eps = 1e-5
            gamma = jnp.ones((1, d_out), jnp.float32)
            beta = jnp.zeros((1, d_out), jnp.float32)
            r_mean = jnp.zeros((1, d_out), jnp.float32)
            r_var = jnp.ones((1, d_out), jnp.float32)
            scale_v = gamma / jnp.sqrt(r_var + eps)
            shift_v = beta - r_mean * scale_v
        else:
            scale_v = jnp.ones((1, d_out), jnp.float32)
            shift_v = jnp.zeros((1, d_out), jnp.float32)
        layer["bn_scale"] = scale_v
        layer["bn_shift"] = shift_v
        params.append(layer)
    return params


def _prep_layer_params(p, d_in_p, d_out_p, compute_dtype):
    # Concatenated weights -> one 2*d_out wide MXU matmul in the projection kernel.
    w_cat = jnp.concatenate(
        [_pad2d(p["w_self"], d_in_p, d_out_p),
         _pad2d(p["w_neigh"], d_in_p, d_out_p)], axis=1).astype(compute_dtype)
    # Bias folded into BN shift: (x + bias)*scale + bn_shift == x*scale + (bn_shift + bias*scale).
    scale = _pad2d(p["bn_scale"], 1, d_out_p, value=1.0)
    shift = _pad2d(p["bn_shift"] + p["bias"] * p["bn_scale"], 1, d_out_p)
    return w_cat, scale, shift


# ---------------------------------------------------------------------------
# Forward
# ---------------------------------------------------------------------------
def graphsage_forward(adj, feat, params, *, compute_dtype=jnp.bfloat16,
                      tile_n=512, tile_k_max=2048, proj_tile_max=2048):
    for t in (tile_n, tile_k_max, proj_tile_max):
        q = t // 128
        assert t % 128 == 0 and q > 0 and (q & (q - 1)) == 0, \
            "tile sizes must be power-of-two multiples of 128"

    n, d_in0 = feat.shape
    n_layers = len(params)
    n_classes = params[-1]["w_self"].shape[1]

    # Row tile: clamp for small graphs; keep >=2 row tiles when possible (v7x has 2 TCs
    # and the row axis is the only "parallel" axis).
    tn = _clamp_tile(tile_n, n)
    while tn > 128 and _round_up(n, tn) // tn < 2:
        tn //= 2
    n_pad = _round_up(n, tn)
    tk = _largest_divisor_tile(n_pad, tile_k_max)      # K tile divides n_pad -> no extra padding
    tp = _largest_divisor_tile(n_pad, proj_tile_max)   # big projection row tile

    # Adjacency as unnormalized 0/1 int8; exact f32 normalization deferred to the kernel.
    # TODO(synk): weighted graphs would need an f32/bf16 adjacency path instead of int8 0/1.
    a_i8 = _pad2d(adj.astype(jnp.int8), n_pad, n_pad)
    deg = jnp.sum(adj.astype(jnp.float32), axis=1, keepdims=True)
    inv_deg = _pad2d(1.0 / jnp.maximum(deg, 1.0), n_pad, 1)          # padded rows -> 0
    row_mask = _pad2d(jnp.ones((n, 1), jnp.float32), n_pad, 1)       # padded rows -> 0

    h = _pad2d(feat, n_pad, _round_up(d_in0, 128)).astype(compute_dtype)

    for i, p in enumerate(params):
        is_hidden = i < n_layers - 1
        d_in, d_out = p["w_self"].shape
        d_in_p, d_out_p = _round_up(d_in, 128), _round_up(d_out, 128)
        assert h.shape[1] == d_in_p
        w_cat, scale, shift = _prep_layer_params(p, d_in_p, d_out_p, compute_dtype)

        # Reassociated neighbor path: Hn = H @ W_neigh (contract in D_in once) plus fused
        # self projection S = H @ W_self; the O(N^2) aggregation then contracts in D_out.
        s, hn = fused_projection(h, w_cat, d_out=d_out_p, tile=tp, hn_dtype=compute_dtype)

        out_dtype = compute_dtype if is_hidden else jnp.float32
        h = sage_layer(a_i8, hn, s, inv_deg, row_mask, scale, shift,
                       apply_relu=is_hidden, tile_n=tn, tile_k=tk, out_dtype=out_dtype)
        # TODO(synk): nn.Dropout in eval mode is identity; training-mode dropout not modeled.

    return h[:n, :n_classes]


# ---------------------------------------------------------------------------
# Self-test
# ---------------------------------------------------------------------------
if __name__ == "__main__":
    key = jax.random.PRNGKey(0)

    # Small but non-trivial: exercises row tiling, padding, both layers.
    N, IN_FEATS, N_HIDDEN, N_CLASSES, N_LAYERS = 300, 48, 96, 10, 2

    key, k_adj, k_feat, k_param = jax.random.split(key, 4)

    # Random sparse-ish 0/1 graph with self loops (mean aggregation over neighbors).
    adj = (jax.random.uniform(k_adj, (N, N)) < 0.05).astype(jnp.float32)
    adj = jnp.maximum(adj, jnp.eye(N, dtype=jnp.float32))
    feat = jax.random.normal(k_feat, (N, IN_FEATS), jnp.float32)
    params = init_params(k_param, IN_FEATS, N_HIDDEN, N_CLASSES, N_LAYERS)

    out = jax.block_until_ready(jax.jit(graphsage_forward)(adj, feat, params))
    assert out.shape == (N, N_CLASSES) and out.dtype == jnp.float32

    # Also exercise the multi-K-step accumulation path with forced small tiles.
    fwd_small = jax.jit(functools.partial(graphsage_forward, tile_n=128,
                                          tile_k_max=128, proj_tile_max=128))
    out_small = jax.block_until_ready(fwd_small(adj, feat, params))

    # Plain-JAX reference mirroring the kernel's cast points (bf16 H/Hn/W, f32 accumulation,
    # exact 0/1 adjacency and exact f32 degree normalization).
    cd = jnp.bfloat16
    deg = jnp.sum(adj, axis=1, keepdims=True)
    inv_deg = 1.0 / jnp.maximum(deg, 1.0)
    h_ref = feat.astype(cd)
    for i, p in enumerate(params):
        hidden = i < N_LAYERS - 1
        wn = p["w_neigh"].astype(cd)
        ws = p["w_self"].astype(cd)
        hn_ref = jnp.dot(h_ref, wn, preferred_element_type=jnp.float32).astype(cd)
        s_ref = jnp.dot(h_ref, ws, preferred_element_type=jnp.float32)
        agg = jnp.dot(adj.astype(cd), hn_ref, preferred_element_type=jnp.float32) * inv_deg
        o = (agg + s_ref) * p["bn_scale"] + (p["bn_shift"] + p["bias"] * p["bn_scale"])
        if hidden:
            o = jnp.maximum(o, 0.0)
            h_ref = o.astype(cd)
        else:
            h_ref = o
    ref = h_ref

    for name, o in (("default-tiles", out), ("small-tiles", out_small)):
        err = jnp.max(jnp.abs(o - ref))
        assert jnp.allclose(o, ref, atol=2e-2, rtol=2e-2), f"{name}: max abs err {err}"

    print("KERNEL_OK")
</pallas_src>

<mosaic_0001>
module attributes {stable_mosaic.version = 11 : i64} {
  func.func @_proj_kernel(%arg0: i32, %arg1: memref<512x128xbf16, #tpu.memory_space<vmem>>, %arg2: memref<128x256xbf16, #tpu.memory_space<vmem>>, %arg3: memref<512x128xf32, #tpu.memory_space<vmem>>, %arg4: memref<512x128xbf16, #tpu.memory_space<vmem>>) attributes {dimension_semantics = [#tpu.dimension_semantics<parallel>], iteration_bounds = array<i64: 1>, scalar_prefetch = 0 : i64, scratch_operands = 0 : i64, tpu.core_type = #tpu.core_type<tc>, window_params = [{transform_indices = @transform_0, window_bounds = array<i64: 512, 128>}, {pipeline_mode = #tpu.pipeline_mode<synchronous>, transform_indices = @transform_1, window_bounds = array<i64: 128, 256>}, {transform_indices = @transform_2, window_bounds = array<i64: 512, 128>}, {transform_indices = @transform_3, window_bounds = array<i64: 512, 128>}]} {
    %c0 = arith.constant 0 : index
    %c0_0 = arith.constant 0 : index
    %0 = vector.load %arg1[%c0, %c0_0] : memref<512x128xbf16, #tpu.memory_space<vmem>>, vector<512x128xbf16>
    %c0_1 = arith.constant 0 : index
    %c0_2 = arith.constant 0 : index
    %1 = vector.load %arg2[%c0_1, %c0_2] : memref<128x256xbf16, #tpu.memory_space<vmem>>, vector<128x256xbf16>
    %cst = arith.constant dense<0.000000e+00> : vector<512x256xf32>
    %2 = tpu.matmul %0, %1, %cst {dimension_numbers = #tpu.dot_dimension_numbers<[1], [0], [0], [1], [0, 0, 1, 1], [], []>} : vector<512x128xbf16>, vector<128x256xbf16>, vector<512x256xf32> -> vector<512x256xf32>
    %3 = vector.extract_strided_slice %2 {offsets = [0, 0], sizes = [512, 128], strides = [1, 1]} : vector<512x256xf32> to vector<512x128xf32>
    %c0_3 = arith.constant 0 : index
    %c0_4 = arith.constant 0 : index
    %4 = vector.load %arg3[%c0_3, %c0_4] : memref<512x128xf32, #tpu.memory_space<vmem>>, vector<512x128xf32>
    tpu.vector_store %arg3[%c0_3, %c0_4], %3 {strides = array<i32>} : memref<512x128xf32, #tpu.memory_space<vmem>>, vector<512x128xf32>,
    %5 = vector.extract_strided_slice %2 {offsets = [0, 128], sizes = [512, 128], strides = [1, 1]} : vector<512x256xf32> to vector<512x128xf32>
    %6 = arith.truncf %5 : vector<512x128xf32> to vector<512x128xbf16>
    %c0_5 = arith.constant 0 : index
    %c0_6 = arith.constant 0 : index
    %7 = vector.load %arg4[%c0_5, %c0_6] : memref<512x128xbf16, #tpu.memory_space<vmem>>, vector<512x128xbf16>
    tpu.vector_store %arg4[%c0_5, %c0_6], %6 {strides = array<i32>} : memref<512x128xbf16, #tpu.memory_space<vmem>>, vector<512x128xbf16>,
    return
  }
  func.func @transform_0(%arg0: i32) -> (i32, i32) {
    %c0_i32 = arith.constant 0 : i32
    %c0_i32_0 = arith.constant 0 : i32
    return %arg0, %c0_i32 : i32, i32
  }
  func.func @transform_1(%arg0: i32) -> (i32, i32) {
    %c0_i32 = arith.constant 0 : i32
    %c0_i32_0 = arith.constant 0 : i32
    %c0_i32_1 = arith.constant 0 : i32
    return %c0_i32, %c0_i32_0 : i32, i32
  }
  func.func @transform_2(%arg0: i32) -> (i32, i32) {
    %c0_i32 = arith.constant 0 : i32
    %c0_i32_0 = arith.constant 0 : i32
    return %arg0, %c0_i32 : i32, i32
  }
  func.func @transform_3(%arg0: i32) -> (i32, i32) {
    %c0_i32 = arith.constant 0 : i32
    %c0_i32_0 = arith.constant 0 : i32
    return %arg0, %c0_i32 : i32, i32
  }
}

module attributes {stable_mosaic.version = 11 : i64} {
  func.func @_sage_agg_kernel(%arg0: i32, %arg1: i32, %arg2: memref<256x512xi8, #tpu.memory_space<vmem>>, %arg3: memref<512x128xbf16, #tpu.memory_space<vmem>>, %arg4: memref<256x128xf32, #tpu.memory_space<vmem>>, %arg5: memref<256x1xf32, #tpu.memory_space<vmem>>, %arg6: memref<256x1xf32, #tpu.memory_space<vmem>>, %arg7: memref<1x128xf32, #tpu.memory_space<vmem>>, %arg8: memref<1x128xf32, #tpu.memory_space<vmem>>, %arg9: memref<256x128xbf16, #tpu.memory_space<vmem>>, %arg10: memref<256x128xf32, #tpu.memory_space<vmem>>) attributes {dimension_semantics = [#tpu.dimension_semantics<parallel>, #tpu.dimension_semantics<arbitrary>], iteration_bounds = array<i64: 2, 1>, scalar_prefetch = 0 : i64, scratch_operands = 1 : i64, tpu.core_type = #tpu.core_type<tc>, window_params = [{transform_indices = @transform_0, window_bounds = array<i64: 256, 512>}, {transform_indices = @transform_1, window_bounds = array<i64: 512, 128>}, {transform_indices = @transform_2, window_bounds = array<i64: 256, 128>}, {transform_indices = @transform_3, window_bounds = array<i64: 256, 1>}, {transform_indices = @transform_4, window_bounds = array<i64: 256, 1>}, {pipeline_mode = #tpu.pipeline_mode<synchronous>, transform_indices = @transform_5, window_bounds = array<i64: 1, 128>}, {pipeline_mode = #tpu.pipeline_mode<synchronous>, transform_indices = @transform_6, window_bounds = array<i64: 1, 128>}, {transform_indices = @transform_7, window_bounds = array<i64: 256, 128>}]} {
    %c0_i32 = arith.constant 0 : i32
    %0 = arith.cmpi eq, %arg1, %c0_i32 : i32
    %1 = arith.extui %0 : i1 to i32
    %c0_i32_0 = arith.constant 0 : i32
    %2 = arith.cmpi ne, %1, %c0_i32_0 : i32
    scf.if %2 {
      %cst_10 = arith.constant 0.000000e+00 : f32
      %13 = vector.broadcast %cst_10 : f32 to vector<256x128xf32>
      %c0_11 = arith.constant 0 : index
      %c0_12 = arith.constant 0 : index
      %14 = vector.load %arg10[%c0_11, %c0_12] : memref<256x128xf32, #tpu.memory_space<vmem>>, vector<256x128xf32>
      tpu.vector_store %arg10[%c0_11, %c0_12], %13 {strides = array<i32>} : memref<256x128xf32, #tpu.memory_space<vmem>>, vector<256x128xf32>,
    } else {
    }
    %c0 = arith.constant 0 : index
    %c0_1 = arith.constant 0 : index
    %3 = vector.load %arg2[%c0, %c0_1] : memref<256x512xi8, #tpu.memory_space<vmem>>, vector<256x512xi8>
    %4 = arith.sitofp %3 : vector<256x512xi8> to vector<256x512xbf16>
    %c0_2 = arith.constant 0 : index
    %c0_3 = arith.constant 0 : index
    %5 = vector.load %arg10[%c0_2, %c0_3] : memref<256x128xf32, #tpu.memory_space<vmem>>, vector<256x128xf32>
    %c0_4 = arith.constant 0 : index
    %c0_5 = arith.constant 0 : index
    %6 = vector.load %arg3[%c0_4, %c0_5] : memref<512x128xbf16, #tpu.memory_space<vmem>>, vector<512x128xbf16>
    %cst = arith.constant dense<0.000000e+00> : vector<256x128xf32>
    %7 = tpu.matmul %4, %6, %cst {dimension_numbers = #tpu.dot_dimension_numbers<[1], [0], [0], [1], [0, 0, 1, 1], [], []>} : vector<256x512xbf16>, vector<512x128xbf16>, vector<256x128xf32> -> vector<256x128xf32>
    %8 = arith.addf %5, %7 : vector<256x128xf32>
    %c0_6 = arith.constant 0 : index
    %c0_7 = arith.constant 0 : index
    %9 = vector.load %arg10[%c0_6, %c0_7] : memref<256x128xf32, #tpu.memory_space<vmem>>, vector<256x128xf32>
    tpu.vector_store %arg10[%c0_6, %c0_7], %8 {strides = array<i32>} : memref<256x128xf32, #tpu.memory_space<vmem>>, vector<256x128xf32>,
    %c0_i32_8 = arith.constant 0 : i32
    %10 = arith.cmpi eq, %arg1, %c0_i32_8 : i32
    %11 = arith.extui %10 : i1 to i32
    %c0_i32_9 = arith.constant 0 : i32
    %12 = arith.cmpi ne, %11, %c0_i32_9 : i32
    scf.if %12 {
      %c0_10 = arith.constant 0 : index
      %c0_11 = arith.constant 0 : index
      %13 = vector.load %arg10[%c0_10, %c0_11] : memref<256x128xf32, #tpu.memory_space<vmem>>, vector<256x128xf32>
      %c0_12 = arith.constant 0 : index
      %c0_13 = arith.constant 0 : index
      %14 = vector.load %arg5[%c0_12, %c0_13] : memref<256x1xf32, #tpu.memory_space<vmem>>, vector<256x1xf32>
      %15 = vector.broadcast %14 : vector<256x1xf32> to vector<256x128xf32>
      %16 = arith.mulf %13, %15 : vector<256x128xf32>
      %c0_14 = arith.constant 0 : index
      %c0_15 = arith.constant 0 : index
      %17 = vector.load %arg4[%c0_14, %c0_15] : memref<256x128xf32, #tpu.memory_space<vmem>>, vector<256x128xf32>
      %18 = arith.addf %16, %17 : vector<256x128xf32>
      %c0_16 = arith.constant 0 : index
      %c0_17 = arith.constant 0 : index
      %19 = vector.load %arg7[%c0_16, %c0_17] : memref<1x128xf32, #tpu.memory_space<vmem>>, vector<1x128xf32>
      %20 = vector.broadcast %19 : vector<1x128xf32> to vector<256x128xf32>
      %21 = arith.mulf %18, %20 : vector<256x128xf32>
      %c0_18 = arith.constant 0 : index
      %c0_19 = arith.constant 0 : index
      %22 = vector.load %arg8[%c0_18, %c0_19] : memref<1x128xf32, #tpu.memory_space<vmem>>, vector<1x128xf32>
      %23 = vector.broadcast %22 : vector<1x128xf32> to vector<256x128xf32>
      %24 = arith.addf %21, %23 : vector<256x128xf32>
      %cst_20 = arith.constant 0.000000e+00 : f32
      %25 = vector.broadcast %cst_20 : f32 to vector<256x128xf32>
      %26 = arith.maximumf %24, %25 : vector<256x128xf32>
      %c0_21 = arith.constant 0 : index
      %c0_22 = arith.constant 0 : index
      %27 = vector.load %arg6[%c0_21, %c0_22] : memref<256x1xf32, #tpu.memory_space<vmem>>, vector<256x1xf32>
      %28 = vector.broadcast %27 : vector<256x1xf32> to vector<256x128xf32>
      %29 = arith.mulf %26, %28 : vector<256x128xf32>
      %30 = arith.truncf %29 : vector<256x128xf32> to vector<256x128xbf16>
      %c0_23 = arith.constant 0 : index
      %c0_24 = arith.constant 0 : index
      %31 = vector.load %arg9[%c0_23, %c0_24] : memref<256x128xbf16, #tpu.memory_space<vmem>>, vector<256x128xbf16>
      tpu.vector_store %arg9[%c0_23, %c0_24], %30 {strides = array<i32>} : memref<256x128xbf16, #tpu.memory_space<vmem>>, vector<256x128xbf16>,
    } else {
    }
    return
  }
  func.func @transform_0(%arg0: i32, %arg1: i32) -> (i32, i32) {
    %c0_i32 = arith.constant 0 : i32
    return %arg0, %arg1 : i32, i32
  }
  func.func @transform_1(%arg0: i32, %arg1: i32) -> (i32, i32) {
    %c0_i32 = arith.constant 0 : i32
    %c0_i32_0 = arith.constant 0 : i32
    return %arg1, %c0_i32 : i32, i32
  }
  func.func @transform_2(%arg0: i32, %arg1: i32) -> (i32, i32) {
    %c0_i32 = arith.constant 0 : i32
    %c0_i32_0 = arith.constant 0 : i32
    return %arg0, %c0_i32 : i32, i32
  }
  func.func @transform_3(%arg0: i32, %arg1: i32) -> (i32, i32) {
    %c0_i32 = arith.constant 0 : i32
    %c0_i32_0 = arith.constant 0 : i32
    return %arg0, %c0_i32 : i32, i32
  }
  func.func @transform_4(%arg0: i32, %arg1: i32) -> (i32, i32) {
    %c0_i32 = arith.constant 0 : i32
    %c0_i32_0 = arith.constant 0 : i32
    return %arg0, %c0_i32 : i32, i32
  }
  func.func @transform_5(%arg0: i32, %arg1: i32) -> (i32, i32) {
    %c0_i32 = arith.constant 0 : i32
    %c0_i32_0 = arith.constant 0 : i32
    %c0_i32_1 = arith.constant 0 : i32
    return %c0_i32, %c0_i32_0 : i32, i32
  }
  func.func @transform_6(%arg0: i32, %arg1: i32) -> (i32, i32) {
    %c0_i32 = arith.constant 0 : i32
    %c0_i32_0 = arith.constant 0 : i32
    %c0_i32_1 = arith.constant 0 : i32
    return %c0_i32, %c0_i32_0 : i32, i32
  }
  func.func @transform_7(%arg0: i32, %arg1: i32) -> (i32, i32) {
    %c0_i32 = arith.constant 0 : i32
    %c0_i32_0 = arith.constant 0 : i32
    return %arg0, %c0_i32 : i32, i32
  }
}

module attributes {stable_mosaic.version = 11 : i64} {
  func.func @_sage_agg_kernel(%arg0: i32, %arg1: i32, %arg2: memref<256x512xi8, #tpu.memory_space<vmem>>, %arg3: memref<512x128xbf16, #tpu.memory_space<vmem>>, %arg4: memref<256x128xf32, #tpu.memory_space<vmem>>, %arg5: memref<256x1xf32, #tpu.memory_space<vmem>>, %arg6: memref<256x1xf32, #tpu.memory_space<vmem>>, %arg7: memref<1x128xf32, #tpu.memory_space<vmem>>, %arg8: memref<1x128xf32, #tpu.memory_space<vmem>>, %arg9: memref<256x128xf32, #tpu.memory_space<vmem>>, %arg10: memref<256x128xf32, #tpu.memory_space<vmem>>) attributes {dimension_semantics = [#tpu.dimension_semantics<parallel>, #tpu.dimension_semantics<arbitrary>], iteration_bounds = array<i64: 2, 1>, scalar_prefetch = 0 : i64, scratch_operands = 1 : i64, tpu.core_type = #tpu.core_type<tc>, window_params = [{transform_indices = @transform_0, window_bounds = array<i64: 256, 512>}, {transform_indices = @transform_1, window_bounds = array<i64: 512, 128>}, {transform_indices = @transform_2, window_bounds = array<i64: 256, 128>}, {transform_indices = @transform_3, window_bounds = array<i64: 256, 1>}, {transform_indices = @transform_4, window_bounds = array<i64: 256, 1>}, {pipeline_mode = #tpu.pipeline_mode<synchronous>, transform_indices = @transform_5, window_bounds = array<i64: 1, 128>}, {pipeline_mode = #tpu.pipeline_mode<synchronous>, transform_indices = @transform_6, window_bounds = array<i64: 1, 128>}, {transform_indices = @transform_7, window_bounds = array<i64: 256, 128>}]} {
    %c0_i32 = arith.constant 0 : i32
    %0 = arith.cmpi eq, %arg1, %c0_i32 : i32
    %1 = arith.extui %0 : i1 to i32
    %c0_i32_0 = arith.constant 0 : i32
    %2 = arith.cmpi ne, %1, %c0_i32_0 : i32
    scf.if %2 {
      %cst_10 = arith.constant 0.000000e+00 : f32
      %13 = vector.broadcast %cst_10 : f32 to vector<256x128xf32>
      %c0_11 = arith.constant 0 : index
      %c0_12 = arith.constant 0 : index
      %14 = vector.load %arg10[%c0_11, %c0_12] : memref<256x128xf32, #tpu.memory_space<vmem>>, vector<256x128xf32>
      tpu.vector_store %arg10[%c0_11, %c0_12], %13 {strides = array<i32>} : memref<256x128xf32, #tpu.memory_space<vmem>>, vector<256x128xf32>,
    } else {
    }
    %c0 = arith.constant 0 : index
    %c0_1 = arith.constant 0 : index
    %3 = vector.load %arg2[%c0, %c0_1] : memref<256x512xi8, #tpu.memory_space<vmem>>, vector<256x512xi8>
    %4 = arith.sitofp %3 : vector<256x512xi8> to vector<256x512xbf16>
    %c0_2 = arith.constant 0 : index
    %c0_3 = arith.constant 0 : index
    %5 = vector.load %arg10[%c0_2, %c0_3] : memref<256x128xf32, #tpu.memory_space<vmem>>, vector<256x128xf32>
    %c0_4 = arith.constant 0 : index
    %c0_5 = arith.constant 0 : index
    %6 = vector.load %arg3[%c0_4, %c0_5] : memref<512x128xbf16, #tpu.memory_space<vmem>>, vector<512x128xbf16>
    %cst = arith.constant dense<0.000000e+00> : vector<256x128xf32>
    %7 = tpu.matmul %4, %6, %cst {dimension_numbers = #tpu.dot_dimension_numbers<[1], [0], [0], [1], [0, 0, 1, 1], [], []>} : vector<256x512xbf16>, vector<512x128xbf16>, vector<256x128xf32> -> vector<256x128xf32>
    %8 = arith.addf %5, %7 : vector<256x128xf32>
    %c0_6 = arith.constant 0 : index
    %c0_7 = arith.constant 0 : index
    %9 = vector.load %arg10[%c0_6, %c0_7] : memref<256x128xf32, #tpu.memory_space<vmem>>, vector<256x128xf32>
    tpu.vector_store %arg10[%c0_6, %c0_7], %8 {strides = array<i32>} : memref<256x128xf32, #tpu.memory_space<vmem>>, vector<256x128xf32>,
    %c0_i32_8 = arith.constant 0 : i32
    %10 = arith.cmpi eq, %arg1, %c0_i32_8 : i32
    %11 = arith.extui %10 : i1 to i32
    %c0_i32_9 = arith.constant 0 : i32
    %12 = arith.cmpi ne, %11, %c0_i32_9 : i32
    scf.if %12 {
      %c0_10 = arith.constant 0 : index
      %c0_11 = arith.constant 0 : index
      %13 = vector.load %arg10[%c0_10, %c0_11] : memref<256x128xf32, #tpu.memory_space<vmem>>, vector<256x128xf32>
      %c0_12 = arith.constant 0 : index
      %c0_13 = arith.constant 0 : index
      %14 = vector.load %arg5[%c0_12, %c0_13] : memref<256x1xf32, #tpu.memory_space<vmem>>, vector<256x1xf32>
      %15 = vector.broadcast %14 : vector<256x1xf32> to vector<256x128xf32>
      %16 = arith.mulf %13, %15 : vector<256x128xf32>
      %c0_14 = arith.constant 0 : index
      %c0_15 = arith.constant 0 : index
      %17 = vector.load %arg4[%c0_14, %c0_15] : memref<256x128xf32, #tpu.memory_space<vmem>>, vector<256x128xf32>
      %18 = arith.addf %16, %17 : vector<256x128xf32>
      %c0_16 = arith.constant 0 : index
      %c0_17 = arith.constant 0 : index
      %19 = vector.load %arg7[%c0_16, %c0_17] : memref<1x128xf32, #tpu.memory_space<vmem>>, vector<1x128xf32>
      %20 = vector.broadcast %19 : vector<1x128xf32> to vector<256x128xf32>
      %21 = arith.mulf %18, %20 : vector<256x128xf32>
      %c0_18 = arith.constant 0 : index
      %c0_19 = arith.constant 0 : index
      %22 = vector.load %arg8[%c0_18, %c0_19] : memref<1x128xf32, #tpu.memory_space<vmem>>, vector<1x128xf32>
      %23 = vector.broadcast %22 : vector<1x128xf32> to vector<256x128xf32>
      %24 = arith.addf %21, %23 : vector<256x128xf32>
      %c0_20 = arith.constant 0 : index
      %c0_21 = arith.constant 0 : index
      %25 = vector.load %arg6[%c0_20, %c0_21] : memref<256x1xf32, #tpu.memory_space<vmem>>, vector<256x1xf32>
      %26 = vector.broadcast %25 : vector<256x1xf32> to vector<256x128xf32>
      %27 = arith.mulf %24, %26 : vector<256x128xf32>
      %c0_22 = arith.constant 0 : index
      %c0_23 = arith.constant 0 : index
      %28 = vector.load %arg9[%c0_22, %c0_23] : memref<256x128xf32, #tpu.memory_space<vmem>>, vector<256x128xf32>
      tpu.vector_store %arg9[%c0_22, %c0_23], %27 {strides = array<i32>} : memref<256x128xf32, #tpu.memory_space<vmem>>, vector<256x128xf32>,
    } else {
    }
    return
  }
  func.func @transform_0(%arg0: i32, %arg1: i32) -> (i32, i32) {
    %c0_i32 = arith.constant 0 : i32
    return %arg0, %arg1 : i32, i32
  }
  func.func @transform_1(%arg0: i32, %arg1: i32) -> (i32, i32) {
    %c0_i32 = arith.constant 0 : i32
    %c0_i32_0 = arith.constant 0 : i32
    return %arg1, %c0_i32 : i32, i32
  }
  func.func @transform_2(%arg0: i32, %arg1: i32) -> (i32, i32) {
    %c0_i32 = arith.constant 0 : i32
    %c0_i32_0 = arith.constant 0 : i32
    return %arg0, %c0_i32 : i32, i32
  }
  func.func @transform_3(%arg0: i32, %arg1: i32) -> (i32, i32) {
    %c0_i32 = arith.constant 0 : i32
    %c0_i32_0 = arith.constant 0 : i32
    return %arg0, %c0_i32 : i32, i32
  }
  func.func @transform_4(%arg0: i32, %arg1: i32) -> (i32, i32) {
    %c0_i32 = arith.constant 0 : i32
    %c0_i32_0 = arith.constant 0 : i32
    return %arg0, %c0_i32 : i32, i32
  }
  func.func @transform_5(%arg0: i32, %arg1: i32) -> (i32, i32) {
    %c0_i32 = arith.constant 0 : i32
    %c0_i32_0 = arith.constant 0 : i32
    %c0_i32_1 = arith.constant 0 : i32
    return %c0_i32, %c0_i32_0 : i32, i32
  }
  func.func @transform_6(%arg0: i32, %arg1: i32) -> (i32, i32) {
    %c0_i32 = arith.constant 0 : i32
    %c0_i32_0 = arith.constant 0 : i32
    %c0_i32_1 = arith.constant 0 : i32
    return %c0_i32, %c0_i32_0 : i32, i32
  }
  func.func @transform_7(%arg0: i32, %arg1: i32) -> (i32, i32) {
    %c0_i32 = arith.constant 0 : i32
    %c0_i32_0 = arith.constant 0 : i32
    return %arg0, %c0_i32 : i32, i32
  }
}

</mosaic_0001>

<bundles_post_ra>
// kernel: graphsage_forward.4
= control target key start
LH: loop header
LB: loop body
LE: loop exit
PB: predicated region body
PF: predicated region fallthrough
CT: control target
= control target key end

     0   :  { %s1850_s1 = inlined_call_operand.vmem [shape: bf16[128,256], index: 1, kind: input, shape index: {}]   ;;  %s1851_s0 = inlined_call_operand.vmem [shape: bf16[512,128], index: 0, kind: input, shape index: {}]   ;;  %s1852_s2 = inlined_call_operand.vmem [shape: f32[512,128], index: 2, kind: output, shape index: {0}]   ;;  %s1853_s3 = inlined_call_operand.vmem [shape: bf16[512,128], index: 3, kind: output, shape index: {1}]  }
   0x1   :  { %v1089_v0 = vld [vmem:[%s1850_s1 + $0x70] sm:$0xf]  ;;  %v1142_v1 = vld [vmem:[%s1850_s1 + $0x74] sm:$0xf0]  ;;  %v1141_v2 = vld [vmem:[%s1850_s1 + $0x74] sm:$0xf] }
   0x2   :  { %v1090_v3 = vor.u32 %v1142_v1, %v1089_v0  ;;  %v1091_v4 = vld [vmem:[%s1850_s1 + $0x78] sm:$0xf0]  ;;  %v1081_v5 = vld [vmem:[%s1850_s1 + $0x60] sm:$0xf]  ;;  %v1140_v6 = vld [vmem:[%s1850_s1 + $0x64] sm:$0xf0] }
   0x3   :  { %v1094_v7 = vor.u32 %v1141_v2, %v1091_v4  ;;  %v1139_v8 = vld [vmem:[%s1850_s1 + $0x64] sm:$0xf]  ;;  %v1083_v9 = vld [vmem:[%s1850_s1 + $0x68] sm:$0xf0]  ;;  %v1082_v10 = vor.u32 %v1140_v6, %v1081_v5  ;;  %v1073_v12 = vld [vmem:[%s1850_s1 + $0x50] sm:$0xf] }
   0x4   :  { %365 = vmatpush.bf16.msra.mxu0 %v1090_v3  ;;  %1334 = vmatpush.bf16.msra.mxu2 %v1090_v3  ;;  %v1086_v11 = vor.u32 %v1139_v8, %v1083_v9  ;;  %v1138_v13 = vld [vmem:[%s1850_s1 + $0x54] sm:$0xf0]  ;;  %v1137_v14 = vld [vmem:[%s1850_s1 + $0x54] sm:$0xf]  ;;  %v1075_v15 = vld [vmem:[%s1850_s1 + $0x58] sm:$0xf0] }
   0x5   :  { %534 = vmatpush.bf16.msra.mxu1 %v1094_v7  ;;  %1342 = vmatpush.bf16.msra.mxu3 %v1094_v7  ;;  %v1074_v16 = vor.u32 %v1138_v13, %v1073_v12  ;;  %v1078_v17 = vor.u32 %v1137_v14, %v1075_v15  ;;  %v1065_v18 = vld [vmem:[%s1850_s1 + $0x40] sm:$0xf]  ;;  %v1136_v19 = vld [vmem:[%s1850_s1 + $0x44] sm:$0xf0]  ;;  %v1135_v20 = vld [vmem:[%s1850_s1 + $0x44] sm:$0xf] }
   0x6   :  { %v1067_v21 = vld [vmem:[%s1850_s1 + $0x48] sm:$0xf0]  ;;  %v1066_v22 = vor.u32 %v1136_v19, %v1065_v18  ;;  %v1057_v24 = vld [vmem:[%s1850_s1 + $0x30] sm:$0xf]  ;;  %v1134_v25 = vld [vmem:[%s1850_s1 + $0x34] sm:$0xf0] }
   0x7   :  { %v1070_v23 = vor.u32 %v1135_v20, %v1067_v21  ;;  %v1133_v26 = vld [vmem:[%s1850_s1 + $0x34] sm:$0xf]  ;;  %v1059_v27 = vld [vmem:[%s1850_s1 + $0x38] sm:$0xf0]  ;;  %v1058_v28 = vor.u32 %v1134_v25, %v1057_v24  ;;  %v1049_v30 = vld [vmem:[%s1850_s1 + $0x20] sm:$0xf] }
   0x8   :  { %366 = vmatpush.bf16.msra.mxu0 %v1082_v10  ;;  %1335 = vmatpush.bf16.msra.mxu2 %v1082_v10  ;;  %v1062_v29 = vor.u32 %v1133_v26, %v1059_v27  ;;  %v1132_v31 = vld [vmem:[%s1850_s1 + $0x24] sm:$0xf0]  ;;  %v1131_v32 = vld [vmem:[%s1850_s1 + $0x24] sm:$0xf]  ;;  %v1051_v33 = vld [vmem:[%s1850_s1 + $0x28] sm:$0xf0] }
   0x9   :  { %535 = vmatpush.bf16.msra.mxu1 %v1086_v11  ;;  %1343 = vmatpush.bf16.msra.mxu3 %v1086_v11  ;;  %v1050_v34 = vor.u32 %v1132_v31, %v1049_v30  ;;  %v1054_v35 = vor.u32 %v1131_v32, %v1051_v33  ;;  %v1041_v36 = vld [vmem:[%s1850_s1 + $0x10] sm:$0xf]  ;;  %v1130_v37 = vld [vmem:[%s1850_s1 + $0x14] sm:$0xf0]  ;;  %v1129_v38 = vld [vmem:[%s1850_s1 + $0x14] sm:$0xf] }
   0xa   :  { %v1043_v39 = vld [vmem:[%s1850_s1 + $0x18] sm:$0xf0]  ;;  %v1042_v40 = vor.u32 %v1130_v37, %v1041_v36  ;;  %v1033_v42 = vld [vmem:[%s1850_s1] sm:$0xf]  ;;  %v1128_v43 = vld [vmem:[%s1850_s1 + $0x4] sm:$0xf0] }
   0xb   :  { %v1046_v41 = vor.u32 %v1129_v38, %v1043_v39  ;;  %v1127_v44 = vld [vmem:[%s1850_s1 + $0x4] sm:$0xf]  ;;  %v1035_v45 = vld [vmem:[%s1850_s1 + $0x8] sm:$0xf0]  ;;  %v1034_v46 = vor.u32 %v1128_v43, %v1033_v42  ;;  %v1097_v52 = vld [vmem:[%s1851_s0 + $0x10] sm:$0xff] }
   0xc   :  { %367 = vmatpush.bf16.msra.mxu0 %v1074_v16  ;;  %1336 = vmatpush.bf16.msra.mxu2 %v1074_v16  ;;  %v1038_v47 = vor.u32 %v1127_v44, %v1035_v45  ;;  %v1095_v48 = vld [vmem:[%s1851_s0] sm:$0xff]  ;;  %v1096_v50 = vld [vmem:[%s1851_s0 + $0x8] sm:$0xff]  ;;  %v1113_v53 = vld [vmem:[%s1851_s0 + $0x90] sm:$0xff] }
   0xd   :  { %536 = vmatpush.bf16.msra.mxu1 %v1078_v17  ;;  %1344 = vmatpush.bf16.msra.mxu3 %v1078_v17  ;;  %v1111_v49 = vld [vmem:[%s1851_s0 + $0x80] sm:$0xff]  ;;  %v1112_v51 = vld [vmem:[%s1851_s0 + $0x88] sm:$0xff]  ;;  %v1098_v54 = vld [vmem:[%s1851_s0 + $0x18] sm:$0xff] }
   0xe   :  { %v1114_v55 = vld [vmem:[%s1851_s0 + $0x98] sm:$0xff]  ;;  %v1099_v56 = vld [vmem:[%s1851_s0 + $0x20] sm:$0xff]  ;;  %v1100_v58 = vld [vmem:[%s1851_s0 + $0x28] sm:$0xff] }
   0xf   :  { %v1115_v57 = vld [vmem:[%s1851_s0 + $0xa0] sm:$0xff]  ;;  %v1116_v59 = vld [vmem:[%s1851_s0 + $0xa8] sm:$0xff]  ;;  %v1101_v60 = vld [vmem:[%s1851_s0 + $0x30] sm:$0xff] }
  0x10   :  { %368 = vmatpush.bf16.msra.mxu0 %v1066_v22  ;;  %1337 = vmatpush.bf16.msra.mxu2 %v1066_v22  ;;  %v1117_v61 = vld [vmem:[%s1851_s0 + $0xb0] sm:$0xff]  ;;  %v1102_v62 = vld [vmem:[%s1851_s0 + $0x38] sm:$0xff]  ;;  %v1103_v0 = vld [vmem:[%s1851_s0 + $0x40] sm:$0xff] }
  0x11   :  { %537 = vmatpush.bf16.msra.mxu1 %v1070_v23  ;;  %1345 = vmatpush.bf16.msra.mxu3 %v1070_v23  ;;  %v1118_v63 = vld [vmem:[%s1851_s0 + $0xb8] sm:$0xff]  ;;  %v1119_v1 = vld [vmem:[%s1851_s0 + $0xc0] sm:$0xff]  ;;  %v1104_v11 = vld [vmem:[%s1851_s0 + $0x48] sm:$0xff] }
  0x12   :  { %v1120_v12 = vld [vmem:[%s1851_s0 + $0xc8] sm:$0xff]  ;;  %v1105_v23 = vld [vmem:[%s1851_s0 + $0x50] sm:$0xff]  ;;  %v1122_v36 = vld [vmem:[%s1851_s0 + $0xd8] sm:$0xff] }
  0x13   :  { %v1121_v24 = vld [vmem:[%s1851_s0 + $0xd0] sm:$0xff] }
  0x14   :  { %369 = vmatpush.bf16.msra.mxu0 %v1058_v28  ;;  %1338 = vmatpush.bf16.msra.mxu2 %v1058_v28 }
  0x15   :  { %538 = vmatpush.bf16.msra.mxu1 %v1062_v29  ;;  %1346 = vmatpush.bf16.msra.mxu3 %v1062_v29 }
  0x18   :  { %370 = vmatpush.bf16.msra.mxu0 %v1050_v34  ;;  %1339 = vmatpush.bf16.msra.mxu2 %v1050_v34 }
  0x19   :  { %539 = vmatpush.bf16.msra.mxu1 %v1054_v35  ;;  %1347 = vmatpush.bf16.msra.mxu3 %v1054_v35  ;;  %v1106_v35 = vld [vmem:[%s1851_s0 + $0x58] sm:$0xff] }
  0x1c   :  { %371 = vmatpush.bf16.msra.mxu0 %v1042_v40  ;;  %1340 = vmatpush.bf16.msra.mxu2 %v1042_v40 }
  0x1d   :  { %540 = vmatpush.bf16.msra.mxu1 %v1046_v41  ;;  %1348 = vmatpush.bf16.msra.mxu3 %v1046_v41 }
  0x20   :  { %372 = vmatpush.bf16.msra.mxu0 %v1034_v46  ;;  %1341 = vmatpush.bf16.msra.mxu2 %v1034_v46 }
  0x21   :  { %541 = vmatpush.bf16.msra.mxu1 %v1038_v47  ;;  %1349 = vmatpush.bf16.msra.mxu3 %v1038_v47  ;;  %v1107_v47 = vld [vmem:[%s1851_s0 + $0x60] sm:$0xff] }
  0x23   :  { %373 = vmatmul.bf16.vlgmr.msra.gmra.mxu0 %v1095_v48  ;;  %453 = vmatmul.bf16.vlgmr.msra.gmra.mxu2 %v1111_v49 }
  0x24   :  { %542 = vmatmul.bf16.vlgmr.msra.gmra.mxu1 %v1095_v48  ;;  %622 = vmatmul.bf16.vlgmr.msra.gmra.mxu3 %v1111_v49  ;;  %v1123_v48 = vld [vmem:[%s1851_s0 + $0xe0] sm:$0xff] }
  0x33   :  { %378 = vmatmul.bf16.gmra.mxu0 %v1096_v50  ;;  %458 = vmatmul.bf16.gmra.mxu2 %v1112_v51 }
  0x34   :  { %547 = vmatmul.bf16.gmra.mxu1 %v1096_v50  ;;  %627 = vmatmul.bf16.gmra.mxu3 %v1112_v51 }
  0x43   :  { %383 = vmatmul.bf16.gmra.mxu0 %v1097_v52  ;;  %463 = vmatmul.bf16.gmra.mxu2 %v1113_v53 }
  0x44   :  { %552 = vmatmul.bf16.gmra.mxu1 %v1097_v52  ;;  %632 = vmatmul.bf16.gmra.mxu3 %v1113_v53 }
  0x53   :  { %388 = vmatmul.bf16.gmra.mxu0 %v1098_v54  ;;  %468 = vmatmul.bf16.gmra.mxu2 %v1114_v55 }
  0x54   :  { %557 = vmatmul.bf16.gmra.mxu1 %v1098_v54  ;;  %637 = vmatmul.bf16.gmra.mxu3 %v1114_v55 }
  0x63   :  { %393 = vmatmul.bf16.gmra.mxu0 %v1099_v56  ;;  %473 = vmatmul.bf16.gmra.mxu2 %v1115_v57 }
  0x64   :  { %562 = vmatmul.bf16.gmra.mxu1 %v1099_v56  ;;  %642 = vmatmul.bf16.gmra.mxu3 %v1115_v57 }
  0x73   :  { %398 = vmatmul.bf16.gmra.mxu0 %v1100_v58  ;;  %478 = vmatmul.bf16.gmra.mxu2 %v1116_v59 }
  0x74   :  { %567 = vmatmul.bf16.gmra.mxu1 %v1100_v58  ;;  %647 = vmatmul.bf16.gmra.mxu3 %v1116_v59  ;;  %v1108_v59 = vld [vmem:[%s1851_s0 + $0x68] sm:$0xff] }
  0x83   :  { %403 = vmatmul.bf16.gmra.mxu0 %v1101_v60  ;;  %483 = vmatmul.bf16.gmra.mxu2 %v1117_v61 }
  0x84   :  { %572 = vmatmul.bf16.gmra.mxu1 %v1101_v60  ;;  %652 = vmatmul.bf16.gmra.mxu3 %v1117_v61  ;;  %v1124_v60 = vld [vmem:[%s1851_s0 + $0xe8] sm:$0xff] }
  0x93   :  { %408 = vmatmul.bf16.gmra.mxu0 %v1102_v62  ;;  %488 = vmatmul.bf16.gmra.mxu2 %v1118_v63 }
  0x94   :  { %577 = vmatmul.bf16.gmra.mxu1 %v1102_v62  ;;  %657 = vmatmul.bf16.gmra.mxu3 %v1118_v63 }
  0xa0   :  { %v374_v2 = vpop.f32.mrf.mxu0 }
  0xa1   :  { %703 = vst [vmem:[%s1852_s2] sm:$0xff] %v374_v2  ;;  %v543_v3 = vpop.f32.mrf.mxu1 }
  0xa3   :  { %413 = vmatmul.bf16.gmra.mxu0 %v1103_v0  ;;  %493 = vmatmul.bf16.gmra.mxu2 %v1119_v1 }
  0xa4   :  { %582 = vmatmul.bf16.gmra.mxu1 %v1103_v0  ;;  %662 = vmatmul.bf16.gmra.mxu3 %v1119_v1 }
  0xa6   :  { %v454_v4 = vpop.f32.mrf.mxu2 }
  0xa7   :  { %735 = vst [vmem:[%s1852_s2 + $0x100] sm:$0xff] %v454_v4  ;;  %v623_v5 = vpop.f32.mrf.mxu3 }
  0xa8   :  { %v376_v6 = vpop.f32.mrf.mxu0 }
  0xa9   :  { %704 = vst [vmem:[%s1852_s2 + $0x8] sm:$0xff] %v376_v6  ;;  %v545_v7 = vpop.f32.mrf.mxu1 }
  0xaa   :  { %v1146_v8 = vpack.c.bf16 %v545_v7, %v543_v3  ;;  %v1109_v7 = vld [vmem:[%s1851_s0 + $0x70] sm:$0xff] }
  0xac   :  { %1147 = vst [vmem:[%s1853_s3] sm:$0xff] %v1146_v8   ;;  %v1125_v8 = vld [vmem:[%s1851_s0 + $0xf0] sm:$0xff] }
  0xae   :  { %v456_v9 = vpop.f32.mrf.mxu2 }
  0xaf   :  { %736 = vst [vmem:[%s1852_s2 + $0x108] sm:$0xff] %v456_v9  ;;  %v625_v10 = vpop.f32.mrf.mxu3 }
  0xb0   :  { %v1226_v13 = vpack.c.bf16 %v625_v10, %v623_v5  ;;  %v379_v14 = vpop.f32.mrf.mxu0 }
  0xb1   :  { %705 = vst [vmem:[%s1852_s2 + $0x10] sm:$0xff] %v379_v14  ;;  %v548_v15 = vpop.f32.mrf.mxu1 }
  0xb2   :  { %1318 = vst [vmem:[%s1853_s3 + $0x80] sm:$0xff] %v1226_v13  }
  0xb3   :  { %418 = vmatmul.bf16.gmra.mxu0 %v1104_v11  ;;  %498 = vmatmul.bf16.gmra.mxu2 %v1120_v12 }
  0xb4   :  { %587 = vmatmul.bf16.gmra.mxu1 %v1104_v11  ;;  %667 = vmatmul.bf16.gmra.mxu3 %v1120_v12 }
  0xb6   :  { %v459_v16 = vpop.f32.mrf.mxu2 }
  0xb7   :  { %737 = vst [vmem:[%s1852_s2 + $0x110] sm:$0xff] %v459_v16  ;;  %v628_v17 = vpop.f32.mrf.mxu3 }
  0xb8   :  { %v381_v18 = vpop.f32.mrf.mxu0 }
  0xb9   :  { %706 = vst [vmem:[%s1852_s2 + $0x18] sm:$0xff] %v381_v18  ;;  %v550_v19 = vpop.f32.mrf.mxu1 }
  0xba   :  { %v1151_v20 = vpack.c.bf16 %v550_v19, %v548_v15  ;;  %v1110_v19 = vld [vmem:[%s1851_s0 + $0x78] sm:$0xff] }
  0xbc   :  { %1303 = vst [vmem:[%s1853_s3 + $0x8] sm:$0xff] %v1151_v20   ;;  %v1126_v20 = vld [vmem:[%s1851_s0 + $0xf8] sm:$0xff] }
  0xbe   :  { %v461_v21 = vpop.f32.mrf.mxu2 }
  0xbf   :  { %738 = vst [vmem:[%s1852_s2 + $0x118] sm:$0xff] %v461_v21  ;;  %v630_v22 = vpop.f32.mrf.mxu3 }
  0xc0   :  { %v1231_v25 = vpack.c.bf16 %v630_v22, %v628_v17  ;;  %v384_v26 = vpop.f32.mrf.mxu0 }
  0xc1   :  { %707 = vst [vmem:[%s1852_s2 + $0x20] sm:$0xff] %v384_v26  ;;  %v553_v27 = vpop.f32.mrf.mxu1 }
  0xc2   :  { %1319 = vst [vmem:[%s1853_s3 + $0x88] sm:$0xff] %v1231_v25  }
  0xc3   :  { %423 = vmatmul.bf16.gmra.mxu0 %v1105_v23  ;;  %503 = vmatmul.bf16.gmra.mxu2 %v1121_v24 }
  0xc4   :  { %592 = vmatmul.bf16.gmra.mxu1 %v1105_v23  ;;  %672 = vmatmul.bf16.gmra.mxu3 %v1121_v24 }
  0xc6   :  { %v464_v28 = vpop.f32.mrf.mxu2 }
  0xc7   :  { %739 = vst [vmem:[%s1852_s2 + $0x120] sm:$0xff] %v464_v28  ;;  %v633_v29 = vpop.f32.mrf.mxu3 }
  0xc8   :  { %v386_v30 = vpop.f32.mrf.mxu0 }
  0xc9   :  { %708 = vst [vmem:[%s1852_s2 + $0x28] sm:$0xff] %v386_v30  ;;  %v555_v31 = vpop.f32.mrf.mxu1 }
  0xca   :  { %v1156_v32 = vpack.c.bf16 %v555_v31, %v553_v27 }
  0xcc   :  { %1304 = vst [vmem:[%s1853_s3 + $0x10] sm:$0xff] %v1156_v32  }
  0xce   :  { %v466_v33 = vpop.f32.mrf.mxu2 }
  0xcf   :  { %740 = vst [vmem:[%s1852_s2 + $0x128] sm:$0xff] %v466_v33  ;;  %v635_v34 = vpop.f32.mrf.mxu3 }
  0xd0   :  { %v1236_v37 = vpack.c.bf16 %v635_v34, %v633_v29  ;;  %v389_v38 = vpop.f32.mrf.mxu0 }
  0xd1   :  { %709 = vst [vmem:[%s1852_s2 + $0x30] sm:$0xff] %v389_v38  ;;  %v558_v39 = vpop.f32.mrf.mxu1 }
  0xd2   :  { %1320 = vst [vmem:[%s1853_s3 + $0x90] sm:$0xff] %v1236_v37  }
  0xd3   :  { %428 = vmatmul.bf16.gmra.mxu0 %v1106_v35  ;;  %508 = vmatmul.bf16.gmra.mxu2 %v1122_v36 }
  0xd4   :  { %597 = vmatmul.bf16.gmra.mxu1 %v1106_v35  ;;  %677 = vmatmul.bf16.gmra.mxu3 %v1122_v36 }
  0xd6   :  { %v469_v40 = vpop.f32.mrf.mxu2 }
  0xd7   :  { %741 = vst [vmem:[%s1852_s2 + $0x130] sm:$0xff] %v469_v40  ;;  %v638_v41 = vpop.f32.mrf.mxu3 }
  0xd8   :  { %v391_v42 = vpop.f32.mrf.mxu0 }
  0xd9   :  { %710 = vst [vmem:[%s1852_s2 + $0x38] sm:$0xff] %v391_v42  ;;  %v560_v43 = vpop.f32.mrf.mxu1 }
  0xda   :  { %v1161_v44 = vpack.c.bf16 %v560_v43, %v558_v39 }
  0xdc   :  { %1305 = vst [vmem:[%s1853_s3 + $0x18] sm:$0xff] %v1161_v44  }
  0xde   :  { %v471_v45 = vpop.f32.mrf.mxu2 }
  0xdf   :  { %742 = vst [vmem:[%s1852_s2 + $0x138] sm:$0xff] %v471_v45  ;;  %v640_v46 = vpop.f32.mrf.mxu3 }
  0xe0   :  { %v1241_v49 = vpack.c.bf16 %v640_v46, %v638_v41  ;;  %v394_v50 = vpop.f32.mrf.mxu0 }
  0xe1   :  { %711 = vst [vmem:[%s1852_s2 + $0x40] sm:$0xff] %v394_v50  ;;  %v563_v51 = vpop.f32.mrf.mxu1 }
  0xe2   :  { %1321 = vst [vmem:[%s1853_s3 + $0x98] sm:$0xff] %v1241_v49  }
  0xe3   :  { %433 = vmatmul.bf16.gmra.mxu0 %v1107_v47  ;;  %513 = vmatmul.bf16.gmra.mxu2 %v1123_v48 }
  0xe4   :  { %602 = vmatmul.bf16.gmra.mxu1 %v1107_v47  ;;  %682 = vmatmul.bf16.gmra.mxu3 %v1123_v48 }
  0xe6   :  { %v474_v52 = vpop.f32.mrf.mxu2 }
  0xe7   :  { %743 = vst [vmem:[%s1852_s2 + $0x140] sm:$0xff] %v474_v52  ;;  %v643_v53 = vpop.f32.mrf.mxu3 }
  0xe8   :  { %v396_v54 = vpop.f32.mrf.mxu0 }
  0xe9   :  { %712 = vst [vmem:[%s1852_s2 + $0x48] sm:$0xff] %v396_v54  ;;  %v565_v55 = vpop.f32.mrf.mxu1 }
  0xea   :  { %v1166_v56 = vpack.c.bf16 %v565_v55, %v563_v51 }
  0xec   :  { %1306 = vst [vmem:[%s1853_s3 + $0x20] sm:$0xff] %v1166_v56  }
  0xee   :  { %v476_v57 = vpop.f32.mrf.mxu2 }
  0xef   :  { %744 = vst [vmem:[%s1852_s2 + $0x148] sm:$0xff] %v476_v57  ;;  %v645_v58 = vpop.f32.mrf.mxu3 }
  0xf0   :  { %v1246_v61 = vpack.c.bf16 %v645_v58, %v643_v53  ;;  %v399_v62 = vpop.f32.mrf.mxu0 }
  0xf1   :  { %713 = vst [vmem:[%s1852_s2 + $0x50] sm:$0xff] %v399_v62  ;;  %v568_v63 = vpop.f32.mrf.mxu1 }
  0xf2   :  { %1322 = vst [vmem:[%s1853_s3 + $0xa0] sm:$0xff] %v1246_v61  }
  0xf3   :  { %438 = vmatmul.bf16.gmra.mxu0 %v1108_v59  ;;  %518 = vmatmul.bf16.gmra.mxu2 %v1124_v60 }
  0xf4   :  { %607 = vmatmul.bf16.gmra.mxu1 %v1108_v59  ;;  %687 = vmatmul.bf16.gmra.mxu3 %v1124_v60 }
  0xf6   :  { %v479_v0 = vpop.f32.mrf.mxu2 }
  0xf7   :  { %745 = vst [vmem:[%s1852_s2 + $0x150] sm:$0xff] %v479_v0  ;;  %v648_v1 = vpop.f32.mrf.mxu3 }
  0xf8   :  { %v401_v2 = vpop.f32.mrf.mxu0 }
  0xf9   :  { %714 = vst [vmem:[%s1852_s2 + $0x58] sm:$0xff] %v401_v2  ;;  %v570_v3 = vpop.f32.mrf.mxu1 }
  0xfa   :  { %v1171_v4 = vpack.c.bf16 %v570_v3, %v568_v63 }
  0xfc   :  { %1307 = vst [vmem:[%s1853_s3 + $0x28] sm:$0xff] %v1171_v4  }
  0xfe   :  { %v481_v5 = vpop.f32.mrf.mxu2 }
  0xff   :  { %746 = vst [vmem:[%s1852_s2 + $0x158] sm:$0xff] %v481_v5  ;;  %v650_v6 = vpop.f32.mrf.mxu3 }
 0x100   :  { %v1251_v9 = vpack.c.bf16 %v650_v6, %v648_v1  ;;  %v404_v10 = vpop.f32.mrf.mxu0 }
 0x101   :  { %715 = vst [vmem:[%s1852_s2 + $0x60] sm:$0xff] %v404_v10  ;;  %v573_v11 = vpop.f32.mrf.mxu1 }
 0x102   :  { %1323 = vst [vmem:[%s1853_s3 + $0xa8] sm:$0xff] %v1251_v9  }
 0x103   :  { %443 = vmatmul.bf16.gmra.mxu0 %v1109_v7  ;;  %523 = vmatmul.bf16.gmra.mxu2 %v1125_v8 }
 0x104   :  { %612 = vmatmul.bf16.gmra.mxu1 %v1109_v7  ;;  %692 = vmatmul.bf16.gmra.mxu3 %v1125_v8 }
 0x106   :  { %v484_v12 = vpop.f32.mrf.mxu2 }
 0x107   :  { %747 = vst [vmem:[%s1852_s2 + $0x160] sm:$0xff] %v484_v12  ;;  %v653_v13 = vpop.f32.mrf.mxu3 }
 0x108   :  { %v406_v14 = vpop.f32.mrf.mxu0 }
 0x109   :  { %716 = vst [vmem:[%s1852_s2 + $0x68] sm:$0xff] %v406_v14  ;;  %v575_v15 = vpop.f32.mrf.mxu1 }
 0x10a   :  { %v1176_v16 = vpack.c.bf16 %v575_v15, %v573_v11 }
 0x10c   :  { %1308 = vst [vmem:[%s1853_s3 + $0x30] sm:$0xff] %v1176_v16  }
 0x10e   :  { %v486_v17 = vpop.f32.mrf.mxu2 }
 0x10f   :  { %748 = vst [vmem:[%s1852_s2 + $0x168] sm:$0xff] %v486_v17  ;;  %v655_v18 = vpop.f32.mrf.mxu3 }
 0x110   :  { %v1256_v21 = vpack.c.bf16 %v655_v18, %v653_v13  ;;  %v409_v22 = vpop.f32.mrf.mxu0 }
 0x111   :  { %717 = vst [vmem:[%s1852_s2 + $0x70] sm:$0xff] %v409_v22  ;;  %v578_v23 = vpop.f32.mrf.mxu1 }
 0x112   :  { %1324 = vst [vmem:[%s1853_s3 + $0xb0] sm:$0xff] %v1256_v21  }
 0x113   :  { %448 = vmatmul.bf16.gmra.mxu0 %v1110_v19  ;;  %528 = vmatmul.bf16.gmra.mxu2 %v1126_v20 }
 0x114   :  { %617 = vmatmul.bf16.gmra.mxu1 %v1110_v19  ;;  %697 = vmatmul.bf16.gmra.mxu3 %v1126_v20 }
 0x116   :  { %v489_v24 = vpop.f32.mrf.mxu2 }
 0x117   :  { %749 = vst [vmem:[%s1852_s2 + $0x170] sm:$0xff] %v489_v24  ;;  %v658_v25 = vpop.f32.mrf.mxu3 }
 0x118   :  { %v411_v26 = vpop.f32.mrf.mxu0 }
 0x119   :  { %718 = vst [vmem:[%s1852_s2 + $0x78] sm:$0xff] %v411_v26  ;;  %v580_v27 = vpop.f32.mrf.mxu1 }
 0x11a   :  { %v1181_v28 = vpack.c.bf16 %v580_v27, %v578_v23 }
 0x11c   :  { %1309 = vst [vmem:[%s1853_s3 + $0x38] sm:$0xff] %v1181_v28  }
 0x11e   :  { %v491_v29 = vpop.f32.mrf.mxu2 }
 0x11f   :  { %750 = vst [vmem:[%s1852_s2 + $0x178] sm:$0xff] %v491_v29  ;;  %v660_v30 = vpop.f32.mrf.mxu3 }
 0x120   :  { %v1261_v31 = vpack.c.bf16 %v660_v30, %v658_v25  ;;  %v414_v32 = vpop.f32.mrf.mxu0 }
 0x121   :  { %719 = vst [vmem:[%s1852_s2 + $0x80] sm:$0xff] %v414_v32  ;;  %v583_v33 = vpop.f32.mrf.mxu1 }
 0x122   :  { %1325 = vst [vmem:[%s1853_s3 + $0xb8] sm:$0xff] %v1261_v31  }
 0x126   :  { %v494_v34 = vpop.f32.mrf.mxu2 }
 0x127   :  { %751 = vst [vmem:[%s1852_s2 + $0x180] sm:$0xff] %v494_v34  ;;  %v663_v35 = vpop.f32.mrf.mxu3 }
 0x128   :  { %v416_v36 = vpop.f32.mrf.mxu0 }
 0x129   :  { %720 = vst [vmem:[%s1852_s2 + $0x88] sm:$0xff] %v416_v36  ;;  %v585_v37 = vpop.f32.mrf.mxu1 }
 0x12a   :  { %v1186_v38 = vpack.c.bf16 %v585_v37, %v583_v33 }
 0x12c   :  { %1310 = vst [vmem:[%s1853_s3 + $0x40] sm:$0xff] %v1186_v38  }
 0x12e   :  { %v496_v39 = vpop.f32.mrf.mxu2 }
 0x12f   :  { %752 = vst [vmem:[%s1852_s2 + $0x188] sm:$0xff] %v496_v39  ;;  %v665_v40 = vpop.f32.mrf.mxu3 }
 0x130   :  { %v1266_v41 = vpack.c.bf16 %v665_v40, %v663_v35  ;;  %v419_v42 = vpop.f32.mrf.mxu0 }
 0x131   :  { %721 = vst [vmem:[%s1852_s2 + $0x90] sm:$0xff] %v419_v42  ;;  %v588_v43 = vpop.f32.mrf.mxu1 }
 0x132   :  { %1326 = vst [vmem:[%s1853_s3 + $0xc0] sm:$0xff] %v1266_v41  }
 0x136   :  { %v499_v44 = vpop.f32.mrf.mxu2 }
 0x137   :  { %753 = vst [vmem:[%s1852_s2 + $0x190] sm:$0xff] %v499_v44  ;;  %v668_v45 = vpop.f32.mrf.mxu3 }
 0x138   :  { %v421_v46 = vpop.f32.mrf.mxu0 }
 0x139   :  { %722 = vst [vmem:[%s1852_s2 + $0x98] sm:$0xff] %v421_v46  ;;  %v590_v47 = vpop.f32.mrf.mxu1 }
 0x13a   :  { %v1191_v48 = vpack.c.bf16 %v590_v47, %v588_v43 }
 0x13c   :  { %1311 = vst [vmem:[%s1853_s3 + $0x48] sm:$0xff] %v1191_v48  }
 0x13e   :  { %v501_v49 = vpop.f32.mrf.mxu2 }
 0x13f   :  { %754 = vst [vmem:[%s1852_s2 + $0x198] sm:$0xff] %v501_v49  ;;  %v670_v50 = vpop.f32.mrf.mxu3 }
 0x140   :  { %v1271_v51 = vpack.c.bf16 %v670_v50, %v668_v45  ;;  %v424_v52 = vpop.f32.mrf.mxu0 }
 0x141   :  { %723 = vst [vmem:[%s1852_s2 + $0xa0] sm:$0xff] %v424_v52  ;;  %v593_v53 = vpop.f32.mrf.mxu1 }
 0x142   :  { %1327 = vst [vmem:[%s1853_s3 + $0xc8] sm:$0xff] %v1271_v51  }
 0x146   :  { %v504_v54 = vpop.f32.mrf.mxu2 }
 0x147   :  { %755 = vst [vmem:[%s1852_s2 + $0x1a0] sm:$0xff] %v504_v54  ;;  %v673_v55 = vpop.f32.mrf.mxu3 }
 0x148   :  { %v426_v56 = vpop.f32.mrf.mxu0 }
 0x149   :  { %724 = vst [vmem:[%s1852_s2 + $0xa8] sm:$0xff] %v426_v56  ;;  %v595_v57 = vpop.f32.mrf.mxu1 }
 0x14a   :  { %v1196_v58 = vpack.c.bf16 %v595_v57, %v593_v53 }
 0x14c   :  { %1312 = vst [vmem:[%s1853_s3 + $0x50] sm:$0xff] %v1196_v58  }
 0x14e   :  { %v506_v59 = vpop.f32.mrf.mxu2 }
 0x14f   :  { %756 = vst [vmem:[%s1852_s2 + $0x1a8] sm:$0xff] %v506_v59  ;;  %v675_v60 = vpop.f32.mrf.mxu3 }
 0x150   :  { %v1276_v61 = vpack.c.bf16 %v675_v60, %v673_v55  ;;  %v429_v62 = vpop.f32.mrf.mxu0 }
 0x151   :  { %725 = vst [vmem:[%s1852_s2 + $0xb0] sm:$0xff] %v429_v62  ;;  %v598_v63 = vpop.f32.mrf.mxu1 }
 0x152   :  { %1328 = vst [vmem:[%s1853_s3 + $0xd0] sm:$0xff] %v1276_v61  }
 0x156   :  { %v509_v0 = vpop.f32.mrf.mxu2 }
 0x157   :  { %757 = vst [vmem:[%s1852_s2 + $0x1b0] sm:$0xff] %v509_v0  ;;  %v678_v1 = vpop.f32.mrf.mxu3 }
 0x158   :  { %v431_v2 = vpop.f32.mrf.mxu0 }
 0x159   :  { %726 = vst [vmem:[%s1852_s2 + $0xb8] sm:$0xff] %v431_v2  ;;  %v600_v3 = vpop.f32.mrf.mxu1 }
 0x15a   :  { %v1201_v4 = vpack.c.bf16 %v600_v3, %v598_v63 }
 0x15c   :  { %1313 = vst [vmem:[%s1853_s3 + $0x58] sm:$0xff] %v1201_v4  }
 0x15e   :  { %v511_v5 = vpop.f32.mrf.mxu2 }
 0x15f   :  { %758 = vst [vmem:[%s1852_s2 + $0x1b8] sm:$0xff] %v511_v5  ;;  %v680_v6 = vpop.f32.mrf.mxu3 }
 0x160   :  { %v1281_v7 = vpack.c.bf16 %v680_v6, %v678_v1  ;;  %v434_v8 = vpop.f32.mrf.mxu0 }
 0x161   :  { %727 = vst [vmem:[%s1852_s2 + $0xc0] sm:$0xff] %v434_v8  ;;  %v603_v9 = vpop.f32.mrf.mxu1 }
 0x162   :  { %1329 = vst [vmem:[%s1853_s3 + $0xd8] sm:$0xff] %v1281_v7  }
 0x166   :  { %v514_v10 = vpop.f32.mrf.mxu2 }
 0x167   :  { %759 = vst [vmem:[%s1852_s2 + $0x1c0] sm:$0xff] %v514_v10  ;;  %v683_v11 = vpop.f32.mrf.mxu3 }
 0x168   :  { %v436_v12 = vpop.f32.mrf.mxu0 }
 0x169   :  { %728 = vst [vmem:[%s1852_s2 + $0xc8] sm:$0xff] %v436_v12  ;;  %v605_v13 = vpop.f32.mrf.mxu1 }
 0x16a   :  { %v1206_v14 = vpack.c.bf16 %v605_v13, %v603_v9 }
 0x16c   :  { %1314 = vst [vmem:[%s1853_s3 + $0x60] sm:$0xff] %v1206_v14  }
 0x16e   :  { %v516_v15 = vpop.f32.mrf.mxu2 }
 0x16f   :  { %760 = vst [vmem:[%s1852_s2 + $0x1c8] sm:$0xff] %v516_v15  ;;  %v685_v16 = vpop.f32.mrf.mxu3 }
 0x170   :  { %v1286_v17 = vpack.c.bf16 %v685_v16, %v683_v11  ;;  %v439_v18 = vpop.f32.mrf.mxu0 }
 0x171   :  { %729 = vst [vmem:[%s1852_s2 + $0xd0] sm:$0xff] %v439_v18  ;;  %v608_v19 = vpop.f32.mrf.mxu1 }
 0x172   :  { %1330 = vst [vmem:[%s1853_s3 + $0xe0] sm:$0xff] %v1286_v17  }
 0x176   :  { %v519_v20 = vpop.f32.mrf.mxu2 }
 0x177   :  { %761 = vst [vmem:[%s1852_s2 + $0x1d0] sm:$0xff] %v519_v20  ;;  %v688_v21 = vpop.f32.mrf.mxu3 }
 0x178   :  { %v441_v22 = vpop.f32.mrf.mxu0 }
 0x179   :  { %730 = vst [vmem:[%s1852_s2 + $0xd8] sm:$0xff] %v441_v22  ;;  %v610_v23 = vpop.f32.mrf.mxu1 }
 0x17a   :  { %v1211_v24 = vpack.c.bf16 %v610_v23, %v608_v19 }
 0x17c   :  { %1315 = vst [vmem:[%s1853_s3 + $0x68] sm:$0xff] %v1211_v24  }
 0x17e   :  { %v521_v25 = vpop.f32.mrf.mxu2 }
 0x17f   :  { %762 = vst [vmem:[%s1852_s2 + $0x1d8] sm:$0xff] %v521_v25  ;;  %v690_v26 = vpop.f32.mrf.mxu3 }
 0x180   :  { %v1291_v27 = vpack.c.bf16 %v690_v26, %v688_v21  ;;  %v444_v28 = vpop.f32.mrf.mxu0 }
 0x181   :  { %731 = vst [vmem:[%s1852_s2 + $0xe0] sm:$0xff] %v444_v28  ;;  %v613_v29 = vpop.f32.mrf.mxu1 }
 0x182   :  { %1331 = vst [vmem:[%s1853_s3 + $0xe8] sm:$0xff] %v1291_v27  }
 0x186   :  { %v524_v30 = vpop.f32.mrf.mxu2 }
 0x187   :  { %763 = vst [vmem:[%s1852_s2 + $0x1e0] sm:$0xff] %v524_v30  ;;  %v693_v31 = vpop.f32.mrf.mxu3 }
 0x188   :  { %v446_v32 = vpop.f32.mrf.mxu0 }
 0x189   :  { %732 = vst [vmem:[%s1852_s2 + $0xe8] sm:$0xff] %v446_v32  ;;  %v615_v33 = vpop.f32.mrf.mxu1 }
 0x18a   :  { %v1216_v34 = vpack.c.bf16 %v615_v33, %v613_v29 }
 0x18c   :  { %1316 = vst [vmem:[%s1853_s3 + $0x70] sm:$0xff] %v1216_v34  }
 0x18e   :  { %v526_v35 = vpop.f32.mrf.mxu2 }
 0x18f   :  { %764 = vst [vmem:[%s1852_s2 + $0x1e8] sm:$0xff] %v526_v35  ;;  %v695_v36 = vpop.f32.mrf.mxu3 }
 0x190   :  { %v1296_v37 = vpack.c.bf16 %v695_v36, %v693_v31  ;;  %v449_v38 = vpop.f32.mrf.mxu0 }
 0x191   :  { %733 = vst [vmem:[%s1852_s2 + $0xf0] sm:$0xff] %v449_v38  ;;  %v618_v39 = vpop.f32.mrf.mxu1 }
 0x192   :  { %1332 = vst [vmem:[%s1853_s3 + $0xf0] sm:$0xff] %v1296_v37  }
 0x196   :  { %v529_v40 = vpop.f32.mrf.mxu2 }
 0x197   :  { %765 = vst [vmem:[%s1852_s2 + $0x1f0] sm:$0xff] %v529_v40  ;;  %v698_v41 = vpop.f32.mrf.mxu3 }
 0x198   :  { %v451_v42 = vpop.f32.mrf.mxu0 }
 0x199   :  { %734 = vst [vmem:[%s1852_s2 + $0xf8] sm:$0xff] %v451_v42  ;;  %v620_v43 = vpop.f32.mrf.mxu1 }
 0x19a   :  { %v1221_v44 = vpack.c.bf16 %v620_v43, %v618_v39 }
 0x19c   :  { %1317 = vst [vmem:[%s1853_s3 + $0x78] sm:$0xff] %v1221_v44  }
 0x19e   :  { %v531_v45 = vpop.f32.mrf.mxu2 }
 0x19f   :  { %766 = vst [vmem:[%s1852_s2 + $0x1f8] sm:$0xff] %v531_v45  ;;  %v700_v46 = vpop.f32.mrf.mxu3 }
 0x1a0   :  { %v1301_v47 = vpack.c.bf16 %v700_v46, %v698_v41 }
 0x1a2   :  { %1333 = vst [vmem:[%s1853_s3 + $0xf8] sm:$0xff] %v1301_v47  }

// kernel: graphsage_forward.5
= control target key start
LH: loop header
LB: loop body
LE: loop exit
PB: predicated region body
PF: predicated region fallthrough
CT: control target
= control target key end

     0   :  { %s2706_s24 = smov 0   ;;  %s2708_s25 = smov 0   ;;  %s3338_s0 = inlined_call_operand.vmem [shape: s8[512,512], index: 0, kind: input, shape index: {}]   ;;  %s3339_s1 = inlined_call_operand.vmem [shape: bf16[512,128], index: 1, kind: input, shape index: {}]   ;;  %s3340_s2 = inlined_call_operand.vmem [shape: f32[512,128], index: 2, kind: input, shape index: {}]   ;;  %s3341_s3 = inlined_call_operand.vmem [shape: f32[512,1], index: 3, kind: input, shape index: {}]   ;;  %s3342_s4 = inlined_call_operand.vmem [shape: f32[512,1], index: 4, kind: input, shape index: {}]   ;;  %s3343_s5 = inlined_call_operand.vmem [shape: f32[1,128], index: 5, kind: input, shape index: {}]   ;;  %s3344_s6 = inlined_call_operand.vmem [shape: f32[1,128], index: 6, kind: input, shape index: {}]   ;;  %s3345_s7 = inlined_call_operand.vmem [shape: bf16[512,128], index: 7, kind: output, shape index: {}]  }
   0x1   :  { %s2710_s26 = smov 0  }
   0x2 LB: > { %s29_s27 = sadd.s32 1, %s2659_s25  ;;  %p2339_p0 = scmp.ge.s32.totalorder %s2663_s26, 1  ;;  %s2663_s26 = sphi %s2710_s26, %s17_s26   ;;  %s2659_s25 = sphi %s2708_s25, %s3350_s25   ;;  %s2655_s24 = sphi %s2706_s24, %s3349_s24  }
   0x3   : > { %p31_p1 = scmp.ge.s32.totalorder %s29_s27, 2  ;;  %p302_p2 = scmp.lt.s32.totalorder %s2663_s26, 3 }
   0x5   : > { %s3352_s27 = smov (%p31_p1, %s29_s27), 0  ;;  %p303_p3 = pnand %p2339_p0, %p302_p2 }
   0x7   : > { %306 = sbr.rel (%p303_p3) target bundleno = 445 (0x1bd), region = 48 }
   0xc   : > { %v2489_v0 = vld [vmem:[%s3339_s1 + $0x38] sm:$0xff]  ;;  %s2343_s11 = sshll.u32 %s2655_s24, 5  ;;  %v2665_v4 = vmov 0   ;;  %s2340_s14 = sshll.u32 %s2655_s24, 3  ;;  %v2488_v5 = vld [vmem:[%s3339_s1 + $0x30] sm:$0xff]  ;;  %v2487_v9 = vld [vmem:[%s3339_s1 + $0x28] sm:$0xff] }
   0xd   : > { %v2497_v1 = vld [vmem:[%s3339_s1 + $0x78] sm:$0xff]  ;;  %2635 = vset.pattern.permute.xlu1 %v2665_v4  ;;  %2634 = vset.pattern.permute.xlu0 %v2665_v4  ;;  %p378_p4 = scmp.lt.s32.totalorder %s2343_s11, 63  ;;  %v2496_v6 = vld [vmem:[%s3339_s1 + $0x70] sm:$0xff]  ;;  %p2754_p5 = scmp.lt.s32.totalorder %s2340_s14, 15  ;;  %v2495_v10 = vld [vmem:[%s3339_s1 + $0x68] sm:$0xff] }
   0xe   : > { %v2505_v2 = vld [vmem:[%s3339_s1 + $0xb8] sm:$0xff]  ;;  %1077 = vmatpush.bf16.msra.mxu0 %v2489_v0  ;;  %1166 = vmatpush.bf16.msra.mxu1 %v2497_v1  ;;  %v2504_v7 = vld [vmem:[%s3339_s1 + $0xb0] sm:$0xff]  ;;  %v2503_v11 = vld [vmem:[%s3339_s1 + $0xa8] sm:$0xff] }
   0xf   : > { %v2513_v3 = vld [vmem:[%s3339_s1 + $0xf8] sm:$0xff]  ;;  %1255 = vmatpush.bf16.msra.mxu2 %v2505_v2  ;;  %v2512_v8 = vld [vmem:[%s3339_s1 + $0xf0] sm:$0xff]  ;;  %s3354_s11 = smov (!%p378_p4, %s2343_s11), 63  ;;  %2636 = vset.pattern.permute.xlu2 %v2665_v4  ;;  %v2511_v12 = vld [vmem:[%s3339_s1 + $0xe8] sm:$0xff]  ;;  %s3356_s14 = smov (!%p2754_p5, %s2340_s14), 15 }
  0x10   : > { %1344 = vmatpush.bf16.msra.mxu3 %v2513_v3  ;;  %s2759_s24 = sshll.u32 %s3354_s11, 3  ;;  %v2486_v16 = vld [vmem:[%s3339_s1 + $0x20] sm:$0xff]  ;;  %s2481_s30 = sshll.u32 %s3356_s14, 5  ;;  %v2485_v23 = vld [vmem:[%s3339_s1 + $0x18] sm:$0xff]  ;;  %v2484_v27 = vld [vmem:[%s3339_s1 + $0x10] sm:$0xff] }
  0x11   : > { %s2768_s9 = scalar_lea.vmem %s3341_s3, %s2759_s24  ;;  %v2494_v17 = vld [vmem:[%s3339_s1 + $0x60] sm:$0xff]  ;;  %v2493_v24 = vld [vmem:[%s3339_s1 + $0x58] sm:$0xff]  ;;  %s2814_s20 = scalar_lea.vmem %s3338_s0, %s2481_s30  ;;  %v2492_v28 = vld [vmem:[%s3339_s1 + $0x50] sm:$0xff] }
  0x12   : > { %1078 = vmatpush.bf16.msra.mxu0 %v2488_v5  ;;  %1167 = vmatpush.bf16.msra.mxu1 %v2496_v6  ;;  %v1534_v13 = vld [vmem:[%s2768_s9 + $0x10] sm:$0xff]  ;;  %v1532_v14 = vld [vmem:[%s2768_s9] sm:$0xff]  ;;  %v1535_v20 = vld [vmem:[%s2768_s9 + $0x18] sm:$0xff]  ;;  %s2913_s15 = scalar_lea.vmem %s3342_s4, %s2759_s24  ;;  %s3083_s14 = scalar_lea.vmem %s3340_s2, %s2759_s24 }
  0x13   : > { %1256 = vmatpush.bf16.msra.mxu2 %v2504_v7  ;;  %v1536_v15 = vld [vmem:[%s2768_s9 + $0x20] sm:$0xff]  ;;  %1576 = vperm.xlu1 %2635, %v1534_v13   ;;  %v1533_v21 = vld [vmem:[%s2768_s9 + $0x8] sm:$0xff]  ;;  %v2501_v25 = vld [vmem:[%s3339_s1 + $0x98] sm:$0xff]  ;;  %s2350_s21 = sshll.u32 %s3354_s11, 2 }
  0x14   : > { %1345 = vmatpush.bf16.msra.mxu3 %v2512_v8  ;;  %1566 = vperm.xlu0 %2634, %v1532_v14   ;;  %v2502_v18 = vld [vmem:[%s3339_s1 + $0xa0] sm:$0xff]  ;;  %v1537_v22 = vld [vmem:[%s2768_s9 + $0x28] sm:$0xff]  ;;  %v2509_v26 = vld [vmem:[%s3339_s1 + $0xd8] sm:$0xff]  ;;  %s3147_s28 = scalar_lea.vmem %s3345_s7, %s2350_s21 }
  0x15   : > { %1586 = vperm.xlu2 %2636, %v1536_v15   ;;  %v2510_v19 = vld [vmem:[%s3339_s1 + $0xe0] sm:$0xff]  ;;  %v2500_v29 = vld [vmem:[%s3339_s1 + $0x90] sm:$0xff]  ;;  %v2832_v32 = vld [vmem:[%s2814_s20 + $0x8] sm:$0xff] }
  0x16   : > { %1079 = vmatpush.bf16.msra.mxu0 %v2487_v9  ;;  %1168 = vmatpush.bf16.msra.mxu1 %v2495_v10  ;;  %v2826_v30 = vld [vmem:[%s2814_s20] sm:$0xff]  ;;  %v2508_v31 = vld [vmem:[%s3339_s1 + $0xd0] sm:$0xff]  ;;  %v2838_v34 = vld [vmem:[%s2814_s20 + $0x18] sm:$0xff]  ;;  %v470_v42 = vunpack.c.0.s8 %v2832_v32  ;;  %v474_v43 = vunpack.c.1.s8 %v2832_v32  ;;  %v478_v10 = vunpack.c.2.s8 %v2832_v32 }
  0x17   : > { %1257 = vmatpush.bf16.msra.mxu2 %v2503_v11  ;;  %v2835_v33 = vld [vmem:[%s2814_s20 + $0x10] sm:$0xff]  ;;  %v1539_v35 = vld [vmem:[%s2768_s9 + $0x38] sm:$0xff]  ;;  %v469_v37 = vunpack.c.0.s8 %v2826_v30  ;;  %v473_v38 = vunpack.c.1.s8 %v2826_v30  ;;  %v1540_v39 = vld [vmem:[%s2768_s9 + $0x40] sm:$0xff]  ;;  %v472_v48 = vunpack.c.0.s8 %v2838_v34  ;;  %v476_v49 = vunpack.c.1.s8 %v2838_v34 }
  0x18   : > { %1346 = vmatpush.bf16.msra.mxu3 %v2511_v12  ;;  %v1538_v36 = vld [vmem:[%s2768_s9 + $0x30] sm:$0xff]  ;;  %v2483_v40 = vld [vmem:[%s3339_s1 + $0x8] sm:$0xff]  ;;  %v471_v44 = vunpack.c.0.s8 %v2835_v33  ;;  %v475_v45 = vunpack.c.1.s8 %v2835_v33  ;;  %v2482_v52 = vld [vmem:[%s3339_s1] sm:$0xff]  ;;  %v598_v54 = vcvt.s32.f32 %v470_v42  ;;  %v602_v55 = vcvt.s32.f32 %v474_v43 }
  0x19   : > { %v2491_v41 = vld [vmem:[%s3339_s1 + $0x48] sm:$0xff]  ;;  %v597_v50 = vcvt.s32.f32 %v469_v37  ;;  %v601_v51 = vcvt.s32.f32 %v473_v38  ;;  %v2490_v53 = vld [vmem:[%s3339_s1 + $0x40] sm:$0xff]  ;;  %v600_v60 = vcvt.s32.f32 %v472_v48  ;;  %v604_v61 = vcvt.s32.f32 %v476_v49  ;;  %v1542_v62 = vld [vmem:[%s2768_s9 + $0x50] sm:$0xff] }
  0x1a   : > { %1080 = vmatpush.bf16.msra.mxu0 %v2486_v16  ;;  %1169 = vmatpush.bf16.msra.mxu1 %v2494_v17  ;;  %v2499_v46 = vld [vmem:[%s3339_s1 + $0x88] sm:$0xff]  ;;  %v599_v56 = vcvt.s32.f32 %v471_v44  ;;  %v603_v57 = vcvt.s32.f32 %v475_v45  ;;  %v2498_v58 = vld [vmem:[%s3339_s1 + $0x80] sm:$0xff]  ;;  %v1543_v1 = vld [vmem:[%s2768_s9 + $0x58] sm:$0xff]  ;;  %v726_v2 = vpack.c.bf16 %v602_v55, %v598_v54  ;;  %v477_v7 = vunpack.c.2.s8 %v2826_v30 }
  0x1b   : > { %1258 = vmatpush.bf16.msra.mxu2 %v2502_v18  ;;  %1581 = vperm.xlu1 %2635, %v1535_v20   ;;  %v2507_v47 = vld [vmem:[%s3339_s1 + $0xc8] sm:$0xff]  ;;  %v2506_v59 = vld [vmem:[%s3339_s1 + $0xc0] sm:$0xff]  ;;  %v725_v0 = vpack.c.bf16 %v601_v51, %v597_v50  ;;  %v728_v4 = vpack.c.bf16 %v604_v61, %v600_v60  ;;  %v481_v8 = vunpack.c.3.s8 %v2826_v30  ;;  %v1546_v9 = vld [vmem:[%s2768_s9 + $0x70] sm:$0xff]  ;;  %v482_v11 = vunpack.c.3.s8 %v2832_v32 }
  0x1c   : > { %1347 = vmatpush.bf16.msra.mxu3 %v2510_v19  ;;  %1571 = vperm.xlu0 %2634, %v1533_v21   ;;  %v1541_v63 = vld [vmem:[%s2768_s9 + $0x48] sm:$0xff]  ;;  %v727_v3 = vpack.c.bf16 %v603_v57, %v599_v56  ;;  %v1544_v6 = vld [vmem:[%s2768_s9 + $0x60] sm:$0xff]  ;;  %v479_v12 = vunpack.c.2.s8 %v2835_v33  ;;  %v483_v13 = vunpack.c.3.s8 %v2835_v33  ;;  %v480_v14 = vunpack.c.2.s8 %v2838_v34  ;;  %v443_v33 = vld [vmem:[%s2814_s20 + $0x30] sm:$0xff] }
  0x1d   : > { %1591 = vperm.xlu2 %2636, %v1537_v22   ;;  %v1545_v5 = vld [vmem:[%s2768_s9 + $0x68] sm:$0xff]  ;;  %v484_v15 = vunpack.c.3.s8 %v2838_v34  ;;  %v605_v16 = vcvt.s32.f32 %v477_v7  ;;  %v609_v17 = vcvt.s32.f32 %v481_v8  ;;  %v606_v18 = vcvt.s32.f32 %v478_v10  ;;  %v444_v34 = vld [vmem:[%s2814_s20 + $0x38] sm:$0xff]  ;;  %v1554_v54 = vld [vmem:[%s2768_s9 + $0xb0] sm:$0xff] }
  0x1e   : > { %1081 = vmatpush.bf16.msra.mxu0 %v2485_v23  ;;  %1170 = vmatpush.bf16.msra.mxu1 %v2493_v24  ;;  %v610_v19 = vcvt.s32.f32 %v482_v11  ;;  %v607_v20 = vcvt.s32.f32 %v479_v12  ;;  %v611_v21 = vcvt.s32.f32 %v483_v13  ;;  %v608_v22 = vcvt.s32.f32 %v480_v14  ;;  %v1548_v24 = vld [vmem:[%s2768_s9 + $0x80] sm:$0xff]  ;;  %v442_v32 = vld [vmem:[%s2814_s20 + $0x28] sm:$0xff]  ;;  %v1555_v57 = vld [vmem:[%s2768_s9 + $0xb8] sm:$0xff] }
  0x1f   : > { %1259 = vmatpush.bf16.msra.mxu2 %v2501_v25  ;;  %v612_v23 = vcvt.s32.f32 %v484_v15  ;;  %v1547_v25 = vld [vmem:[%s2768_s9 + $0x78] sm:$0xff]  ;;  %v487_v42 = vunpack.c.0.s8 %v443_v33  ;;  %v491_v43 = vunpack.c.1.s8 %v443_v33  ;;  %v488_v44 = vunpack.c.0.s8 %v444_v34  ;;  %v1553_v55 = vld [vmem:[%s2768_s9 + $0xa8] sm:$0xff] }
  0x20   : > { %1348 = vmatpush.bf16.msra.mxu3 %v2509_v26  ;;  %v729_v26 = vpack.c.bf16 %v609_v17, %v605_v16  ;;  %v492_v45 = vunpack.c.1.s8 %v444_v34  ;;  %v1557_v61 = vld [vmem:[%s2768_s9 + $0xc8] sm:$0xff]  ;;  %v500_v7 = vunpack.c.3.s8 %v444_v34  ;;  %v1560_v16 = vld [vmem:[%s2768_s9 + $0xe0] sm:$0xff]  ;;  %v1559_v17 = vld [vmem:[%s2768_s9 + $0xd8] sm:$0xff] }
  0x21   : > { %v732_v30 = vpack.c.bf16 %v612_v23, %v608_v22  ;;  %v615_v50 = vcvt.s32.f32 %v487_v42  ;;  %v619_v51 = vcvt.s32.f32 %v491_v43  ;;  %v445_v23 = vld [vmem:[%s2814_s20 + $0x40] sm:$0xff] }
  0x22   : > { %1082 = vmatpush.bf16.msra.mxu0 %v2484_v27  ;;  %1171 = vmatpush.bf16.msra.mxu1 %v2492_v28  ;;  %v1549_v27 = vld [vmem:[%s2768_s9 + $0x88] sm:$0xff]  ;;  %v730_v28 = vpack.c.bf16 %v610_v19, %v606_v18  ;;  %v628_v15 = vcvt.s32.f32 %v500_v7 }
  0x23   : > { %1260 = vmatpush.bf16.msra.mxu2 %v2500_v29  ;;  %1601 = vperm.xlu1 %2635, %v1539_v35   ;;  %v731_v29 = vpack.c.bf16 %v611_v21, %v607_v20  ;;  %v1551_v35 = vld [vmem:[%s2768_s9 + $0x98] sm:$0xff]  ;;  %v1561_v19 = vld [vmem:[%s2768_s9 + $0xe8] sm:$0xff] }
  0x24   : > { %1349 = vmatpush.bf16.msra.mxu3 %v2508_v31  ;;  %1596 = vperm.xlu0 %2634, %v1538_v36   ;;  %v441_v31 = vld [vmem:[%s2814_s20 + $0x20] sm:$0xff]  ;;  %v1550_v36 = vld [vmem:[%s2768_s9 + $0x90] sm:$0xff] }
  0x25   : > { %1606 = vperm.xlu2 %2636, %v1540_v39   ;;  %v485_v37 = vunpack.c.0.s8 %v441_v31  ;;  %v489_v38 = vunpack.c.1.s8 %v441_v31  ;;  %v1552_v39 = vld [vmem:[%s2768_s9 + $0xa0] sm:$0xff] }
  0x26   : > { %1083 = vmatpush.bf16.msra.mxu0 %v2483_v40  ;;  %1172 = vmatpush.bf16.msra.mxu1 %v2491_v41  ;;  %v486_v40 = vunpack.c.0.s8 %v442_v32  ;;  %v490_v41 = vunpack.c.1.s8 %v442_v32 }
  0x27   : > { %1261 = vmatpush.bf16.msra.mxu2 %v2499_v46  ;;  %v613_v46 = vcvt.s32.f32 %v485_v37 }
  0x28   : > { %1350 = vmatpush.bf16.msra.mxu3 %v2507_v47  ;;  %v617_v47 = vcvt.s32.f32 %v489_v38  ;;  %v614_v48 = vcvt.s32.f32 %v486_v40  ;;  %v618_v49 = vcvt.s32.f32 %v490_v41 }
  0x2a   : > { %1084 = vmatpush.bf16.msra.mxu0 %v2482_v52  ;;  %1173 = vmatpush.bf16.msra.mxu1 %v2490_v53  ;;  %v616_v52 = vcvt.s32.f32 %v488_v44  ;;  %v620_v53 = vcvt.s32.f32 %v492_v45  ;;  %v733_v56 = vpack.c.bf16 %v617_v47, %v613_v46  ;;  %v1926_v46 = vld [vmem:[%s2913_s15 + $0x10] sm:$0xff]  ;;  %v1925_v47 = vld [vmem:[%s2913_s15 + $0x8] sm:$0xff] }
  0x2b   : > { %1262 = vmatpush.bf16.msra.mxu2 %v2498_v58  ;;  %1616 = vperm.xlu1 %2635, %v1542_v62   ;;  %v734_v58 = vpack.c.bf16 %v618_v49, %v614_v48  ;;  %v1556_v62 = vld [vmem:[%s2768_s9 + $0xc0] sm:$0xff] }
  0x2c   : > { %1351 = vmatpush.bf16.msra.mxu3 %v2506_v59  ;;  %1611 = vperm.xlu0 %2634, %v1541_v63   ;;  %v735_v59 = vpack.c.bf16 %v619_v51, %v615_v50  ;;  %v736_v60 = vpack.c.bf16 %v620_v53, %v616_v52  ;;  %v493_v63 = vunpack.c.2.s8 %v441_v31  ;;  %v1927_v51 = vld [vmem:[%s2913_s15 + $0x18] sm:$0xff] }
  0x2d   : > { %1621 = vperm.xlu2 %2636, %v1543_v1   ;;  %1085 = vmatmul.bf16.vlgmr.msra.gmra.mxu0 %v725_v0  ;;  %v497_v0 = vunpack.c.3.s8 %v441_v31  ;;  %v1558_v1 = vld [vmem:[%s2768_s9 + $0xd0] sm:$0xff]  ;;  %v1924_v31 = vld [vmem:[%s2913_s15] sm:$0xff] }
  0x2e   : > { %1174 = vmatmul.bf16.vlgmr.msra.gmra.mxu1 %v726_v2  ;;  %1263 = vmatmul.bf16.vlgmr.msra.gmra.mxu2 %v727_v3  ;;  %v494_v2 = vunpack.c.2.s8 %v442_v32  ;;  %v498_v3 = vunpack.c.3.s8 %v442_v32  ;;  %v621_v8 = vcvt.s32.f32 %v493_v63 }
  0x2f   : > { %1352 = vmatmul.bf16.vlgmr.msra.gmra.mxu3 %v728_v4  ;;  %v495_v4 = vunpack.c.2.s8 %v443_v33 }
  0x30   : > { %v622_v10 = vcvt.s32.f32 %v494_v2  ;;  %v626_v11 = vcvt.s32.f32 %v498_v3 }
  0x31   : > { %v623_v12 = vcvt.s32.f32 %v495_v4 }
  0x32   : > { %v738_v20 = vpack.c.bf16 %v626_v11, %v622_v10  ;;  %v1931_v10 = vld [vmem:[%s2913_s15 + $0x38] sm:$0xff] }
  0x33   : > { %1631 = vperm.xlu1 %2635, %v1545_v5   ;;  %v499_v5 = vunpack.c.3.s8 %v443_v33 }
  0x34   : > { %1626 = vperm.xlu0 %2634, %v1544_v6   ;;  %v496_v6 = vunpack.c.2.s8 %v444_v34 }
  0x35   : > { %1636 = vperm.xlu2 %2636, %v1546_v9   ;;  %v625_v9 = vcvt.s32.f32 %v497_v0  ;;  %v627_v13 = vcvt.s32.f32 %v499_v5 }
  0x36   : > { %v624_v14 = vcvt.s32.f32 %v496_v6 }
  0x37   : > { %v737_v18 = vpack.c.bf16 %v625_v9, %v621_v8  ;;  %v739_v21 = vpack.c.bf16 %v627_v13, %v623_v12  ;;  %v1932_v9 = vld [vmem:[%s2913_s15 + $0x40] sm:$0xff] }
  0x38   : > { %v740_v22 = vpack.c.bf16 %v628_v15, %v624_v14  ;;  %v1933_v14 = vld [vmem:[%s2913_s15 + $0x48] sm:$0xff] }
  0x3b   : > { %1646 = vperm.xlu1 %2635, %v1548_v24   ;;  %v446_v24 = vld [vmem:[%s2814_s20 + $0x48] sm:$0xff] }
  0x3c   : > { %1641 = vperm.xlu0 %2634, %v1547_v25   ;;  %v447_v25 = vld [vmem:[%s2814_s20 + $0x50] sm:$0xff]  ;;  %v502_v32 = vunpack.c.0.s8 %v446_v24  ;;  %v506_v33 = vunpack.c.1.s8 %v446_v24 }
  0x3d   : > { %1651 = vperm.xlu2 %2636, %v1549_v27   ;;  %1090 = vmatmul.bf16.gmra.mxu0 %v729_v26  ;;  %v448_v26 = vld [vmem:[%s2814_s20 + $0x58] sm:$0xff]  ;;  %v503_v34 = vunpack.c.0.s8 %v447_v25 }
  0x3e   : > { %1179 = vmatmul.bf16.gmra.mxu1 %v730_v28  ;;  %1268 = vmatmul.bf16.gmra.mxu2 %v731_v29  ;;  %v1563_v27 = vld [vmem:[%s2768_s9 + $0xf8] sm:$0xff]  ;;  %v1562_v28 = vld [vmem:[%s2768_s9 + $0xf0] sm:$0xff]  ;;  %v501_v29 = vunpack.c.0.s8 %v445_v23  ;;  %v508_v37 = vunpack.c.1.s8 %v448_v26  ;;  %v630_v40 = vcvt.s32.f32 %v502_v32  ;;  %v634_v41 = vcvt.s32.f32 %v506_v33 }
  0x3f   : > { %1357 = vmatmul.bf16.gmra.mxu3 %v732_v30  ;;  %v505_v30 = vunpack.c.1.s8 %v445_v23  ;;  %v631_v42 = vcvt.s32.f32 %v503_v34  ;;  %v512_v63 = vunpack.c.2.s8 %v448_v26  ;;  %v516_v0 = vunpack.c.3.s8 %v448_v26 }
  0x40   : > { %v629_v38 = vcvt.s32.f32 %v501_v29  ;;  %v636_v45 = vcvt.s32.f32 %v508_v37  ;;  %v742_v49 = vpack.c.bf16 %v634_v41, %v630_v40 }
  0x41   : > { %v640_v7 = vcvt.s32.f32 %v512_v63  ;;  %v644_v8 = vcvt.s32.f32 %v516_v0 }
  0x43   : > { %1661 = vperm.xlu1 %2635, %v1551_v35   ;;  %v507_v35 = vunpack.c.1.s8 %v447_v25 }
  0x44   : > { %1656 = vperm.xlu0 %2634, %v1550_v36   ;;  %v504_v36 = vunpack.c.0.s8 %v448_v26 }
  0x45   : > { %1666 = vperm.xlu2 %2636, %v1552_v39   ;;  %v633_v39 = vcvt.s32.f32 %v505_v30  ;;  %v635_v43 = vcvt.s32.f32 %v507_v35 }
  0x46   : > { %v632_v44 = vcvt.s32.f32 %v504_v36 }
  0x47   : > { %v741_v48 = vpack.c.bf16 %v633_v39, %v629_v38  ;;  %v743_v50 = vpack.c.bf16 %v635_v43, %v631_v42  ;;  %v1938_v43 = vld [vmem:[%s2913_s15 + $0x70] sm:$0xff] }
  0x48   : > { %v744_v52 = vpack.c.bf16 %v636_v45, %v632_v44  ;;  %v1937_v44 = vld [vmem:[%s2913_s15 + $0x68] sm:$0xff] }
  0x4b   : > { %1676 = vperm.xlu1 %2635, %v1554_v54   ;;  %v1929_v54 = vld [vmem:[%s2913_s15 + $0x28] sm:$0xff] }
  0x4c   : > { %1671 = vperm.xlu0 %2634, %v1553_v55   ;;  %v1928_v55 = vld [vmem:[%s2913_s15 + $0x20] sm:$0xff] }
  0x4d   : > { %1681 = vperm.xlu2 %2636, %v1555_v57   ;;  %1095 = vmatmul.bf16.gmra.mxu0 %v733_v56  ;;  %v509_v56 = vunpack.c.2.s8 %v445_v23  ;;  %v513_v57 = vunpack.c.3.s8 %v445_v23 }
  0x4e   : > { %1184 = vmatmul.bf16.gmra.mxu1 %v734_v58  ;;  %1273 = vmatmul.bf16.gmra.mxu2 %v735_v59  ;;  %v1930_v58 = vld [vmem:[%s2913_s15 + $0x30] sm:$0xff]  ;;  %v510_v59 = vunpack.c.2.s8 %v446_v24 }
  0x4f   : > { %1362 = vmatmul.bf16.gmra.mxu3 %v736_v60  ;;  %v514_v60 = vunpack.c.3.s8 %v446_v24  ;;  %v641_v2 = vcvt.s32.f32 %v513_v57 }
  0x50   : > { %v638_v3 = vcvt.s32.f32 %v510_v59 }
  0x51   : > { %v642_v4 = vcvt.s32.f32 %v514_v60 }
  0x53   : > { %1691 = vperm.xlu1 %2635, %v1557_v61   ;;  %v511_v61 = vunpack.c.2.s8 %v447_v25  ;;  %v746_v12 = vpack.c.bf16 %v642_v4, %v638_v3 }
  0x54   : > { %1686 = vperm.xlu0 %2634, %v1556_v62   ;;  %v515_v62 = vunpack.c.3.s8 %v447_v25  ;;  %v1936_v25 = vld [vmem:[%s2913_s15 + $0x60] sm:$0xff] }
  0x55   : > { %1696 = vperm.xlu2 %2636, %v1558_v1   ;;  %v637_v1 = vcvt.s32.f32 %v509_v56  ;;  %v639_v5 = vcvt.s32.f32 %v511_v61 }
  0x56   : > { %v643_v6 = vcvt.s32.f32 %v515_v62 }
  0x57   : > { %v745_v11 = vpack.c.bf16 %v641_v2, %v637_v1 }
  0x58   : > { %v747_v13 = vpack.c.bf16 %v643_v6, %v639_v5 }
  0x5b   : > { %1706 = vperm.xlu1 %2635, %v1560_v16   ;;  %v748_v16 = vpack.c.bf16 %v644_v8, %v640_v7 }
  0x5c   : > { %1701 = vperm.xlu0 %2634, %v1559_v17   ;;  %v449_v17 = vld [vmem:[%s2814_s20 + $0x60] sm:$0xff] }
  0x5d   : > { %1711 = vperm.xlu2 %2636, %v1561_v19   ;;  %1100 = vmatmul.bf16.gmra.mxu0 %v737_v18  ;;  %v2936_v18 = vld [vmem:[%s2814_s20 + $0x68] sm:$0xff]  ;;  %v2939_v19 = vld [vmem:[%s2814_s20 + $0x70] sm:$0xff]  ;;  %v517_v23 = vunpack.c.0.s8 %v449_v17  ;;  %v521_v24 = vunpack.c.1.s8 %v449_v17  ;;  %v525_v56 = vunpack.c.2.s8 %v449_v17  ;;  %v529_v57 = vunpack.c.3.s8 %v449_v17 }
  0x5e   : > { %1189 = vmatmul.bf16.gmra.mxu1 %v738_v20  ;;  %1278 = vmatmul.bf16.gmra.mxu2 %v739_v21  ;;  %v2942_v20 = vld [vmem:[%s2814_s20 + $0x78] sm:$0xff]  ;;  %v518_v26 = vunpack.c.0.s8 %v2936_v18  ;;  %v523_v29 = vunpack.c.1.s8 %v2939_v19  ;;  %v526_v59 = vunpack.c.2.s8 %v2936_v18  ;;  %v530_v60 = vunpack.c.3.s8 %v2936_v18 }
  0x5f   : > { %1367 = vmatmul.bf16.gmra.mxu3 %v740_v22  ;;  %v1935_v21 = vld [vmem:[%s2913_s15 + $0x58] sm:$0xff]  ;;  %v1934_v22 = vld [vmem:[%s2913_s15 + $0x50] sm:$0xff]  ;;  %v520_v30 = vunpack.c.0.s8 %v2942_v20  ;;  %v645_v33 = vcvt.s32.f32 %v517_v23  ;;  %v649_v34 = vcvt.s32.f32 %v521_v24  ;;  %v527_v61 = vunpack.c.2.s8 %v2939_v19  ;;  %v2994_v23 = vld [vmem:[%s2814_s20 + $0x88] sm:$0xff] }
  0x60   : > { %v646_v37 = vcvt.s32.f32 %v518_v26  ;;  %v651_v40 = vcvt.s32.f32 %v523_v29  ;;  %v531_v62 = vunpack.c.3.s8 %v2939_v19  ;;  %v528_v63 = vunpack.c.2.s8 %v2942_v20  ;;  %v2997_v24 = vld [vmem:[%s2814_s20 + $0x90] sm:$0xff]  ;;  %v1947_v26 = vld [vmem:[%s2913_s15 + $0xb8] sm:$0xff] }
  0x61   : > { %v648_v41 = vcvt.s32.f32 %v520_v30  ;;  %v749_v45 = vpack.c.bf16 %v649_v34, %v645_v33  ;;  %v532_v0 = vunpack.c.3.s8 %v2942_v20  ;;  %v653_v1 = vcvt.s32.f32 %v525_v56  ;;  %v1948_v30 = vld [vmem:[%s2913_s15 + $0xc0] sm:$0xff]  ;;  %v1949_v56 = vld [vmem:[%s2913_s15 + $0xc8] sm:$0xff] }
  0x62   : > { %v657_v2 = vcvt.s32.f32 %v529_v57  ;;  %v654_v5 = vcvt.s32.f32 %v526_v59  ;;  %v658_v6 = vcvt.s32.f32 %v530_v60  ;;  %v655_v7 = vcvt.s32.f32 %v527_v61  ;;  %v1951_v61 = vld [vmem:[%s2913_s15 + $0xd8] sm:$0xff] }
  0x63   : > { %1721 = vperm.xlu1 %2635, %v1563_v27   ;;  %v522_v27 = vunpack.c.1.s8 %v2936_v18  ;;  %v659_v8 = vcvt.s32.f32 %v531_v62  ;;  %v1945_v18 = vld [vmem:[%s2913_s15 + $0xa8] sm:$0xff]  ;;  %v538_v33 = vunpack.c.1.s8 %v2994_v23  ;;  %v535_v34 = vunpack.c.0.s8 %v2997_v24 }
  0x64   : > { %1716 = vperm.xlu0 %2634, %v1562_v28   ;;  %v519_v28 = vunpack.c.0.s8 %v2939_v19 }
  0x65   : > { %1958 = vperm.xlu2 %2636, %v1924_v31   ;;  %v524_v31 = vunpack.c.1.s8 %v2942_v20  ;;  %v650_v38 = vcvt.s32.f32 %v522_v27  ;;  %v755_v17 = vpack.c.bf16 %v659_v8, %v655_v7  ;;  %v1946_v27 = vld [vmem:[%s2913_s15 + $0xb0] sm:$0xff]  ;;  %v1952_v7 = vld [vmem:[%s2913_s15 + $0xe0] sm:$0xff] }
  0x66   : > { %v647_v39 = vcvt.s32.f32 %v519_v28 }
  0x67   : > { %v652_v42 = vcvt.s32.f32 %v524_v31  ;;  %v534_v31 = vunpack.c.0.s8 %v2994_v23 }
  0x6b   : > { %1968 = vperm.xlu1 %2635, %v1926_v46   ;;  %v750_v46 = vpack.c.bf16 %v650_v38, %v646_v37  ;;  %v539_v37 = vunpack.c.1.s8 %v2997_v24 }
  0x6c   : > { %1963 = vperm.xlu0 %2634, %v1925_v47   ;;  %v751_v47 = vpack.c.bf16 %v651_v40, %v647_v39 }
  0x6d   : > { %1105 = vmatmul.bf16.gmra.mxu0 %v741_v48  ;;  %1973 = vperm.xlu2 %2636, %v1927_v51   ;;  %v1939_v48 = vld [vmem:[%s2913_s15 + $0x78] sm:$0xff] }
  0x6e   : > { %1194 = vmatmul.bf16.gmra.mxu1 %v742_v49  ;;  %1283 = vmatmul.bf16.gmra.mxu2 %v743_v50  ;;  %v752_v49 = vpack.c.bf16 %v652_v42, %v648_v41 }
  0x6f   : > { %1372 = vmatmul.bf16.gmra.mxu3 %v744_v52  ;;  %v2924_v53 = vpop.permute.xlu2 %1586 }
  0x73   : > { %1983 = vperm.xlu1 %2635, %v1929_v54   ;;  %v1941_v54 = vld [vmem:[%s2913_s15 + $0x88] sm:$0xff] }
  0x74   : > { %1978 = vperm.xlu0 %2634, %v1928_v55   ;;  %v1940_v55 = vld [vmem:[%s2913_s15 + $0x80] sm:$0xff] }
  0x75   : > { %1988 = vperm.xlu2 %2636, %v1930_v58   ;;  %v1942_v58 = vld [vmem:[%s2913_s15 + $0x90] sm:$0xff] }
  0x77   : > { %v2932_v15 = vpop.permute.xlu2 %1591 }
  0x7b   : > { %1998 = vperm.xlu1 %2635, %v1932_v9   ;;  %v656_v9 = vcvt.s32.f32 %v528_v63 }
  0x7c   : > { %1993 = vperm.xlu0 %2634, %v1931_v10   ;;  %v660_v10 = vcvt.s32.f32 %v532_v0 }
  0x7d   : > { %1110 = vmatmul.bf16.gmra.mxu0 %v745_v11  ;;  %2003 = vperm.xlu2 %2636, %v1933_v14   ;;  %v753_v14 = vpack.c.bf16 %v657_v2, %v653_v1 }
  0x7e   : > { %1199 = vmatmul.bf16.gmra.mxu1 %v746_v12  ;;  %1288 = vmatmul.bf16.gmra.mxu2 %v747_v13  ;;  %v1944_v12 = vld [vmem:[%s2913_s15 + $0xa0] sm:$0xff]  ;;  %v1943_v13 = vld [vmem:[%s2913_s15 + $0x98] sm:$0xff]  ;;  %v756_v19 = vpack.c.bf16 %v660_v10, %v656_v9 }
  0x7f   : > { %1377 = vmatmul.bf16.gmra.mxu3 %v748_v16  ;;  %v2953_v32 = vpop.permute.xlu2 %1606  ;;  %v754_v16 = vpack.c.bf16 %v658_v6, %v654_v5  ;;  %v1953_v6 = vld [vmem:[%s2913_s15 + $0xe8] sm:$0xff] }
  0x83   : > { %2013 = vperm.xlu1 %2635, %v1935_v21  }
  0x84   : > { %2008 = vperm.xlu0 %2634, %v1934_v22   ;;  %v2991_v22 = vld [vmem:[%s2814_s20 + $0x80] sm:$0xff] }
  0x85   : > { %2018 = vperm.xlu2 %2636, %v1936_v25   ;;  %v2955_v35 = vpop.permute.xlu1 %1576  ;;  %v3000_v25 = vld [vmem:[%s2814_s20 + $0x98] sm:$0xff]  ;;  %v533_v28 = vunpack.c.0.s8 %v2991_v22  ;;  %v537_v29 = vunpack.c.1.s8 %v2991_v22  ;;  %v541_v8 = vunpack.c.2.s8 %v2991_v22  ;;  %v545_v9 = vunpack.c.3.s8 %v2991_v22 }
  0x86   : > { %v2957_v36 = vpop.permute.xlu0 %1566  ;;  %v536_v39 = vunpack.c.0.s8 %v3000_v25  ;;  %v540_v40 = vunpack.c.1.s8 %v3000_v25 }
  0x87   : > { %v2966_v52 = vpop.permute.xlu2 %1621  ;;  %v661_v41 = vcvt.s32.f32 %v533_v28  ;;  %v665_v42 = vcvt.s32.f32 %v537_v29  ;;  %v669_v22 = vcvt.s32.f32 %v541_v8  ;;  %v673_v28 = vcvt.s32.f32 %v545_v9 }
  0x89   : > { %v757_v57 = vpack.c.bf16 %v665_v42, %v661_v41  ;;  %v761_v41 = vpack.c.bf16 %v673_v28, %v669_v22 }
  0x8b   : > { %2028 = vperm.xlu1 %2635, %v1938_v43  }
  0x8c   : > { %2023 = vperm.xlu0 %2634, %v1937_v44  }
  0x8d   : > { %1115 = vmatmul.bf16.gmra.mxu0 %v749_v45  ;;  %2033 = vperm.xlu2 %2636, %v1939_v48   ;;  %v2962_v50 = vpop.permute.xlu1 %1581  ;;  %v662_v45 = vcvt.s32.f32 %v534_v31  ;;  %v667_v48 = vcvt.s32.f32 %v539_v37 }
  0x8e   : > { %v2964_v51 = vpop.permute.xlu0 %1571  ;;  %1204 = vmatmul.bf16.gmra.mxu1 %v750_v46  ;;  %1293 = vmatmul.bf16.gmra.mxu2 %v751_v47  ;;  %v666_v46 = vcvt.s32.f32 %v538_v33  ;;  %v663_v47 = vcvt.s32.f32 %v535_v34 }
  0x8f   : > { %1382 = vmatmul.bf16.gmra.mxu3 %v752_v49  ;;  %v2981_v11 = vpop.permute.xlu2 %1636  ;;  %v664_v49 = vcvt.s32.f32 %v536_v39 }
  0x90   : > { %v758_v59 = vpack.c.bf16 %v666_v46, %v662_v45  ;;  %v759_v60 = vpack.c.bf16 %v667_v48, %v663_v47 }
  0x93   : > { %2043 = vperm.xlu1 %2635, %v1941_v54   ;;  %v668_v54 = vcvt.s32.f32 %v540_v40  ;;  %v1955_v40 = vld [vmem:[%s2913_s15 + $0xf8] sm:$0xff] }
  0x94   : > { %2038 = vperm.xlu0 %2634, %v1940_v55   ;;  %v1950_v55 = vld [vmem:[%s2913_s15 + $0xd0] sm:$0xff] }
  0x95   : > { %2048 = vperm.xlu2 %2636, %v1942_v58   ;;  %v2977_v3 = vpop.permute.xlu1 %1601  ;;  %v760_v63 = vpack.c.bf16 %v668_v54, %v664_v49 }
  0x96   : > { %v2979_v4 = vpop.permute.xlu0 %1596 }
  0x97   : > { %v3011_v38 = vpop.permute.xlu2 %1651 }
  0x9b   : > { %2058 = vperm.xlu1 %2635, %v1944_v12  }
  0x9c   : > { %2053 = vperm.xlu0 %2634, %v1943_v13   ;;  %v1954_v13 = vld [vmem:[%s2913_s15 + $0xf0] sm:$0xff] }
  0x9d   : > { %1120 = vmatmul.bf16.gmra.mxu0 %v753_v14  ;;  %2063 = vperm.xlu2 %2636, %v1945_v18   ;;  %v2986_v20 = vpop.permute.xlu1 %1616  ;;  %v542_v14 = vunpack.c.2.s8 %v2994_v23  ;;  %v547_v18 = vunpack.c.3.s8 %v2997_v24 }
  0x9e   : > { %v2988_v21 = vpop.permute.xlu0 %1611  ;;  %1209 = vmatmul.bf16.gmra.mxu1 %v754_v16  ;;  %1298 = vmatmul.bf16.gmra.mxu2 %v755_v17  ;;  %v546_v16 = vunpack.c.3.s8 %v2994_v23  ;;  %v543_v17 = vunpack.c.2.s8 %v2997_v24 }
  0x9f   : > { %1387 = vmatmul.bf16.gmra.mxu3 %v756_v19  ;;  %v3022_v0 = vpop.permute.xlu2 %1666  ;;  %v670_v23 = vcvt.s32.f32 %v542_v14  ;;  %v675_v34 = vcvt.s32.f32 %v547_v18 }
  0xa0   : > { %v674_v31 = vcvt.s32.f32 %v546_v16  ;;  %v671_v33 = vcvt.s32.f32 %v543_v17 }
  0xa2   : > { %v762_v46 = vpack.c.bf16 %v674_v31, %v670_v23  ;;  %v763_v47 = vpack.c.bf16 %v675_v34, %v671_v33 }
  0xa3   : > { %2073 = vperm.xlu1 %2635, %v1947_v26   ;;  %v544_v26 = vunpack.c.2.s8 %v3000_v25 }
  0xa4   : > { %2068 = vperm.xlu0 %2634, %v1946_v27   ;;  %v548_v27 = vunpack.c.3.s8 %v3000_v25 }
  0xa5   : > { %2078 = vperm.xlu2 %2636, %v1948_v30   ;;  %v3015_v43 = vpop.permute.xlu1 %1631  ;;  %v672_v37 = vcvt.s32.f32 %v544_v26 }
  0xa6   : > { %v3017_v44 = vpop.permute.xlu0 %1626  ;;  %v676_v39 = vcvt.s32.f32 %v548_v27 }
  0xa7   : > { %v3045_v24 = vpop.permute.xlu2 %1681 }
  0xa8   : > { %v764_v49 = vpack.c.bf16 %v676_v39, %v672_v37 }
  0xaa   : > { %v1086_v58 = vpop.f32.mrf.mxu0 }
  0xab   : > { %v1175_v62 = vpop.f32.mrf.mxu1  ;;  %2088 = vperm.xlu1 %2635, %v1950_v55  }
  0xac   : > { %2083 = vperm.xlu0 %2634, %v1949_v56   ;;  %v3053_v56 = vld [vmem:[%s2814_s20 + $0xa0] sm:$0xff] }
  0xad   : > { %1125 = vmatmul.bf16.gmra.mxu0 %v757_v57  ;;  %2093 = vperm.xlu2 %2636, %v1951_v61   ;;  %v3024_v1 = vpop.permute.xlu1 %1646  ;;  %v1176_v57 = vadd.f32 %v1175_v62, %v1086_v58  ;;  %v3062_v61 = vld [vmem:[%s2814_s20 + $0xb8] sm:$0xff]  ;;  %v549_v8 = vunpack.c.0.s8 %v3053_v56  ;;  %v553_v9 = vunpack.c.1.s8 %v3053_v56 }
  0xae   : > { %v3026_v2 = vpop.permute.xlu0 %1641  ;;  %1214 = vmatmul.bf16.gmra.mxu1 %v758_v59  ;;  %1303 = vmatmul.bf16.gmra.mxu2 %v759_v60  ;;  %v3056_v59 = vld [vmem:[%s2814_s20 + $0xa8] sm:$0xff]  ;;  %v3059_v60 = vld [vmem:[%s2814_s20 + $0xb0] sm:$0xff]  ;;  %v552_v22 = vunpack.c.0.s8 %v3062_v61  ;;  %v556_v28 = vunpack.c.1.s8 %v3062_v61 }
  0xaf   : > { %1392 = vmatmul.bf16.gmra.mxu3 %v760_v63  ;;  %v3064_v63 = vpop.permute.xlu2 %1696  ;;  %v550_v16 = vunpack.c.0.s8 %v3056_v59  ;;  %v554_v58 = vunpack.c.1.s8 %v3056_v59  ;;  %v551_v62 = vunpack.c.0.s8 %v3059_v60  ;;  %v555_v17 = vunpack.c.1.s8 %v3059_v60 }
  0xb0   : > { %v677_v33 = vcvt.s32.f32 %v549_v8  ;;  %v681_v34 = vcvt.s32.f32 %v553_v9 }
  0xb1   : > { %v1264_v5 = vpop.f32.mrf.mxu2 }
  0xb2   : > { %v3032_v10 = vpop.f32.mrf.mxu3  ;;  %v1088_v12 = vpop.f32.mrf.mxu0  ;;  %v1265_v18 = vadd.f32 %v1264_v5, %v1176_v57  ;;  %v765_v57 = vpack.c.bf16 %v681_v34, %v677_v33  ;;  %v557_v34 = vunpack.c.2.s8 %v3053_v56 }
  0xb3   : > { %v1177_v19 = vpop.f32.mrf.mxu1  ;;  %2103 = vperm.xlu1 %2635, %v1953_v6  }
  0xb4   : > { %2098 = vperm.xlu0 %2634, %v1952_v7   ;;  %v1178_v26 = vadd.f32 %v1177_v19, %v1088_v12  ;;  %v1354_v5 = vadd.f32 %v3032_v10, %v1265_v18  ;;  %v680_v12 = vcvt.s32.f32 %v552_v22  ;;  %v684_v19 = vcvt.s32.f32 %v556_v28  ;;  %v1758_v22 = vld [vmem:[%s3083_s14 + $0x10] sm:$0xff] }
  0xb5   : > { %2108 = vperm.xlu2 %2636, %v1954_v13   ;;  %v3041_v29 = vpop.permute.xlu1 %1661 }
  0xb6   : > { %v3043_v30 = vpop.permute.xlu0 %1656 }
  0xb9   : > { %v1266_v25 = vpop.f32.mrf.mxu2 }
  0xba   : > { %v1355_v42 = vpop.f32.mrf.mxu3  ;;  %v1091_v45 = vpop.f32.mrf.mxu0  ;;  %v1267_v23 = vadd.f32 %v1266_v25, %v1178_v26  ;;  %v1759_v26 = vld [vmem:[%s3083_s14 + $0x18] sm:$0xff] }
  0xbb   : > { %v1180_v48 = vpop.f32.mrf.mxu1 }
  0xbc   : > { %2113 = vperm.xlu0 %2634, %v1955_v40   ;;  %v1181_v6 = vadd.f32 %v1180_v48, %v1091_v45  ;;  %v678_v40 = vcvt.s32.f32 %v550_v16  ;;  %v679_v45 = vcvt.s32.f32 %v551_v62  ;;  %v1356_v25 = vadd.f32 %v1355_v42, %v1267_v23  ;;  %v3086_v16 = vpop.permute.xlu2 %1711 }
  0xbd   : > { %1130 = vmatmul.bf16.gmra.mxu0 %v761_v41  ;;  %v3048_v54 = vpop.permute.xlu1 %1676  ;;  %v682_v41 = vcvt.s32.f32 %v554_v58  ;;  %v768_v62 = vpack.c.bf16 %v684_v19, %v680_v12 }
  0xbe   : > { %v3050_v55 = vpop.permute.xlu0 %1671  ;;  %1219 = vmatmul.bf16.gmra.mxu1 %v762_v46  ;;  %1308 = vmatmul.bf16.gmra.mxu2 %v763_v47  ;;  %v683_v46 = vcvt.s32.f32 %v555_v17  ;;  %v1756_v17 = vld [vmem:[%s3083_s14] sm:$0xff]  ;;  %v1725_v42 = vmul.f32 %v2964_v51, %v1356_v25  ;;  %v559_v25 = vunpack.c.2.s8 %v3059_v60 }
  0xbf   : > { %1397 = vmatmul.bf16.gmra.mxu3 %v764_v49  ;;  %v766_v10 = vpack.c.bf16 %v682_v41, %v678_v40  ;;  %v3102_v51 = vld [vmem:[%s3343_s5] ss:$0 sm:$0xff] }
  0xc0   : > { %v767_v9 = vpack.c.bf16 %v683_v46, %v679_v45  ;;  %v561_v45 = vunpack.c.3.s8 %v3053_v56  ;;  %v558_v46 = vunpack.c.2.s8 %v3056_v59 }
  0xc1   : > { %v1269_v7 = vpop.f32.mrf.mxu2 }
  0xc2   : > { %v1358_v13 = vpop.f32.mrf.mxu3  ;;  %v1093_v14 = vpop.f32.mrf.mxu0  ;;  %v1270_v31 = vadd.f32 %v1269_v7, %v1181_v6 }
  0xc3   : > { %v1182_v27 = vpop.f32.mrf.mxu1 }
  0xc4   : > { %v1183_v47 = vadd.f32 %v1182_v27, %v1093_v14  ;;  %v1359_v48 = vadd.f32 %v1358_v13, %v1270_v31  ;;  %v1724_v14 = vmul.f32 %v2957_v36, %v1354_v5  ;;  %v1757_v27 = vld [vmem:[%s3083_s14 + $0x8] sm:$0xff] }
  0xc5   : > { %v3074_v37 = vpop.permute.xlu1 %1691  ;;  %v1789_v40 = vadd.f32 %v1757_v27, %v1725_v42  ;;  %v687_v27 = vcvt.s32.f32 %v559_v25 }
  0xc6   : > { %v3076_v39 = vpop.permute.xlu0 %1686  ;;  %v1726_v13 = vmul.f32 %v2955_v35, %v1359_v48  ;;  %v1788_v33 = vadd.f32 %v1756_v17, %v1724_v14  ;;  %v563_v48 = vunpack.c.3.s8 %v3059_v60 }
  0xc7   : > { %v1825_v60 = vmul.f32 %v3102_v51, %v1789_v40 }
  0xc8   : > { %v1790_v41 = vadd.f32 %v1758_v22, %v1726_v13  ;;  %v691_v22 = vcvt.s32.f32 %v563_v48 }
  0xc9   : > { %v1271_v49 = vpop.f32.mrf.mxu2 }
  0xca   : > { %v1272_v6 = vadd.f32 %v1271_v49, %v1183_v47  ;;  %v1360_v7 = vpop.f32.mrf.mxu3  ;;  %v1096_v8 = vpop.f32.mrf.mxu0  ;;  %v562_v47 = vunpack.c.3.s8 %v3056_v59  ;;  %v3113_v49 = vld [vmem:[%s3344_s6] ss:$0 sm:$0xff]  ;;  %v1826_v14 = vmul.f32 %v3102_v51, %v1790_v41 }
  0xcb   : > { %v1185_v58 = vpop.f32.mrf.mxu1  ;;  %v1861_v41 = vadd.f32 %v3113_v49, %v1825_v60  ;;  %v3138_v60 = vld [vmem:[%s2814_s20 + $0xc8] sm:$0xff] }
  0xcc   : > { %v1361_v18 = vadd.f32 %v1360_v7, %v1272_v6  ;;  %v1186_v23 = vadd.f32 %v1185_v58, %v1096_v8  ;;  %v560_v7 = vunpack.c.2.s8 %v3062_v61  ;;  %v564_v8 = vunpack.c.3.s8 %v3062_v61 }
  0xcd   : > { %1135 = vmatmul.bf16.gmra.mxu0 %v765_v57  ;;  %v3095_v31 = vpop.permute.xlu1 %1706  ;;  %v1824_v57 = vmul.f32 %v3102_v51, %v1788_v33  ;;  %v689_v58 = vcvt.s32.f32 %v561_v45 }
  0xce   : > { %v1727_v28 = vmul.f32 %v2962_v50, %v1361_v18  ;;  %v3097_v36 = vpop.permute.xlu0 %1701  ;;  %1224 = vmatmul.bf16.gmra.mxu1 %v766_v10  ;;  %1313 = vmatmul.bf16.gmra.mxu2 %v767_v9  ;;  %v685_v10 = vcvt.s32.f32 %v557_v34  ;;  %v1959_v9 = vpop.permute.xlu2 %1958  ;;  %v1760_v18 = vld [vmem:[%s3083_s14 + $0x20] sm:$0xff]  ;;  %v692_v33 = vcvt.s32.f32 %v564_v8 }
  0xcf   : > { %1402 = vmatmul.bf16.gmra.mxu3 %v768_v62  ;;  %v686_v62 = vcvt.s32.f32 %v558_v46  ;;  %v1860_v61 = vadd.f32 %v3113_v49, %v1824_v57 }
  0xd0   : > { %v1791_v35 = vadd.f32 %v1759_v26, %v1727_v28  ;;  %v690_v26 = vcvt.s32.f32 %v562_v47  ;;  %v771_v47 = vpack.c.bf16 %v691_v22, %v687_v27 }
  0xd1   : > { %v1274_v50 = vpop.f32.mrf.mxu2  ;;  %v1892_v25 = vmax.f32 %v1860_v61, 0.0 }
  0xd2   : > { %v1275_v5 = vadd.f32 %v1274_v50, %v1186_v23  ;;  %v1363_v12 = vpop.f32.mrf.mxu3  ;;  %v1098_v19 = vpop.f32.mrf.mxu0  ;;  %v1827_v56 = vmul.f32 %v3102_v51, %v1791_v35  ;;  %v688_v23 = vcvt.s32.f32 %v560_v7  ;;  %v769_v50 = vpack.c.bf16 %v689_v58, %v685_v10  ;;  %v1761_v7 = vld [vmem:[%s3083_s14 + $0x28] sm:$0xff] }
  0xd3   : > { %v1187_v6 = vpop.f32.mrf.mxu1 }
  0xd4   : > { %v1364_v59 = vadd.f32 %v1363_v12, %v1275_v5  ;;  %v1863_v28 = vadd.f32 %v3113_v49, %v1827_v56  ;;  %v1188_v35 = vadd.f32 %v1187_v6, %v1098_v19  ;;  %v770_v12 = vpack.c.bf16 %v690_v26, %v686_v62 }
  0xd5   : > { %v3123_v42 = vpop.permute.xlu1 %1721  ;;  %v772_v19 = vpack.c.bf16 %v692_v33, %v688_v23  ;;  %v2116_v26 = vmul.f32 %v1959_v9, %v1892_v25  ;;  %v3153_v9 = vld [vmem:[%s2814_s20 + $0xd8] sm:$0xff] }
  0xd6   : > { %v1728_v17 = vmul.f32 %v2924_v53, %v1364_v59  ;;  %3347 = vst [vmem:[#allocation3_spill] sm:$0xff] %v3123_v42  ;;  %v3125_v13 = vpop.permute.xlu0 %1716  ;;  %v1862_v53 = vadd.f32 %v3113_v49, %v1826_v14  ;;  %v1895_v48 = vmax.f32 %v1863_v28, 0.0  ;;  %v1974_v6 = vpop.permute.xlu2 %1973  ;;  %v1893_v59 = vmax.f32 %v1861_v41, 0.0  ;;  %v3135_v14 = vld [vmem:[%s2814_s20 + $0xc0] sm:$0xff]  ;;  %v3142_v28 = vld [vmem:[%s2814_s20 + $0xd0] sm:$0xff] }
  0xd7   : > { %v569_v33 = vunpack.c.1.s8 %v3135_v14  ;;  %v571_v25 = vunpack.c.1.s8 %v3142_v28 }
  0xd8   : > { %v1792_v34 = vadd.f32 %v1760_v18, %v1728_v17  ;;  %v1894_v8 = vmax.f32 %v1862_v53, 0.0  ;;  %v2119_v27 = vmul.f32 %v1974_v6, %v1895_v48 }
  0xd9   : > { %v1276_v40 = vpop.f32.mrf.mxu2 }
  0xda   : > { %v1277_v45 = vadd.f32 %v1276_v40, %v1188_v35  ;;  %v1365_v46 = vpop.f32.mrf.mxu3  ;;  %v1101_v5 = vpop.f32.mrf.mxu0  ;;  %v1828_v10 = vmul.f32 %v3102_v51, %v1792_v34  ;;  %v566_v35 = vunpack.c.0.s8 %v3138_v60 }
  0xdb   : > { %v1190_v57 = vpop.f32.mrf.mxu1 }
  0xdc   : > { %v1366_v56 = vadd.f32 %v1365_v46, %v1277_v45  ;;  %v1191_v62 = vadd.f32 %v1190_v57, %v1101_v5  ;;  %v1864_v41 = vadd.f32 %v3113_v49, %v1828_v10  ;;  %v568_v57 = vunpack.c.0.s8 %v3153_v9 }
  0xdd   : > { %1140 = vmatmul.bf16.gmra.mxu0 %v769_v50  ;;  %v1969_v17 = vpop.permute.xlu1 %1968  ;;  %v570_v50 = vunpack.c.1.s8 %v3138_v60  ;;  %v697_v10 = vcvt.s32.f32 %v569_v33 }
  0xde   : > { %v1729_v58 = vmul.f32 %v2932_v15, %v1366_v56  ;;  %v1964_v18 = vpop.permute.xlu0 %1963  ;;  %1229 = vmatmul.bf16.gmra.mxu1 %v770_v12  ;;  %1318 = vmatmul.bf16.gmra.mxu2 %v771_v47  ;;  %v2118_v22 = vmul.f32 %v1969_v17, %v1894_v8  ;;  %v565_v15 = vunpack.c.0.s8 %v3135_v14  ;;  %v567_v47 = vunpack.c.0.s8 %v3142_v28  ;;  %v1762_v8 = vld [vmem:[%s3083_s14 + $0x30] sm:$0xff] }
  0xdf   : > { %v2117_v61 = vmul.f32 %v1964_v18, %v1893_v59  ;;  %1407 = vmatmul.bf16.gmra.mxu3 %v772_v19  ;;  %v572_v19 = vunpack.c.1.s8 %v3153_v9  ;;  %v1896_v59 = vmax.f32 %v1864_v41, 0.0 }
  0xe0   : > { %v1793_v23 = vadd.f32 %v1761_v7, %v1729_v58  ;;  %v2522_v34 = vpack.c.bf16 %v2119_v27, %v2118_v22  ;;  %v693_v7 = vcvt.s32.f32 %v565_v15  ;;  %v694_v58 = vcvt.s32.f32 %v566_v35 }
  0xe1   : > { %v2517_v40 = vpack.c.bf16 %v2117_v61, %v2116_v26  ;;  %v1279_v53 = vpop.f32.mrf.mxu2  ;;  %v695_v22 = vcvt.s32.f32 %v567_v47  ;;  %v699_v61 = vcvt.s32.f32 %v571_v25 }
  0xe2   : > { %v1280_v45 = vadd.f32 %v1279_v53, %v1191_v62  ;;  %v1368_v46 = vpop.f32.mrf.mxu3  ;;  %v1103_v5 = vpop.f32.mrf.mxu0  ;;  %v1829_v12 = vmul.f32 %v3102_v51, %v1793_v23  ;;  %2594 = vst [vmem:[%s3147_s28 + $0x8] sm:$0xff] %v2522_v34   ;;  %v698_v62 = vcvt.s32.f32 %v570_v50  ;;  %v696_v34 = vcvt.s32.f32 %v568_v57  ;;  %v1763_v57 = vld [vmem:[%s3083_s14 + $0x38] sm:$0xff] }
  0xe3   : > { %v1192_v48 = vpop.f32.mrf.mxu1  ;;  %2518 = vst [vmem:[%s3147_s28] sm:$0xff] %v2517_v40   ;;  %v700_v40 = vcvt.s32.f32 %v572_v19  ;;  %v773_v41 = vpack.c.bf16 %v697_v10, %v693_v7  ;;  %v577_v10 = vunpack.c.3.s8 %v3135_v14 }
  0xe4   : > { %v1369_v56 = vadd.f32 %v1368_v46, %v1280_v45  ;;  %v1865_v6 = vadd.f32 %v3113_v49, %v1829_v12  ;;  %v1193_v45 = vadd.f32 %v1192_v48, %v1103_v5 }
  0xe5   : > { %v1984_v18 = vpop.permute.xlu1 %1983  ;;  %v776_v42 = vpack.c.bf16 %v700_v40, %v696_v34 }
  0xe6   : > { %v1730_v17 = vmul.f32 %v2979_v4, %v1369_v56  ;;  %v1897_v26 = vmax.f32 %v1865_v6, 0.0  ;;  %v1979_v27 = vpop.permute.xlu0 %1978  ;;  %v774_v4 = vpack.c.bf16 %v698_v62, %v694_v58  ;;  %v775_v56 = vpack.c.bf16 %v699_v61, %v695_v22 }
  0xe7   : > { %v2120_v23 = vmul.f32 %v1979_v27, %v1896_v59  ;;  %v573_v59 = vunpack.c.2.s8 %v3135_v14  ;;  %v574_v58 = vunpack.c.2.s8 %v3138_v60  ;;  %v578_v62 = vunpack.c.3.s8 %v3138_v60 }
  0xe8   : > { %v1794_v53 = vadd.f32 %v1762_v8, %v1730_v17  ;;  %v2121_v15 = vmul.f32 %v1984_v18, %v1897_v26  ;;  %v579_v27 = vunpack.c.3.s8 %v3142_v28  ;;  %v576_v61 = vunpack.c.2.s8 %v3153_v9 }
  0xe9   : > { %v1281_v46 = vpop.f32.mrf.mxu2  ;;  %v701_v60 = vcvt.s32.f32 %v573_v59 }
  0xea   : > { %v2527_v33 = vpack.c.bf16 %v2121_v15, %v2120_v23  ;;  %v1282_v35 = vadd.f32 %v1281_v46, %v1193_v45  ;;  %v1370_v50 = vpop.f32.mrf.mxu3  ;;  %v1106_v12 = vpop.f32.mrf.mxu0  ;;  %v1830_v47 = vmul.f32 %v3102_v51, %v1794_v53  ;;  %v580_v23 = vunpack.c.3.s8 %v3153_v9  ;;  %v1764_v53 = vld [vmem:[%s3083_s14 + $0x40] sm:$0xff] }
  0xeb   : > { %v1195_v6 = vpop.f32.mrf.mxu1  ;;  %v705_v45 = vcvt.s32.f32 %v577_v10  ;;  %v702_v15 = vcvt.s32.f32 %v574_v58  ;;  %v706_v46 = vcvt.s32.f32 %v578_v62 }
  0xec   : > { %2595 = vst [vmem:[%s3147_s28 + $0x10] sm:$0xff] %v2527_v33   ;;  %v1371_v25 = vadd.f32 %v1370_v50, %v1282_v35  ;;  %v1196_v5 = vadd.f32 %v1195_v6, %v1106_v12  ;;  %v1866_v7 = vadd.f32 %v3113_v49, %v1830_v47  ;;  %v707_v50 = vcvt.s32.f32 %v579_v27  ;;  %v3192_v27 = vld [vmem:[%s2814_s20 + $0xe8] sm:$0xff] }
  0xed   : > { %1145 = vmatmul.bf16.gmra.mxu0 %v773_v41 }
  0xee   : > { %v1731_v19 = vmul.f32 %v2977_v3, %v1371_v25  ;;  %1234 = vmatmul.bf16.gmra.mxu1 %v774_v4  ;;  %1323 = vmatmul.bf16.gmra.mxu2 %v775_v56  ;;  %v1898_v34 = vmax.f32 %v1866_v7, 0.0  ;;  %v1994_v12 = vpop.permute.xlu0 %1993  ;;  %v704_v4 = vcvt.s32.f32 %v576_v61  ;;  %v708_v56 = vcvt.s32.f32 %v580_v23 }
  0xef   : > { %1412 = vmatmul.bf16.gmra.mxu3 %v776_v42  ;;  %v575_v42 = vunpack.c.2.s8 %v3142_v28  ;;  %v1989_v28 = vpop.permute.xlu2 %1988 }
  0xf0   : > { %v1795_v48 = vadd.f32 %v1763_v57, %v1731_v19  ;;  %v2122_v9 = vmul.f32 %v1989_v28, %v1898_v34  ;;  %v777_v19 = vpack.c.bf16 %v705_v45, %v701_v60  ;;  %v780_v58 = vpack.c.bf16 %v708_v56, %v704_v4 }
  0xf1   : > { %v1284_v8 = vpop.f32.mrf.mxu2  ;;  %v703_v35 = vcvt.s32.f32 %v575_v42  ;;  %v3189_v42 = vld [vmem:[%s2814_s20 + $0xe0] sm:$0xff]  ;;  %v586_v60 = vunpack.c.1.s8 %v3192_v27 }
  0xf2   : > { %v1831_v17 = vmul.f32 %v3102_v51, %v1795_v48  ;;  %v1285_v3 = vadd.f32 %v1284_v8, %v1196_v5  ;;  %v1373_v18 = vpop.f32.mrf.mxu3  ;;  %v1108_v26 = vpop.f32.mrf.mxu0  ;;  %v778_v8 = vpack.c.bf16 %v706_v46, %v702_v15 }
  0xf3   : > { %v1197_v22 = vpop.f32.mrf.mxu1  ;;  %v779_v59 = vpack.c.bf16 %v707_v50, %v703_v35 }
  0xf4   : > { %v1867_v14 = vadd.f32 %v3113_v49, %v1831_v17  ;;  %v1374_v40 = vadd.f32 %v1373_v18, %v1285_v3  ;;  %v1198_v25 = vadd.f32 %v1197_v22, %v1108_v26  ;;  %v1765_v3 = vld [vmem:[%s3083_s14 + $0x48] sm:$0xff]  ;;  %v3195_v22 = vld [vmem:[%s2814_s20 + $0xf0] sm:$0xff] }
  0xf5   : > { %v587_v35 = vunpack.c.1.s8 %v3195_v22 }
  0xf6   : > { %v1899_v41 = vmax.f32 %v1867_v14, 0.0  ;;  %v1732_v33 = vmul.f32 %v2953_v32, %v1374_v40  ;;  %v3199_v14 = vld [vmem:[%s2814_s20 + $0xf8] sm:$0xff]  ;;  %v581_v40 = vunpack.c.0.s8 %v3189_v42 }
  0xf7   : > { %v584_v28 = vunpack.c.0.s8 %v3199_v14 }
  0xf8   : > { %v2123_v6 = vmul.f32 %v1994_v12, %v1899_v41  ;;  %v1796_v47 = vadd.f32 %v1764_v53, %v1732_v33  ;;  %v582_v53 = vunpack.c.0.s8 %v3192_v27  ;;  %v583_v33 = vunpack.c.0.s8 %v3195_v22 }
  0xf9   : > { %v1286_v57 = vpop.f32.mrf.mxu2  ;;  %v588_v12 = vunpack.c.1.s8 %v3199_v14 }
  0xfa   : > { %v2532_v5 = vpack.c.bf16 %v2123_v6, %v2122_v9  ;;  %v1287_v48 = vadd.f32 %v1286_v57, %v1198_v25  ;;  %v1375_v7 = vpop.f32.mrf.mxu3  ;;  %v1111_v32 = vpop.f32.mrf.mxu0  ;;  %v1832_v62 = vmul.f32 %v3102_v51, %v1796_v47  ;;  %v1766_v6 = vld [vmem:[%s3083_s14 + $0x50] sm:$0xff]  ;;  %v709_v47 = vcvt.s32.f32 %v581_v40 }
  0xfb   : > { %v1200_v10 = vpop.f32.mrf.mxu1  ;;  %v710_v57 = vcvt.s32.f32 %v582_v53 }
  0xfc   : > { %2596 = vst [vmem:[%s3147_s28 + $0x18] sm:$0xff] %v2532_v5   ;;  %v1376_v17 = vadd.f32 %v1375_v7, %v1287_v48  ;;  %v1201_v26 = vadd.f32 %v1200_v10, %v1111_v32  ;;  %v1868_v61 = vadd.f32 %v3113_v49, %v1832_v62  ;;  %v711_v7 = vcvt.s32.f32 %v583_v33  ;;  %v1767_v33 = vld [vmem:[%s3083_s14 + $0x58] sm:$0xff] }
  0xfd   : > { %1150 = vmatmul.bf16.gmra.mxu0 %v777_v19  ;;  %v714_v19 = vcvt.s32.f32 %v586_v60  ;;  %v715_v32 = vcvt.s32.f32 %v587_v35  ;;  %v712_v10 = vcvt.s32.f32 %v584_v28 }
  0xfe   : > { %v1733_v18 = vmul.f32 %v2988_v21, %v1376_v17  ;;  %1239 = vmatmul.bf16.gmra.mxu1 %v778_v8  ;;  %1328 = vmatmul.bf16.gmra.mxu2 %v779_v59  ;;  %v585_v21 = vunpack.c.1.s8 %v3189_v42  ;;  %v1900_v4 = vmax.f32 %v1868_v61, 0.0  ;;  %v2004_v8 = vpop.permute.xlu2 %2003  ;;  %v1999_v59 = vpop.permute.xlu1 %1998 }
  0xff   : > { %1417 = vmatmul.bf16.gmra.mxu3 %v780_v58  ;;  %v716_v58 = vcvt.s32.f32 %v588_v12  ;;  %v782_v53 = vpack.c.bf16 %v714_v19, %v710_v57  ;;  %v591_v19 = vunpack.c.2.s8 %v3195_v22 }
 0x100   : > { %v1797_v23 = vadd.f32 %v1765_v3, %v1733_v18  ;;  %v713_v25 = vcvt.s32.f32 %v585_v21  ;;  %v2124_v62 = vmul.f32 %v1999_v59, %v1900_v4  ;;  %v589_v4 = vunpack.c.2.s8 %v3189_v42 }
 0x101   : > { %v1289_v34 = vpop.f32.mrf.mxu2 }
 0x102   : > { %v1833_v45 = vmul.f32 %v3102_v51, %v1797_v23  ;;  %v1290_v15 = vadd.f32 %v1289_v34, %v1201_v26  ;;  %v1378_v46 = vpop.f32.mrf.mxu3  ;;  %v1113_v41 = vpop.f32.mrf.mxu0  ;;  %v781_v61 = vpack.c.bf16 %v713_v25, %v709_v47 }
 0x103   : > { %v1202_v50 = vpop.f32.mrf.mxu1 }
 0x104   : > { %v1869_v56 = vadd.f32 %v3113_v49, %v1833_v45  ;;  %v1379_v9 = vadd.f32 %v1378_v46, %v1290_v15  ;;  %v1203_v18 = vadd.f32 %v1202_v50, %v1113_v41  ;;  %v784_v45 = vpack.c.bf16 %v716_v58, %v712_v10  ;;  %v1768_v10 = vld [vmem:[%s3083_s14 + $0x60] sm:$0xff] }
 0x106   : > { %v1901_v5 = vmax.f32 %v1869_v56, 0.0  ;;  %v1734_v48 = vmul.f32 %v2986_v20, %v1379_v9  ;;  %v783_v20 = vpack.c.bf16 %v715_v32, %v711_v7  ;;  %v593_v56 = vunpack.c.3.s8 %v3189_v42 }
 0x107   : > { %v590_v9 = vunpack.c.2.s8 %v3192_v27  ;;  %v592_v7 = vunpack.c.2.s8 %v3199_v14  ;;  %v596_v32 = vunpack.c.3.s8 %v3199_v14 }
 0x108   : > { %v2125_v17 = vmul.f32 %v2004_v8, %v1901_v5  ;;  %v1798_v3 = vadd.f32 %v1766_v6, %v1734_v48  ;;  %v594_v6 = vunpack.c.3.s8 %v3192_v27  ;;  %v595_v5 = vunpack.c.3.s8 %v3195_v22  ;;  %v2014_v22 = vpop.permute.xlu1 %2013 }
 0x109   : > { %v1291_v26 = vpop.f32.mrf.mxu2  ;;  %v717_v27 = vcvt.s32.f32 %v589_v4  ;;  %v721_v58 = vcvt.s32.f32 %v593_v56  ;;  %v1769_v56 = vld [vmem:[%s3083_s14 + $0x68] sm:$0xff] }
 0x10a   : > { %v2537_v23 = vpack.c.bf16 %v2125_v17, %v2124_v62  ;;  %v1292_v34 = vadd.f32 %v1291_v26, %v1203_v18  ;;  %v1380_v40 = vpop.f32.mrf.mxu3  ;;  %v1116_v21 = vpop.f32.mrf.mxu0  ;;  %v1834_v15 = vmul.f32 %v3102_v51, %v1798_v3  ;;  %v718_v62 = vcvt.s32.f32 %v590_v9 }
 0x10b   : > { %v1205_v60 = vpop.f32.mrf.mxu1  ;;  %v722_v17 = vcvt.s32.f32 %v594_v6  ;;  %v719_v26 = vcvt.s32.f32 %v591_v19 }
 0x10c   : > { %2597 = vst [vmem:[%s3147_s28 + $0x20] sm:$0xff] %v2537_v23   ;;  %v1381_v46 = vadd.f32 %v1380_v40, %v1292_v34  ;;  %v1206_v28 = vadd.f32 %v1205_v60, %v1116_v21  ;;  %v1870_v41 = vadd.f32 %v3113_v49, %v1834_v15  ;;  %v2009_v23 = vpop.permute.xlu0 %2008  ;;  %v720_v34 = vcvt.s32.f32 %v592_v7 }
 0x10d   : > { %1155 = vmatmul.bf16.gmra.mxu0 %v781_v61  ;;  %v723_v61 = vcvt.s32.f32 %v595_v5  ;;  %v724_v40 = vcvt.s32.f32 %v596_v32 }
 0x10e   : > { %v1735_v35 = vmul.f32 %v2966_v52, %v1381_v46  ;;  %1244 = vmatmul.bf16.gmra.mxu1 %v782_v53  ;;  %1333 = vmatmul.bf16.gmra.mxu2 %v783_v20  ;;  %v1902_v8 = vmax.f32 %v1870_v41, 0.0 }
 0x10f   : > { %1422 = vmatmul.bf16.gmra.mxu3 %v784_v45  ;;  %v785_v45 = vpack.c.bf16 %v721_v58, %v717_v27  ;;  %v2019_v27 = vpop.permute.xlu2 %2018 }
 0x110   : > { %v1799_v50 = vadd.f32 %v1767_v33, %v1735_v35  ;;  %v2126_v14 = vmul.f32 %v2009_v23, %v1902_v8 }
 0x111   : > { %v1294_v12 = vpop.f32.mrf.mxu2 }
 0x112   : > { %v1835_v47 = vmul.f32 %v3102_v51, %v1799_v50  ;;  %v1295_v52 = vadd.f32 %v1294_v12, %v1206_v28  ;;  %v1383_v25 = vpop.f32.mrf.mxu3  ;;  %v1118_v57 = vpop.f32.mrf.mxu0  ;;  %v786_v28 = vpack.c.bf16 %v722_v17, %v718_v62  ;;  %v788_v50 = vpack.c.bf16 %v724_v40, %v720_v34 }
 0x113   : > { %v1207_v48 = vpop.f32.mrf.mxu1 }
 0x114   : > { %v1871_v42 = vadd.f32 %v3113_v49, %v1835_v47  ;;  %v1384_v59 = vadd.f32 %v1383_v25, %v1295_v52  ;;  %v1208_v20 = vadd.f32 %v1207_v48, %v1118_v57  ;;  %v2024_v58 = vpop.permute.xlu0 %2023 }
 0x116   : > { %v1903_v3 = vmax.f32 %v1871_v42, 0.0  ;;  %v1736_v18 = vmul.f32 %v3017_v44, %v1384_v59  ;;  %v787_v44 = vpack.c.bf16 %v723_v61, %v719_v26 }
 0x118   : > { %v2127_v21 = vmul.f32 %v2014_v22, %v1903_v3  ;;  %v1800_v53 = vadd.f32 %v1768_v10, %v1736_v18 }
 0x119   : > { %v1296_v60 = vpop.f32.mrf.mxu2 }
 0x11a   : > { %v2542_v15 = vpack.c.bf16 %v2127_v21, %v2126_v14  ;;  %v1297_v46 = vadd.f32 %v1296_v60, %v1208_v20  ;;  %v1385_v33 = vpop.f32.mrf.mxu3  ;;  %v1121_v35 = vpop.f32.mrf.mxu0  ;;  %v1836_v12 = vmul.f32 %v3102_v51, %v1800_v53  ;;  %v1771_v53 = vld [vmem:[%s3083_s14 + $0x78] sm:$0xff] }
 0x11b   : > { %v1210_v41 = vpop.f32.mrf.mxu1 }
 0x11c   : > { %2598 = vst [vmem:[%s3147_s28 + $0x28] sm:$0xff] %v2542_v15   ;;  %v1386_v4 = vadd.f32 %v1385_v33, %v1297_v46  ;;  %v1211_v6 = vadd.f32 %v1210_v41, %v1121_v35  ;;  %v1872_v47 = vadd.f32 %v3113_v49, %v1836_v12 }
 0x11d   : > { %1160 = vmatmul.bf16.gmra.mxu0 %v785_v45 }
 0x11e   : > { %v1737_v9 = vmul.f32 %v3015_v43, %v1386_v4  ;;  %1249 = vmatmul.bf16.gmra.mxu1 %v786_v28  ;;  %1338 = vmatmul.bf16.gmra.mxu2 %v787_v44  ;;  %v1904_v32 = vmax.f32 %v1872_v47, 0.0  ;;  %v1770_v43 = vld [vmem:[%s3083_s14 + $0x70] sm:$0xff]  ;;  %v1772_v4 = vld [vmem:[%s3083_s14 + $0x80] sm:$0xff] }
 0x11f   : > { %1427 = vmatmul.bf16.gmra.mxu3 %v788_v50 }
 0x120   : > { %v1801_v52 = vadd.f32 %v1769_v56, %v1737_v9  ;;  %v2128_v62 = vmul.f32 %v2019_v27, %v1904_v32  ;;  %v2034_v9 = vpop.permute.xlu2 %2033 }
 0x121   : > { %v1299_v25 = vpop.f32.mrf.mxu2 }
 0x122   : > { %v1837_v57 = vmul.f32 %v3102_v51, %v1801_v52  ;;  %v1300_v19 = vadd.f32 %v1299_v25, %v1211_v6  ;;  %v1388_v5 = vpop.f32.mrf.mxu3  ;;  %v1123_v48 = vpop.f32.mrf.mxu0 }
 0x123   : > { %v1212_v7 = vpop.f32.mrf.mxu1  ;;  %v2029_v6 = vpop.permute.xlu1 %2028 }
 0x124   : > { %v1873_v8 = vadd.f32 %v3113_v49, %v1837_v57  ;;  %v1389_v42 = vadd.f32 %v1388_v5, %v1300_v19  ;;  %v1213_v18 = vadd.f32 %v1212_v7, %v1123_v48 }
 0x126   : > { %v1905_v59 = vmax.f32 %v1873_v8, 0.0  ;;  %v1738_v10 = vmul.f32 %v2981_v11, %v1389_v42 }
 0x128   : > { %v2129_v17 = vmul.f32 %v2024_v58, %v1905_v59  ;;  %v1802_v3 = vadd.f32 %v1770_v43, %v1738_v10  ;;  %v1773_v59 = vld [vmem:[%s3083_s14 + $0x88] sm:$0xff] }
 0x129   : > { %v1301_v26 = vpop.f32.mrf.mxu2 }
 0x12a   : > { %v2547_v61 = vpack.c.bf16 %v2129_v17, %v2128_v62  ;;  %v1302_v22 = vadd.f32 %v1301_v26, %v1213_v18  ;;  %v1390_v23 = vpop.f32.mrf.mxu3  ;;  %v1126_v34 = vpop.f32.mrf.mxu0  ;;  %v1838_v14 = vmul.f32 %v3102_v51, %v1802_v3 }
 0x12b   : > { %v1215_v40 = vpop.f32.mrf.mxu1 }
 0x12c   : > { %2599 = vst [vmem:[%s3147_s28 + $0x30] sm:$0xff] %v2547_v61   ;;  %v1391_v21 = vadd.f32 %v1390_v23, %v1302_v22  ;;  %v1216_v20 = vadd.f32 %v1215_v40, %v1126_v34  ;;  %v1874_v60 = vadd.f32 %v3113_v49, %v1838_v14  ;;  %v1774_v40 = vld [vmem:[%s3083_s14 + $0x90] sm:$0xff] }
 0x12e   : > { %v1739_v11 = vmul.f32 %v3026_v2, %v1391_v21  ;;  %v1906_v41 = vmax.f32 %v1874_v60, 0.0  ;;  %v2044_v21 = vpop.permute.xlu1 %2043 }
 0x130   : > { %v1803_v45 = vadd.f32 %v1771_v53, %v1739_v11  ;;  %v2130_v47 = vmul.f32 %v2029_v6, %v1906_v41  ;;  %v2039_v53 = vpop.permute.xlu0 %2038 }
 0x131   : > { %v1304_v15 = vpop.f32.mrf.mxu2 }
 0x132   : > { %v1839_v46 = vmul.f32 %v3102_v51, %v1803_v45  ;;  %v1305_v33 = vadd.f32 %v1304_v15, %v1216_v20  ;;  %v1393_v35 = vpop.f32.mrf.mxu3  ;;  %v1128_v28 = vpop.f32.mrf.mxu0 }
 0x133   : > { %v1217_v44 = vpop.f32.mrf.mxu1 }
 0x134   : > { %v1875_v50 = vadd.f32 %v3113_v49, %v1839_v46  ;;  %v1394_v12 = vadd.f32 %v1393_v35, %v1305_v33  ;;  %v1218_v57 = vadd.f32 %v1217_v44, %v1128_v28 }
 0x136   : > { %v1907_v56 = vmax.f32 %v1875_v50, 0.0  ;;  %v1740_v2 = vmul.f32 %v3024_v1, %v1394_v12  ;;  %v1775_v12 = vld [vmem:[%s3083_s14 + $0x98] sm:$0xff] }
 0x138   : > { %v2131_v52 = vmul.f32 %v2034_v9, %v1907_v56  ;;  %v1804_v25 = vadd.f32 %v1772_v4, %v1740_v2 }
 0x139   : > { %v1306_v19 = vpop.f32.mrf.mxu2 }
 0x13a   : > { %v2552_v5 = vpack.c.bf16 %v2131_v52, %v2130_v47  ;;  %v1307_v48 = vadd.f32 %v1306_v19, %v1218_v57  ;;  %v1395_v7 = vpop.f32.mrf.mxu3  ;;  %v1131_v32 = vpop.f32.mrf.mxu0  ;;  %v1840_v42 = vmul.f32 %v3102_v51, %v1804_v25 }
 0x13b   : > { %v1220_v8 = vpop.f32.mrf.mxu1 }
 0x13c   : > { %2600 = vst [vmem:[%s3147_s28 + $0x38] sm:$0xff] %v2552_v5   ;;  %v1396_v43 = vadd.f32 %v1395_v7, %v1307_v48  ;;  %v1221_v10 = vadd.f32 %v1220_v8, %v1131_v32  ;;  %v1876_v27 = vadd.f32 %v3113_v49, %v1840_v42  ;;  %v1776_v7 = vld [vmem:[%s3083_s14 + $0xa0] sm:$0xff]  ;;  %v2049_v8 = vpop.permute.xlu2 %2048  ;;  %v2054_v42 = vpop.permute.xlu0 %2053 }
 0x13e   : > { %v1741_v1 = vmul.f32 %v3011_v38, %v1396_v43  ;;  %v1908_v22 = vmax.f32 %v1876_v27, 0.0 }
 0x140   : > { %v1805_v58 = vadd.f32 %v1773_v59, %v1741_v1  ;;  %v2132_v11 = vmul.f32 %v2039_v53, %v1908_v22  ;;  %v1777_v22 = vld [vmem:[%s3083_s14 + $0xa8] sm:$0xff] }
 0x141   : > { %v1309_v62 = vpop.f32.mrf.mxu2 }
 0x142   : > { %v1841_v17 = vmul.f32 %v3102_v51, %v1805_v58  ;;  %v1310_v3 = vadd.f32 %v1309_v62, %v1221_v10  ;;  %v1398_v18 = vpop.f32.mrf.mxu3  ;;  %v1133_v26 = vpop.f32.mrf.mxu0 }
 0x143   : > { %v1222_v61 = vpop.f32.mrf.mxu1 }
 0x144   : > { %v1877_v23 = vadd.f32 %v3113_v49, %v1841_v17  ;;  %v1399_v34 = vadd.f32 %v1398_v18, %v1310_v3  ;;  %v1223_v45 = vadd.f32 %v1222_v61, %v1133_v26 }
 0x146   : > { %v1909_v14 = vmax.f32 %v1877_v23, 0.0  ;;  %v1742_v38 = vmul.f32 %v3043_v30, %v1399_v34 }
 0x148   : > { %v2133_v20 = vmul.f32 %v2044_v21, %v1909_v14  ;;  %v1806_v60 = vadd.f32 %v1774_v40, %v1742_v38 }
 0x149   : > { %v1311_v15 = vpop.f32.mrf.mxu2 }
 0x14a   : > { %v2557_v46 = vpack.c.bf16 %v2133_v20, %v2132_v11  ;;  %v1312_v33 = vadd.f32 %v1311_v15, %v1223_v45  ;;  %v1400_v35 = vpop.f32.mrf.mxu3  ;;  %v1136_v28 = vpop.f32.mrf.mxu0  ;;  %v1842_v41 = vmul.f32 %v3102_v51, %v1806_v60 }
 0x14b   : > { %v1225_v44 = vpop.f32.mrf.mxu1 }
 0x14c   : > { %2601 = vst [vmem:[%s3147_s28 + $0x40] sm:$0xff] %v2557_v46   ;;  %v1401_v50 = vadd.f32 %v1400_v35, %v1312_v33  ;;  %v1226_v4 = vadd.f32 %v1225_v44, %v1136_v28  ;;  %v1878_v56 = vadd.f32 %v3113_v49, %v1842_v41  ;;  %v1778_v46 = vld [vmem:[%s3083_s14 + $0xb0] sm:$0xff]  ;;  %v2064_v35 = vpop.permute.xlu2 %2063  ;;  %v2059_v28 = vpop.permute.xlu1 %2058 }
 0x14e   : > { %v1743_v30 = vmul.f32 %v3041_v29, %v1401_v50  ;;  %v1910_v19 = vmax.f32 %v1878_v56, 0.0 }
 0x150   : > { %v1807_v2 = vadd.f32 %v1775_v12, %v1743_v30  ;;  %v2134_v43 = vmul.f32 %v2049_v8, %v1910_v19 }
 0x151   : > { %v1314_v9 = vpop.f32.mrf.mxu2 }
 0x152   : > { %v1843_v6 = vmul.f32 %v3102_v51, %v1807_v2  ;;  %v1315_v47 = vadd.f32 %v1314_v9, %v1226_v4  ;;  %v1403_v52 = vpop.f32.mrf.mxu3  ;;  %v1138_v25 = vpop.f32.mrf.mxu0 }
 0x153   : > { %v1227_v57 = vpop.f32.mrf.mxu1 }
 0x154   : > { %v1879_v5 = vadd.f32 %v3113_v49, %v1843_v6  ;;  %v1404_v48 = vadd.f32 %v1403_v52, %v1315_v47  ;;  %v1228_v10 = vadd.f32 %v1227_v57, %v1138_v25  ;;  %v1779_v25 = vld [vmem:[%s3083_s14 + $0xb8] sm:$0xff] }
 0x156   : > { %v1911_v32 = vmax.f32 %v1879_v5, 0.0  ;;  %v1744_v29 = vmul.f32 %v3022_v0, %v1404_v48 }
 0x158   : > { %v2135_v59 = vmul.f32 %v2054_v42, %v1911_v32  ;;  %v1808_v1 = vadd.f32 %v1776_v7, %v1744_v29 }
 0x159   : > { %v1316_v27 = vpop.f32.mrf.mxu2 }
 0x15a   : > { %v2562_v58 = vpack.c.bf16 %v2135_v59, %v2134_v43  ;;  %v1317_v62 = vadd.f32 %v1316_v27, %v1228_v10  ;;  %v1405_v17 = vpop.f32.mrf.mxu3  ;;  %v1141_v3 = vpop.f32.mrf.mxu0  ;;  %v1844_v26 = vmul.f32 %v3102_v51, %v1808_v1  ;;  %v1780_v10 = vld [vmem:[%s3083_s14 + $0xc0] sm:$0xff] }
 0x15b   : > { %v1230_v18 = vpop.f32.mrf.mxu1 }
 0x15c   : > { %2602 = vst [vmem:[%s3147_s28 + $0x48] sm:$0xff] %v2562_v58   ;;  %v1406_v61 = vadd.f32 %v1405_v17, %v1317_v62  ;;  %v1231_v23 = vadd.f32 %v1230_v18, %v1141_v3  ;;  %v1880_v34 = vadd.f32 %v3113_v49, %v1844_v26  ;;  %v2074_v58 = vpop.permute.xlu1 %2073  ;;  %v2069_v62 = vpop.permute.xlu0 %2068 }
 0x15e   : > { %v1745_v0 = vmul.f32 %v3050_v55, %v1406_v61  ;;  %v1912_v60 = vmax.f32 %v1880_v34, 0.0 }
 0x160   : > { %v1809_v40 = vadd.f32 %v1777_v22, %v1745_v0  ;;  %v2136_v44 = vmul.f32 %v2059_v28, %v1912_v60 }
 0x161   : > { %v1319_v14 = vpop.f32.mrf.mxu2 }
 0x162   : > { %v1845_v38 = vmul.f32 %v3102_v51, %v1809_v40  ;;  %v1320_v21 = vadd.f32 %v1319_v14, %v1231_v23  ;;  %v1408_v53 = vpop.f32.mrf.mxu3  ;;  %v1143_v11 = vpop.f32.mrf.mxu0 }
 0x163   : > { %v1232_v20 = vpop.f32.mrf.mxu1 }
 0x164   : > { %v1881_v45 = vadd.f32 %v3113_v49, %v1845_v38  ;;  %v1409_v15 = vadd.f32 %v1408_v53, %v1320_v21  ;;  %v1233_v12 = vadd.f32 %v1232_v20, %v1143_v11  ;;  %v1781_v21 = vld [vmem:[%s3083_s14 + $0xc8] sm:$0xff] }
 0x166   : > { %v1913_v33 = vmax.f32 %v1881_v45, 0.0  ;;  %v1746_v55 = vmul.f32 %v3048_v54, %v1409_v15 }
 0x168   : > { %v2137_v41 = vmul.f32 %v2064_v35, %v1913_v33  ;;  %v1810_v50 = vadd.f32 %v1778_v46, %v1746_v55 }
 0x169   : > { %v1321_v30 = vpop.f32.mrf.mxu2 }
 0x16a   : > { %v2567_v4 = vpack.c.bf16 %v2137_v41, %v2136_v44  ;;  %v1322_v56 = vadd.f32 %v1321_v30, %v1233_v12  ;;  %v1410_v2 = vpop.f32.mrf.mxu3  ;;  %v1146_v9 = vpop.f32.mrf.mxu0  ;;  %v1846_v47 = vmul.f32 %v3102_v51, %v1810_v50  ;;  %v1782_v41 = vld [vmem:[%s3083_s14 + $0xd0] sm:$0xff] }
 0x16b   : > { %v1235_v6 = vpop.f32.mrf.mxu1  ;;  %v2079_v12 = vpop.permute.xlu2 %2078 }
 0x16c   : > { %2603 = vst [vmem:[%s3147_s28 + $0x50] sm:$0xff] %v2567_v4   ;;  %v1411_v52 = vadd.f32 %v1410_v2, %v1322_v56  ;;  %v1236_v57 = vadd.f32 %v1235_v6, %v1146_v9  ;;  %v1882_v19 = vadd.f32 %v3113_v49, %v1846_v47  ;;  %v2084_v30 = vpop.permute.xlu0 %2083 }
 0x16e   : > { %v1747_v54 = vmul.f32 %v3045_v24, %v1411_v52  ;;  %v1914_v43 = vmax.f32 %v1882_v19, 0.0  ;;  %v1783_v19 = vld [vmem:[%s3083_s14 + $0xd8] sm:$0xff] }
 0x170   : > { %v1811_v5 = vadd.f32 %v1779_v25, %v1747_v54  ;;  %v2138_v17 = vmul.f32 %v2069_v62, %v1914_v43 }
 0x171   : > { %v1324_v48 = vpop.f32.mrf.mxu2 }
 0x172   : > { %v1847_v7 = vmul.f32 %v3102_v51, %v1811_v5  ;;  %v1325_v32 = vadd.f32 %v1324_v48, %v1236_v57  ;;  %v1413_v29 = vpop.f32.mrf.mxu3  ;;  %v1148_v8 = vpop.f32.mrf.mxu0 }
 0x173   : > { %v1237_v42 = vpop.f32.mrf.mxu1 }
 0x174   : > { %v1883_v59 = vadd.f32 %v3113_v49, %v1847_v7  ;;  %v1414_v1 = vadd.f32 %v1413_v29, %v1325_v32  ;;  %v1238_v26 = vadd.f32 %v1237_v42, %v1148_v8  ;;  %v3305_v7 = vld [vmem:[%s3344_s6] ss:$0 sm:$0xff] }
 0x176   : > { %v1915_v27 = vmax.f32 %v1883_v59, 0.0  ;;  %v1748_v24 = vmul.f32 %v3076_v39, %v1414_v1 }
 0x178   : > { %v2139_v3 = vmul.f32 %v2074_v58, %v1915_v27  ;;  %v1812_v18 = vadd.f32 %v1780_v10, %v1748_v24  ;;  %v1784_v58 = vld [vmem:[%s3083_s14 + $0xe0] sm:$0xff] }
 0x179   : > { %v1326_v61 = vpop.f32.mrf.mxu2 }
 0x17a   : > { %v2572_v22 = vpack.c.bf16 %v2139_v3, %v2138_v17  ;;  %v1327_v0 = vadd.f32 %v1326_v61, %v1238_v26  ;;  %v1415_v23 = vpop.f32.mrf.mxu3  ;;  %v1151_v34 = vpop.f32.mrf.mxu0  ;;  %v1848_v14 = vmul.f32 %v3102_v51, %v1812_v18 }
 0x17b   : > { %v1240_v40 = vpop.f32.mrf.mxu1  ;;  %v2094_v3 = vpop.permute.xlu2 %2093 }
 0x17c   : > { %2604 = vst [vmem:[%s3147_s28 + $0x58] sm:$0xff] %v2572_v22   ;;  %v1416_v38 = vadd.f32 %v1415_v23, %v1327_v0  ;;  %v1241_v53 = vadd.f32 %v1240_v40, %v1151_v34  ;;  %v1884_v11 = vadd.f32 %v3113_v49, %v1848_v14  ;;  %v2089_v18 = vpop.permute.xlu1 %2088 }
 0x17e   : > { %v1749_v39 = vmul.f32 %v3074_v37, %v1416_v38  ;;  %v1916_v35 = vmax.f32 %v1884_v11, 0.0  ;;  %v1785_v11 = vld [vmem:[%s3083_s14 + $0xe8] sm:$0xff] }
 0x180   : > { %v1813_v20 = vadd.f32 %v1781_v21, %v1749_v39  ;;  %v2140_v4 = vmul.f32 %v2079_v12, %v1916_v35 }
 0x181   : > { %v1329_v60 = vpop.f32.mrf.mxu2 }
 0x182   : > { %v1849_v45 = vmul.f32 %v3102_v51, %v1813_v20  ;;  %v1330_v15 = vadd.f32 %v1329_v60, %v1241_v53  ;;  %v1418_v46 = vpop.f32.mrf.mxu3  ;;  %v1153_v33 = vpop.f32.mrf.mxu0 }
 0x183   : > { %v1242_v55 = vpop.f32.mrf.mxu1 }
 0x184   : > { %v1885_v28 = vadd.f32 %v3113_v49, %v1849_v45  ;;  %v1419_v44 = vadd.f32 %v1418_v46, %v1330_v15  ;;  %v1243_v51 = vadd.f32 %v1242_v55, %v1153_v33  ;;  %v3297_v49 = vld [vmem:[%s3343_s5] ss:$0 sm:$0xff] }
 0x186   : > { %v1917_v50 = vmax.f32 %v1885_v28, 0.0  ;;  %v1750_v37 = vmul.f32 %v3064_v63, %v1419_v44 }
 0x188   : > { %v2141_v56 = vmul.f32 %v2084_v30, %v1917_v50  ;;  %v1814_v2 = vadd.f32 %v1782_v41, %v1750_v37  ;;  %v1786_v41 = vld [vmem:[%s3083_s14 + $0xf0] sm:$0xff]  ;;  %v2104_v30 = vpop.permute.xlu1 %2103 }
 0x189   : > { %v1331_v9 = vpop.f32.mrf.mxu2 }
 0x18a   : > { %v2577_v6 = vpack.c.bf16 %v2141_v56, %v2140_v4  ;;  %v1332_v47 = vadd.f32 %v1331_v9, %v1243_v51  ;;  %v1420_v52 = vpop.f32.mrf.mxu3  ;;  %v1156_v25 = vpop.f32.mrf.mxu0  ;;  %v1850_v63 = vmul.f32 %v3297_v49, %v1814_v2 }
 0x18b   : > { %v1245_v54 = vpop.f32.mrf.mxu1  ;;  %v2099_v4 = vpop.permute.xlu0 %2098 }
 0x18c   : > { %2605 = vst [vmem:[%s3147_s28 + $0x60] sm:$0xff] %v2577_v6   ;;  %v1421_v57 = vadd.f32 %v1420_v52, %v1332_v47  ;;  %v1246_v48 = vadd.f32 %v1245_v54, %v1156_v25  ;;  %v1886_v32 = vadd.f32 %v3305_v7, %v1850_v63 }
 0x18e   : > { %v1751_v5 = vmul.f32 %v3097_v36, %v1421_v57  ;;  %v1918_v27 = vmax.f32 %v1886_v32, 0.0  ;;  %v1787_v57 = vld [vmem:[%s3083_s14 + $0xf8] sm:$0xff] }
 0x190   : > { %v1815_v29 = vadd.f32 %v1783_v19, %v1751_v5  ;;  %v2142_v26 = vmul.f32 %v2089_v18, %v1918_v27  ;;  %v3348_v19 = vld [vmem:[#allocation3_spill] sm:$0xff] }
 0x191   : > { %v1334_v8 = vpop.f32.mrf.mxu2 }
 0x192   : > { %v1851_v42 = vmul.f32 %v3297_v49, %v1815_v29  ;;  %v1335_v43 = vadd.f32 %v1334_v8, %v1246_v48  ;;  %v1423_v59 = vpop.f32.mrf.mxu3  ;;  %v1158_v1 = vpop.f32.mrf.mxu0 }
 0x193   : > { %v1247_v10 = vpop.f32.mrf.mxu1 }
 0x194   : > { %v1887_v24 = vadd.f32 %v3305_v7, %v1851_v42  ;;  %v1424_v36 = vadd.f32 %v1423_v59, %v1335_v43  ;;  %v1248_v0 = vadd.f32 %v1247_v10, %v1158_v1  ;;  %v2109_v43 = vpop.permute.xlu2 %2108  ;;  %v2114_v59 = vpop.permute.xlu0 %2113 }
 0x196   : > { %v1919_v62 = vmax.f32 %v1887_v24, 0.0  ;;  %v1752_v17 = vmul.f32 %v3095_v31, %v1424_v36 }
 0x198   : > { %v2143_v61 = vmul.f32 %v2094_v3, %v1919_v62  ;;  %v1816_v22 = vadd.f32 %v1784_v58, %v1752_v17 }
 0x199   : > { %v1336_v23 = vpop.f32.mrf.mxu2 }
 0x19a   : > { %v2582_v34 = vpack.c.bf16 %v2143_v61, %v2142_v26  ;;  %v1337_v40 = vadd.f32 %v1336_v23, %v1248_v0  ;;  %v1425_v14 = vpop.f32.mrf.mxu3  ;;  %v1161_v38 = vpop.f32.mrf.mxu0  ;;  %v1852_v39 = vmul.f32 %v3297_v49, %v1816_v22 }
 0x19b   : > { %v1250_v21 = vpop.f32.mrf.mxu1 }
 0x19c   : > { %2606 = vst [vmem:[%s3147_s28 + $0x68] sm:$0xff] %v2582_v34   ;;  %v1426_v53 = vadd.f32 %v1425_v14, %v1337_v40  ;;  %v1251_v20 = vadd.f32 %v1250_v21, %v1161_v38  ;;  %v1888_v60 = vadd.f32 %v3305_v7, %v1852_v39 }
 0x19e   : > { %v1753_v31 = vmul.f32 %v3086_v16, %v1426_v53  ;;  %v1920_v35 = vmax.f32 %v1888_v60, 0.0 }
 0x1a0   : > { %v1817_v45 = vadd.f32 %v1785_v11, %v1753_v31  ;;  %v2144_v56 = vmul.f32 %v2099_v4, %v1920_v35 }
 0x1a1   : > { %v1339_v15 = vpop.f32.mrf.mxu2 }
 0x1a2   : > { %v1853_v46 = vmul.f32 %v3297_v49, %v1817_v45  ;;  %v1340_v33 = vadd.f32 %v1339_v15, %v1251_v20  ;;  %v1428_v55 = vpop.f32.mrf.mxu3  ;;  %v1163_v50 = vpop.f32.mrf.mxu0 }
 0x1a3   : > { %v1252_v37 = vpop.f32.mrf.mxu1 }
 0x1a4   : > { %v1889_v28 = vadd.f32 %v3305_v7, %v1853_v46  ;;  %v1429_v44 = vadd.f32 %v1428_v55, %v1340_v33  ;;  %v1253_v9 = vadd.f32 %v1252_v37, %v1163_v50 }
 0x1a6   : > { %v1921_v12 = vmax.f32 %v1889_v28, 0.0  ;;  %v1754_v16 = vmul.f32 %v3125_v13, %v1429_v44 }
 0x1a8   : > { %v2145_v2 = vmul.f32 %v2104_v30, %v1921_v12  ;;  %v1818_v51 = vadd.f32 %v1786_v41, %v1754_v16 }
 0x1a9   : > { %v1341_v6 = vpop.f32.mrf.mxu2 }
 0x1aa   : > { %v2587_v47 = vpack.c.bf16 %v2145_v2, %v2144_v56  ;;  %v1342_v52 = vadd.f32 %v1341_v6, %v1253_v9  ;;  %v1430_v25 = vpop.f32.mrf.mxu3  ;;  %v1854_v54 = vmul.f32 %v3297_v49, %v1818_v51 }
 0x1ac   : > { %2607 = vst [vmem:[%s3147_s28 + $0x70] sm:$0xff] %v2587_v47   ;;  %v1431_v63 = vadd.f32 %v1430_v25, %v1342_v52  ;;  %v1890_v13 = vadd.f32 %v3305_v7, %v1854_v54 }
 0x1ae   : > { %v1755_v5 = vmul.f32 %v3348_v19, %v1431_v63  ;;  %v1922_v29 = vmax.f32 %v1890_v13, 0.0 }
 0x1b0   : > { %v1819_v48 = vadd.f32 %v1787_v57, %v1755_v5  ;;  %v2146_v1 = vmul.f32 %v2109_v43, %v1922_v29 }
 0x1b2   : > { %v1855_v32 = vmul.f32 %v3297_v49, %v1819_v48 }
 0x1b4   : > { %v1891_v8 = vadd.f32 %v3305_v7, %v1855_v32 }
 0x1b6   : > { %v1923_v42 = vmax.f32 %v1891_v8, 0.0 }
 0x1b8   : > { %v2147_v10 = vmul.f32 %v2114_v59, %v1923_v42 }
 0x1ba   : > { %v2592_v27 = vpack.c.bf16 %v2147_v10, %v2146_v1 }
 0x1bc   : > { %2608 = vst [vmem:[%s3147_s28 + $0x78] sm:$0xff] %v2592_v27  }
 0x1bd PF: > { %s17_s26 = sadd.s32 1, %s2663_s26   ;;  %s3349_s24 = smov %s2659_s25 }
 0x1be   : > { %p14_p6 = scmp.ge.s32.totalorder %s17_s26, 4   ;;  %s3350_s25 = smov %s3352_s27 }
 0x1c0   :  { %16 = sbr.rel (!%p14_p6) target bundleno = 2 (0x2), region = 98 }

// kernel: graphsage_forward.7
= control target key start
LH: loop header
LB: loop body
LE: loop exit
PB: predicated region body
PF: predicated region fallthrough
CT: control target
= control target key end

     0   :  { %s2547_s24 = smov 0   ;;  %s2549_s25 = smov 0   ;;  %s3195_s0 = inlined_call_operand.vmem [shape: s8[512,512], index: 0, kind: input, shape index: {}]   ;;  %s3196_s1 = inlined_call_operand.vmem [shape: bf16[512,128], index: 1, kind: input, shape index: {}]   ;;  %s3197_s2 = inlined_call_operand.vmem [shape: f32[512,128], index: 2, kind: input, shape index: {}]   ;;  %s3198_s3 = inlined_call_operand.vmem [shape: f32[512,1], index: 3, kind: input, shape index: {}]   ;;  %s3199_s4 = inlined_call_operand.vmem [shape: f32[512,1], index: 4, kind: input, shape index: {}]   ;;  %s3200_s5 = inlined_call_operand.vmem [shape: f32[1,128], index: 5, kind: input, shape index: {}]   ;;  %s3201_s6 = inlined_call_operand.vmem [shape: f32[1,128], index: 6, kind: input, shape index: {}]   ;;  %s3202_s7 = inlined_call_operand.vmem [shape: f32[512,128], index: 7, kind: output, shape index: {}]  }
   0x1   :  { %s2551_s26 = smov 0  }
   0x2 LB: > { %s29_s27 = sadd.s32 1, %s2500_s25  ;;  %p2275_p0 = scmp.ge.s32.totalorder %s2504_s26, 1  ;;  %s2504_s26 = sphi %s2551_s26, %s17_s26   ;;  %s2500_s25 = sphi %s2549_s25, %s3211_s25   ;;  %s2496_s24 = sphi %s2547_s24, %s3210_s24  }
   0x3   : > { %p31_p1 = scmp.ge.s32.totalorder %s29_s27, 2  ;;  %p302_p2 = scmp.lt.s32.totalorder %s2504_s26, 3 }
   0x5   : > { %s3213_s27 = smov (%p31_p1, %s29_s27), 0  ;;  %p303_p3 = pnand %p2275_p0, %p302_p2 }
   0x7   : > { %306 = sbr.rel (%p303_p3) target bundleno = 441 (0x1b9), region = 48 }
   0xc   : > { %v2425_v0 = vld [vmem:[%s3196_s1 + $0x38] sm:$0xff]  ;;  %s2279_s11 = sshll.u32 %s2496_s24, 5  ;;  %v2506_v4 = vmov 0   ;;  %s2276_s14 = sshll.u32 %s2496_s24, 3  ;;  %v2424_v5 = vld [vmem:[%s3196_s1 + $0x30] sm:$0xff]  ;;  %v2423_v9 = vld [vmem:[%s3196_s1 + $0x28] sm:$0xff] }
   0xd   : > { %v2433_v1 = vld [vmem:[%s3196_s1 + $0x78] sm:$0xff]  ;;  %2477 = vset.pattern.permute.xlu2 %v2506_v4  ;;  %2476 = vset.pattern.permute.xlu1 %v2506_v4  ;;  %p378_p4 = scmp.lt.s32.totalorder %s2279_s11, 63  ;;  %v2432_v6 = vld [vmem:[%s3196_s1 + $0x70] sm:$0xff]  ;;  %p2593_p5 = scmp.lt.s32.totalorder %s2276_s14, 15  ;;  %v2431_v10 = vld [vmem:[%s3196_s1 + $0x68] sm:$0xff] }
   0xe   : > { %v2441_v2 = vld [vmem:[%s3196_s1 + $0xb8] sm:$0xff]  ;;  %1077 = vmatpush.bf16.msra.mxu0 %v2425_v0  ;;  %1166 = vmatpush.bf16.msra.mxu1 %v2433_v1  ;;  %v2440_v7 = vld [vmem:[%s3196_s1 + $0xb0] sm:$0xff]  ;;  %v2439_v11 = vld [vmem:[%s3196_s1 + $0xa8] sm:$0xff] }
   0xf   : > { %v2449_v3 = vld [vmem:[%s3196_s1 + $0xf8] sm:$0xff]  ;;  %1255 = vmatpush.bf16.msra.mxu2 %v2441_v2  ;;  %v2448_v8 = vld [vmem:[%s3196_s1 + $0xf0] sm:$0xff]  ;;  %s3215_s11 = smov (!%p378_p4, %s2279_s11), 63  ;;  %2475 = vset.pattern.permute.xlu0 %v2506_v4  ;;  %v2447_v12 = vld [vmem:[%s3196_s1 + $0xe8] sm:$0xff]  ;;  %s3217_s14 = smov (!%p2593_p5, %s2276_s14), 15 }
  0x10   : > { %1344 = vmatpush.bf16.msra.mxu3 %v2449_v3  ;;  %s2597_s24 = sshll.u32 %s3215_s11, 3  ;;  %v2422_v16 = vld [vmem:[%s3196_s1 + $0x20] sm:$0xff]  ;;  %s2417_s29 = sshll.u32 %s3217_s14, 5  ;;  %v2421_v23 = vld [vmem:[%s3196_s1 + $0x18] sm:$0xff]  ;;  %v2420_v27 = vld [vmem:[%s3196_s1 + $0x10] sm:$0xff] }
  0x11   : > { %s2606_s9 = scalar_lea.vmem %s3198_s3, %s2597_s24  ;;  %v2430_v17 = vld [vmem:[%s3196_s1 + $0x60] sm:$0xff]  ;;  %v2429_v24 = vld [vmem:[%s3196_s1 + $0x58] sm:$0xff]  ;;  %s2652_s18 = scalar_lea.vmem %s3195_s0, %s2417_s29  ;;  %v2428_v28 = vld [vmem:[%s3196_s1 + $0x50] sm:$0xff] }
  0x12   : > { %1078 = vmatpush.bf16.msra.mxu0 %v2424_v5  ;;  %1167 = vmatpush.bf16.msra.mxu1 %v2432_v6  ;;  %v1536_v13 = vld [vmem:[%s2606_s9 + $0x20] sm:$0xff]  ;;  %v1534_v14 = vld [vmem:[%s2606_s9 + $0x10] sm:$0xff]  ;;  %v1537_v20 = vld [vmem:[%s2606_s9 + $0x28] sm:$0xff]  ;;  %s2750_s10 = scalar_lea.vmem %s3199_s4, %s2597_s24  ;;  %s2879_s11 = scalar_lea.vmem %s3197_s2, %s2597_s24 }
  0x13   : > { %1256 = vmatpush.bf16.msra.mxu2 %v2440_v7  ;;  %v1532_v15 = vld [vmem:[%s2606_s9] sm:$0xff]  ;;  %1586 = vperm.xlu2 %2477, %v1536_v13   ;;  %v1535_v21 = vld [vmem:[%s2606_s9 + $0x18] sm:$0xff]  ;;  %v1533_v22 = vld [vmem:[%s2606_s9 + $0x8] sm:$0xff]  ;;  %s2916_s20 = scalar_lea.vmem %s3202_s7, %s2597_s24 }
  0x14   : > { %1345 = vmatpush.bf16.msra.mxu3 %v2448_v8  ;;  %1576 = vperm.xlu1 %2476, %v1534_v14   ;;  %v2438_v18 = vld [vmem:[%s3196_s1 + $0xa0] sm:$0xff]  ;;  %v2437_v25 = vld [vmem:[%s3196_s1 + $0x98] sm:$0xff]  ;;  %v2436_v29 = vld [vmem:[%s3196_s1 + $0x90] sm:$0xff] }
  0x15   : > { %1566 = vperm.xlu0 %2475, %v1532_v15   ;;  %v2446_v19 = vld [vmem:[%s3196_s1 + $0xe0] sm:$0xff]  ;;  %v2445_v26 = vld [vmem:[%s3196_s1 + $0xd8] sm:$0xff]  ;;  %v2444_v31 = vld [vmem:[%s3196_s1 + $0xd0] sm:$0xff] }
  0x16   : > { %1079 = vmatpush.bf16.msra.mxu0 %v2423_v9  ;;  %1168 = vmatpush.bf16.msra.mxu1 %v2431_v10  ;;  %v2664_v30 = vld [vmem:[%s2652_s18] sm:$0xff]  ;;  %v2670_v32 = vld [vmem:[%s2652_s18 + $0x8] sm:$0xff]  ;;  %v2673_v33 = vld [vmem:[%s2652_s18 + $0x10] sm:$0xff] }
  0x17   : > { %1257 = vmatpush.bf16.msra.mxu2 %v2439_v11  ;;  %v2676_v34 = vld [vmem:[%s2652_s18 + $0x18] sm:$0xff]  ;;  %v1540_v35 = vld [vmem:[%s2606_s9 + $0x40] sm:$0xff]  ;;  %v469_v37 = vunpack.c.0.s8 %v2664_v30  ;;  %v473_v38 = vunpack.c.1.s8 %v2664_v30  ;;  %v1538_v39 = vld [vmem:[%s2606_s9 + $0x30] sm:$0xff]  ;;  %v470_v42 = vunpack.c.0.s8 %v2670_v32  ;;  %v474_v43 = vunpack.c.1.s8 %v2670_v32 }
  0x18   : > { %1346 = vmatpush.bf16.msra.mxu3 %v2447_v12  ;;  %v1539_v36 = vld [vmem:[%s2606_s9 + $0x38] sm:$0xff]  ;;  %v2419_v40 = vld [vmem:[%s3196_s1 + $0x8] sm:$0xff]  ;;  %v471_v44 = vunpack.c.0.s8 %v2673_v33  ;;  %v475_v45 = vunpack.c.1.s8 %v2673_v33  ;;  %v472_v48 = vunpack.c.0.s8 %v2676_v34  ;;  %v476_v49 = vunpack.c.1.s8 %v2676_v34  ;;  %v2418_v52 = vld [vmem:[%s3196_s1] sm:$0xff] }
  0x19   : > { %v2427_v41 = vld [vmem:[%s3196_s1 + $0x48] sm:$0xff]  ;;  %v597_v50 = vcvt.s32.f32 %v469_v37  ;;  %v601_v51 = vcvt.s32.f32 %v473_v38  ;;  %v2426_v53 = vld [vmem:[%s3196_s1 + $0x40] sm:$0xff]  ;;  %v598_v54 = vcvt.s32.f32 %v470_v42  ;;  %v602_v55 = vcvt.s32.f32 %v474_v43  ;;  %v1543_v62 = vld [vmem:[%s2606_s9 + $0x58] sm:$0xff] }
  0x1a   : > { %1080 = vmatpush.bf16.msra.mxu0 %v2422_v16  ;;  %1169 = vmatpush.bf16.msra.mxu1 %v2430_v17  ;;  %v2435_v46 = vld [vmem:[%s3196_s1 + $0x88] sm:$0xff]  ;;  %v599_v56 = vcvt.s32.f32 %v471_v44  ;;  %v603_v57 = vcvt.s32.f32 %v475_v45  ;;  %v2434_v58 = vld [vmem:[%s3196_s1 + $0x80] sm:$0xff]  ;;  %v600_v60 = vcvt.s32.f32 %v472_v48  ;;  %v604_v61 = vcvt.s32.f32 %v476_v49  ;;  %v1542_v63 = vld [vmem:[%s2606_s9 + $0x50] sm:$0xff] }
  0x1b   : > { %1258 = vmatpush.bf16.msra.mxu2 %v2438_v18  ;;  %1591 = vperm.xlu2 %2477, %v1537_v20   ;;  %v2443_v47 = vld [vmem:[%s3196_s1 + $0xc8] sm:$0xff]  ;;  %v2442_v59 = vld [vmem:[%s3196_s1 + $0xc0] sm:$0xff]  ;;  %v725_v0 = vpack.c.bf16 %v601_v51, %v597_v50  ;;  %v726_v2 = vpack.c.bf16 %v602_v55, %v598_v54  ;;  %v1546_v5 = vld [vmem:[%s2606_s9 + $0x70] sm:$0xff]  ;;  %v477_v7 = vunpack.c.2.s8 %v2664_v30  ;;  %v481_v8 = vunpack.c.3.s8 %v2664_v30 }
  0x1c   : > { %1347 = vmatpush.bf16.msra.mxu3 %v2446_v19  ;;  %1581 = vperm.xlu1 %2476, %v1535_v21   ;;  %v1541_v1 = vld [vmem:[%s2606_s9 + $0x48] sm:$0xff]  ;;  %v727_v3 = vpack.c.bf16 %v603_v57, %v599_v56  ;;  %v728_v4 = vpack.c.bf16 %v604_v61, %v600_v60  ;;  %v1544_v9 = vld [vmem:[%s2606_s9 + $0x60] sm:$0xff]  ;;  %v478_v10 = vunpack.c.2.s8 %v2670_v32  ;;  %v482_v11 = vunpack.c.3.s8 %v2670_v32  ;;  %v1555_v54 = vld [vmem:[%s2606_s9 + $0xb8] sm:$0xff] }
  0x1d   : > { %1571 = vperm.xlu0 %2475, %v1533_v22   ;;  %v1545_v6 = vld [vmem:[%s2606_s9 + $0x68] sm:$0xff]  ;;  %v479_v12 = vunpack.c.2.s8 %v2673_v33  ;;  %v483_v13 = vunpack.c.3.s8 %v2673_v33  ;;  %v480_v14 = vunpack.c.2.s8 %v2676_v34  ;;  %v484_v15 = vunpack.c.3.s8 %v2676_v34  ;;  %v443_v33 = vld [vmem:[%s2652_s18 + $0x30] sm:$0xff]  ;;  %v444_v34 = vld [vmem:[%s2652_s18 + $0x38] sm:$0xff] }
  0x1e   : > { %1081 = vmatpush.bf16.msra.mxu0 %v2421_v23  ;;  %1170 = vmatpush.bf16.msra.mxu1 %v2429_v24  ;;  %v605_v16 = vcvt.s32.f32 %v477_v7  ;;  %v609_v17 = vcvt.s32.f32 %v481_v8  ;;  %v606_v18 = vcvt.s32.f32 %v478_v10  ;;  %v610_v19 = vcvt.s32.f32 %v482_v11  ;;  %v1549_v24 = vld [vmem:[%s2606_s9 + $0x88] sm:$0xff]  ;;  %v1554_v55 = vld [vmem:[%s2606_s9 + $0xb0] sm:$0xff] }
  0x1f   : > { %1259 = vmatpush.bf16.msra.mxu2 %v2437_v25  ;;  %v607_v20 = vcvt.s32.f32 %v479_v12  ;;  %v611_v21 = vcvt.s32.f32 %v483_v13  ;;  %v608_v22 = vcvt.s32.f32 %v480_v14  ;;  %v612_v23 = vcvt.s32.f32 %v484_v15  ;;  %v1548_v25 = vld [vmem:[%s2606_s9 + $0x80] sm:$0xff]  ;;  %v442_v32 = vld [vmem:[%s2652_s18 + $0x28] sm:$0xff]  ;;  %v1558_v61 = vld [vmem:[%s2606_s9 + $0xd0] sm:$0xff] }
  0x20   : > { %1348 = vmatpush.bf16.msra.mxu3 %v2445_v26  ;;  %v729_v26 = vpack.c.bf16 %v609_v17, %v605_v16  ;;  %v487_v42 = vunpack.c.0.s8 %v443_v33  ;;  %v491_v43 = vunpack.c.1.s8 %v443_v33  ;;  %v488_v44 = vunpack.c.0.s8 %v444_v34  ;;  %v1553_v57 = vld [vmem:[%s2606_s9 + $0xa8] sm:$0xff]  ;;  %v1560_v17 = vld [vmem:[%s2606_s9 + $0xe0] sm:$0xff] }
  0x21   : > { %v732_v30 = vpack.c.bf16 %v612_v23, %v608_v22  ;;  %v492_v45 = vunpack.c.1.s8 %v444_v34  ;;  %v500_v7 = vunpack.c.3.s8 %v444_v34  ;;  %v1561_v16 = vld [vmem:[%s2606_s9 + $0xe8] sm:$0xff]  ;;  %v445_v23 = vld [vmem:[%s2652_s18 + $0x40] sm:$0xff] }
  0x22   : > { %1082 = vmatpush.bf16.msra.mxu0 %v2420_v27  ;;  %1171 = vmatpush.bf16.msra.mxu1 %v2428_v28  ;;  %v1547_v27 = vld [vmem:[%s2606_s9 + $0x78] sm:$0xff]  ;;  %v730_v28 = vpack.c.bf16 %v610_v19, %v606_v18  ;;  %v615_v50 = vcvt.s32.f32 %v487_v42  ;;  %v619_v51 = vcvt.s32.f32 %v491_v43 }
  0x23   : > { %1260 = vmatpush.bf16.msra.mxu2 %v2436_v29  ;;  %1606 = vperm.xlu2 %2477, %v1540_v35   ;;  %v731_v29 = vpack.c.bf16 %v611_v21, %v607_v20  ;;  %v1552_v35 = vld [vmem:[%s2606_s9 + $0xa0] sm:$0xff]  ;;  %v628_v15 = vcvt.s32.f32 %v500_v7  ;;  %v1559_v19 = vld [vmem:[%s2606_s9 + $0xd8] sm:$0xff] }
  0x24   : > { %1349 = vmatpush.bf16.msra.mxu3 %v2444_v31  ;;  %1601 = vperm.xlu1 %2476, %v1539_v36   ;;  %v441_v31 = vld [vmem:[%s2652_s18 + $0x20] sm:$0xff]  ;;  %v1551_v36 = vld [vmem:[%s2606_s9 + $0x98] sm:$0xff] }
  0x25   : > { %1596 = vperm.xlu0 %2475, %v1538_v39   ;;  %v485_v37 = vunpack.c.0.s8 %v441_v31  ;;  %v489_v38 = vunpack.c.1.s8 %v441_v31  ;;  %v1550_v39 = vld [vmem:[%s2606_s9 + $0x90] sm:$0xff] }
  0x26   : > { %1083 = vmatpush.bf16.msra.mxu0 %v2419_v40  ;;  %1172 = vmatpush.bf16.msra.mxu1 %v2427_v41  ;;  %v486_v40 = vunpack.c.0.s8 %v442_v32  ;;  %v490_v41 = vunpack.c.1.s8 %v442_v32 }
  0x27   : > { %1261 = vmatpush.bf16.msra.mxu2 %v2435_v46  ;;  %v613_v46 = vcvt.s32.f32 %v485_v37 }
  0x28   : > { %1350 = vmatpush.bf16.msra.mxu3 %v2443_v47  ;;  %v617_v47 = vcvt.s32.f32 %v489_v38  ;;  %v614_v48 = vcvt.s32.f32 %v486_v40  ;;  %v618_v49 = vcvt.s32.f32 %v490_v41 }
  0x2a   : > { %1084 = vmatpush.bf16.msra.mxu0 %v2418_v52  ;;  %1173 = vmatpush.bf16.msra.mxu1 %v2426_v53  ;;  %v616_v52 = vcvt.s32.f32 %v488_v44  ;;  %v620_v53 = vcvt.s32.f32 %v492_v45  ;;  %v733_v56 = vpack.c.bf16 %v617_v47, %v613_v46  ;;  %v1894_v46 = vld [vmem:[%s2750_s10 + $0x10] sm:$0xff] }
  0x2b   : > { %1262 = vmatpush.bf16.msra.mxu2 %v2434_v58  ;;  %1621 = vperm.xlu2 %2477, %v1543_v62   ;;  %v734_v58 = vpack.c.bf16 %v618_v49, %v614_v48  ;;  %v1557_v62 = vld [vmem:[%s2606_s9 + $0xc8] sm:$0xff]  ;;  %v1895_v48 = vld [vmem:[%s2750_s10 + $0x18] sm:$0xff] }
  0x2c   : > { %1351 = vmatpush.bf16.msra.mxu3 %v2442_v59  ;;  %1616 = vperm.xlu1 %2476, %v1542_v63   ;;  %v735_v59 = vpack.c.bf16 %v619_v51, %v615_v50  ;;  %v736_v60 = vpack.c.bf16 %v620_v53, %v616_v52  ;;  %v493_v63 = vunpack.c.2.s8 %v441_v31  ;;  %v1893_v49 = vld [vmem:[%s2750_s10 + $0x8] sm:$0xff] }
  0x2d   : > { %1611 = vperm.xlu0 %2475, %v1541_v1   ;;  %1085 = vmatmul.bf16.vlgmr.msra.gmra.mxu0 %v725_v0  ;;  %v497_v0 = vunpack.c.3.s8 %v441_v31  ;;  %v1556_v1 = vld [vmem:[%s2606_s9 + $0xc0] sm:$0xff]  ;;  %v1562_v31 = vld [vmem:[%s2606_s9 + $0xf0] sm:$0xff] }
  0x2e   : > { %1174 = vmatmul.bf16.vlgmr.msra.gmra.mxu1 %v726_v2  ;;  %1263 = vmatmul.bf16.vlgmr.msra.gmra.mxu2 %v727_v3  ;;  %v494_v2 = vunpack.c.2.s8 %v442_v32  ;;  %v498_v3 = vunpack.c.3.s8 %v442_v32  ;;  %v621_v8 = vcvt.s32.f32 %v493_v63 }
  0x2f   : > { %1352 = vmatmul.bf16.vlgmr.msra.gmra.mxu3 %v728_v4  ;;  %v495_v4 = vunpack.c.2.s8 %v443_v33 }
  0x30   : > { %v622_v10 = vcvt.s32.f32 %v494_v2  ;;  %v626_v11 = vcvt.s32.f32 %v498_v3 }
  0x31   : > { %v623_v12 = vcvt.s32.f32 %v495_v4 }
  0x32   : > { %v738_v20 = vpack.c.bf16 %v626_v11, %v622_v10  ;;  %v1900_v10 = vld [vmem:[%s2750_s10 + $0x40] sm:$0xff] }
  0x33   : > { %1636 = vperm.xlu2 %2477, %v1546_v5   ;;  %v499_v5 = vunpack.c.3.s8 %v443_v33 }
  0x34   : > { %1631 = vperm.xlu1 %2476, %v1545_v6   ;;  %v496_v6 = vunpack.c.2.s8 %v444_v34 }
  0x35   : > { %1626 = vperm.xlu0 %2475, %v1544_v9   ;;  %v625_v9 = vcvt.s32.f32 %v497_v0  ;;  %v627_v13 = vcvt.s32.f32 %v499_v5 }
  0x36   : > { %v624_v14 = vcvt.s32.f32 %v496_v6 }
  0x37   : > { %v737_v18 = vpack.c.bf16 %v625_v9, %v621_v8  ;;  %v739_v21 = vpack.c.bf16 %v627_v13, %v623_v12  ;;  %v1901_v12 = vld [vmem:[%s2750_s10 + $0x48] sm:$0xff]  ;;  %v1899_v13 = vld [vmem:[%s2750_s10 + $0x38] sm:$0xff] }
  0x38   : > { %v740_v22 = vpack.c.bf16 %v628_v15, %v624_v14 }
  0x3b   : > { %1651 = vperm.xlu2 %2477, %v1549_v24   ;;  %v446_v24 = vld [vmem:[%s2652_s18 + $0x48] sm:$0xff] }
  0x3c   : > { %1646 = vperm.xlu1 %2476, %v1548_v25   ;;  %v447_v25 = vld [vmem:[%s2652_s18 + $0x50] sm:$0xff]  ;;  %v502_v32 = vunpack.c.0.s8 %v446_v24  ;;  %v506_v33 = vunpack.c.1.s8 %v446_v24 }
  0x3d   : > { %1641 = vperm.xlu0 %2475, %v1547_v27   ;;  %1090 = vmatmul.bf16.gmra.mxu0 %v729_v26  ;;  %v448_v26 = vld [vmem:[%s2652_s18 + $0x58] sm:$0xff]  ;;  %v1892_v27 = vld [vmem:[%s2750_s10] sm:$0xff]  ;;  %v503_v34 = vunpack.c.0.s8 %v447_v25 }
  0x3e   : > { %1179 = vmatmul.bf16.gmra.mxu1 %v730_v28  ;;  %1268 = vmatmul.bf16.gmra.mxu2 %v731_v29  ;;  %v1563_v28 = vld [vmem:[%s2606_s9 + $0xf8] sm:$0xff]  ;;  %v501_v29 = vunpack.c.0.s8 %v445_v23  ;;  %v508_v37 = vunpack.c.1.s8 %v448_v26  ;;  %v630_v40 = vcvt.s32.f32 %v502_v32  ;;  %v634_v41 = vcvt.s32.f32 %v506_v33 }
  0x3f   : > { %1357 = vmatmul.bf16.gmra.mxu3 %v732_v30  ;;  %v505_v30 = vunpack.c.1.s8 %v445_v23  ;;  %v631_v42 = vcvt.s32.f32 %v503_v34  ;;  %v512_v63 = vunpack.c.2.s8 %v448_v26  ;;  %v516_v0 = vunpack.c.3.s8 %v448_v26 }
  0x40   : > { %v629_v38 = vcvt.s32.f32 %v501_v29  ;;  %v636_v45 = vcvt.s32.f32 %v508_v37  ;;  %v742_v50 = vpack.c.bf16 %v634_v41, %v630_v40 }
  0x41   : > { %v640_v8 = vcvt.s32.f32 %v512_v63  ;;  %v644_v9 = vcvt.s32.f32 %v516_v0 }
  0x43   : > { %1666 = vperm.xlu2 %2477, %v1552_v35   ;;  %v507_v35 = vunpack.c.1.s8 %v447_v25 }
  0x44   : > { %1661 = vperm.xlu1 %2476, %v1551_v36   ;;  %v504_v36 = vunpack.c.0.s8 %v448_v26  ;;  %v1902_v26 = vld [vmem:[%s2750_s10 + $0x50] sm:$0xff] }
  0x45   : > { %1656 = vperm.xlu0 %2475, %v1550_v39   ;;  %v633_v39 = vcvt.s32.f32 %v505_v30  ;;  %v635_v43 = vcvt.s32.f32 %v507_v35 }
  0x46   : > { %v632_v44 = vcvt.s32.f32 %v504_v36 }
  0x47   : > { %v741_v47 = vpack.c.bf16 %v633_v39, %v629_v38  ;;  %v743_v51 = vpack.c.bf16 %v635_v43, %v631_v42 }
  0x48   : > { %v744_v52 = vpack.c.bf16 %v636_v45, %v632_v44  ;;  %v1906_v44 = vld [vmem:[%s2750_s10 + $0x70] sm:$0xff] }
  0x4b   : > { %1681 = vperm.xlu2 %2477, %v1555_v54   ;;  %v1897_v54 = vld [vmem:[%s2750_s10 + $0x28] sm:$0xff] }
  0x4c   : > { %1676 = vperm.xlu1 %2476, %v1554_v55   ;;  %v1898_v55 = vld [vmem:[%s2750_s10 + $0x30] sm:$0xff] }
  0x4d   : > { %1671 = vperm.xlu0 %2475, %v1553_v57   ;;  %1095 = vmatmul.bf16.gmra.mxu0 %v733_v56  ;;  %v509_v56 = vunpack.c.2.s8 %v445_v23  ;;  %v513_v57 = vunpack.c.3.s8 %v445_v23  ;;  %v1904_v23 = vld [vmem:[%s2750_s10 + $0x60] sm:$0xff] }
  0x4e   : > { %1184 = vmatmul.bf16.gmra.mxu1 %v734_v58  ;;  %1273 = vmatmul.bf16.gmra.mxu2 %v735_v59  ;;  %v1896_v58 = vld [vmem:[%s2750_s10 + $0x20] sm:$0xff]  ;;  %v510_v59 = vunpack.c.2.s8 %v446_v24 }
  0x4f   : > { %1362 = vmatmul.bf16.gmra.mxu3 %v736_v60  ;;  %v514_v60 = vunpack.c.3.s8 %v446_v24  ;;  %v641_v2 = vcvt.s32.f32 %v513_v57 }
  0x50   : > { %v638_v4 = vcvt.s32.f32 %v510_v59  ;;  %v1908_v59 = vld [vmem:[%s2750_s10 + $0x80] sm:$0xff] }
  0x51   : > { %v642_v5 = vcvt.s32.f32 %v514_v60 }
  0x53   : > { %1696 = vperm.xlu2 %2477, %v1558_v61   ;;  %v511_v61 = vunpack.c.2.s8 %v447_v25  ;;  %v746_v14 = vpack.c.bf16 %v642_v5, %v638_v4 }
  0x54   : > { %1691 = vperm.xlu1 %2476, %v1557_v62   ;;  %v515_v62 = vunpack.c.3.s8 %v447_v25 }
  0x55   : > { %1686 = vperm.xlu0 %2475, %v1556_v1   ;;  %v637_v1 = vcvt.s32.f32 %v509_v56  ;;  %v639_v6 = vcvt.s32.f32 %v511_v61  ;;  %v1910_v56 = vld [vmem:[%s2750_s10 + $0x90] sm:$0xff] }
  0x56   : > { %v643_v7 = vcvt.s32.f32 %v515_v62 }
  0x57   : > { %v745_v11 = vpack.c.bf16 %v641_v2, %v637_v1 }
  0x58   : > { %v747_v15 = vpack.c.bf16 %v643_v7, %v639_v6 }
  0x5b   : > { %1711 = vperm.xlu2 %2477, %v1561_v16   ;;  %v748_v16 = vpack.c.bf16 %v644_v9, %v640_v8 }
  0x5c   : > { %1706 = vperm.xlu1 %2476, %v1560_v17  }
  0x5d   : > { %1701 = vperm.xlu0 %2475, %v1559_v19   ;;  %1100 = vmatmul.bf16.gmra.mxu0 %v737_v18  ;;  %v449_v18 = vld [vmem:[%s2652_s18 + $0x60] sm:$0xff]  ;;  %v2776_v19 = vld [vmem:[%s2652_s18 + $0x68] sm:$0xff] }
  0x5e   : > { %1189 = vmatmul.bf16.gmra.mxu1 %v738_v20  ;;  %1278 = vmatmul.bf16.gmra.mxu2 %v739_v21  ;;  %v2779_v20 = vld [vmem:[%s2652_s18 + $0x70] sm:$0xff]  ;;  %v2782_v21 = vld [vmem:[%s2652_s18 + $0x78] sm:$0xff]  ;;  %v517_v24 = vunpack.c.0.s8 %v449_v18  ;;  %v521_v25 = vunpack.c.1.s8 %v449_v18  ;;  %v525_v57 = vunpack.c.2.s8 %v449_v18  ;;  %v526_v60 = vunpack.c.2.s8 %v2776_v19 }
  0x5f   : > { %1367 = vmatmul.bf16.gmra.mxu3 %v740_v22  ;;  %v1903_v22 = vld [vmem:[%s2750_s10 + $0x58] sm:$0xff]  ;;  %v519_v29 = vunpack.c.0.s8 %v2779_v20  ;;  %v523_v30 = vunpack.c.1.s8 %v2779_v20  ;;  %v524_v32 = vunpack.c.1.s8 %v2782_v21  ;;  %v530_v61 = vunpack.c.3.s8 %v2776_v19 }
  0x60   : > { %v645_v33 = vcvt.s32.f32 %v517_v24  ;;  %v649_v34 = vcvt.s32.f32 %v521_v25  ;;  %v527_v62 = vunpack.c.2.s8 %v2779_v20  ;;  %v531_v63 = vunpack.c.3.s8 %v2779_v20  ;;  %v2831_v24 = vld [vmem:[%s2652_s18 + $0x80] sm:$0xff] }
  0x61   : > { %v647_v39 = vcvt.s32.f32 %v519_v29  ;;  %v651_v40 = vcvt.s32.f32 %v523_v30  ;;  %v652_v43 = vcvt.s32.f32 %v524_v32  ;;  %v528_v0 = vunpack.c.2.s8 %v2782_v21  ;;  %v1915_v29 = vld [vmem:[%s2750_s10 + $0xb8] sm:$0xff]  ;;  %v1916_v30 = vld [vmem:[%s2750_s10 + $0xc0] sm:$0xff] }
  0x62   : > { %v749_v45 = vpack.c.bf16 %v649_v34, %v645_v33  ;;  %v532_v1 = vunpack.c.3.s8 %v2782_v21  ;;  %v653_v2 = vcvt.s32.f32 %v525_v57  ;;  %v654_v7 = vcvt.s32.f32 %v526_v60  ;;  %v1914_v33 = vld [vmem:[%s2750_s10 + $0xb0] sm:$0xff]  ;;  %v1919_v60 = vld [vmem:[%s2750_s10 + $0xd8] sm:$0xff] }
  0x63   : > { %1926 = vperm.xlu2 %2477, %v1892_v27   ;;  %v518_v27 = vunpack.c.0.s8 %v2776_v19  ;;  %v658_v8 = vcvt.s32.f32 %v530_v61  ;;  %v655_v9 = vcvt.s32.f32 %v527_v62  ;;  %v537_v32 = vunpack.c.1.s8 %v2831_v24  ;;  %v1917_v62 = vld [vmem:[%s2750_s10 + $0xc8] sm:$0xff] }
  0x64   : > { %1721 = vperm.xlu1 %2476, %v1563_v28   ;;  %v522_v28 = vunpack.c.1.s8 %v2776_v19 }
  0x65   : > { %1716 = vperm.xlu0 %2475, %v1562_v31   ;;  %v520_v31 = vunpack.c.0.s8 %v2782_v21  ;;  %v646_v37 = vcvt.s32.f32 %v518_v27  ;;  %v754_v19 = vpack.c.bf16 %v658_v8, %v654_v7  ;;  %v2839_v27 = vld [vmem:[%s2652_s18 + $0x90] sm:$0xff] }
  0x66   : > { %v650_v38 = vcvt.s32.f32 %v522_v28  ;;  %v2842_v28 = vld [vmem:[%s2652_s18 + $0x98] sm:$0xff] }
  0x67   : > { %v648_v42 = vcvt.s32.f32 %v520_v31  ;;  %v533_v31 = vunpack.c.0.s8 %v2831_v24 }
  0x6b   : > { %1941 = vperm.xlu2 %2477, %v1895_v48   ;;  %v750_v48 = vpack.c.bf16 %v650_v38, %v646_v37  ;;  %v535_v38 = vunpack.c.0.s8 %v2839_v27 }
  0x6c   : > { %1936 = vperm.xlu1 %2476, %v1894_v46   ;;  %v1907_v46 = vld [vmem:[%s2750_s10 + $0x78] sm:$0xff] }
  0x6d   : > { %1931 = vperm.xlu0 %2475, %v1893_v49   ;;  %1105 = vmatmul.bf16.gmra.mxu0 %v741_v47  ;;  %v2762_v53 = vpop.permute.xlu2 %1586  ;;  %v1905_v47 = vld [vmem:[%s2750_s10 + $0x68] sm:$0xff]  ;;  %v751_v49 = vpack.c.bf16 %v651_v40, %v647_v39  ;;  %v539_v39 = vunpack.c.1.s8 %v2839_v27  ;;  %v536_v40 = vunpack.c.0.s8 %v2842_v28 }
  0x6e   : > { %1194 = vmatmul.bf16.gmra.mxu1 %v742_v50  ;;  %1283 = vmatmul.bf16.gmra.mxu2 %v743_v51  ;;  %v752_v50 = vpack.c.bf16 %v652_v43, %v648_v42  ;;  %v540_v42 = vunpack.c.1.s8 %v2842_v28  ;;  %v661_v43 = vcvt.s32.f32 %v533_v31  ;;  %v547_v31 = vunpack.c.3.s8 %v2839_v27 }
  0x6f   : > { %1372 = vmatmul.bf16.gmra.mxu3 %v744_v52 }
  0x70   : > { %v668_v57 = vcvt.s32.f32 %v540_v42 }
  0x73   : > { %1956 = vperm.xlu2 %2477, %v1898_v55   ;;  %v1909_v55 = vld [vmem:[%s2750_s10 + $0x88] sm:$0xff] }
  0x74   : > { %1951 = vperm.xlu1 %2476, %v1897_v54  }
  0x75   : > { %1946 = vperm.xlu0 %2475, %v1896_v58   ;;  %v2767_v3 = vpop.permute.xlu2 %1591  ;;  %v529_v58 = vunpack.c.3.s8 %v449_v18  ;;  %v1911_v18 = vld [vmem:[%s2750_s10 + $0x98] sm:$0xff] }
  0x77   : > { %v657_v4 = vcvt.s32.f32 %v529_v58  ;;  %v1918_v58 = vld [vmem:[%s2750_s10 + $0xd0] sm:$0xff] }
  0x7b   : > { %1971 = vperm.xlu2 %2477, %v1901_v12   ;;  %v656_v12 = vcvt.s32.f32 %v528_v0 }
  0x7c   : > { %1966 = vperm.xlu1 %2476, %v1900_v10   ;;  %v659_v10 = vcvt.s32.f32 %v531_v63 }
  0x7d   : > { %1961 = vperm.xlu0 %2475, %v1899_v13   ;;  %1110 = vmatmul.bf16.gmra.mxu0 %v745_v11  ;;  %v2772_v17 = vpop.permute.xlu2 %1606  ;;  %v660_v13 = vcvt.s32.f32 %v532_v1 }
  0x7e   : > { %1199 = vmatmul.bf16.gmra.mxu1 %v746_v14  ;;  %1288 = vmatmul.bf16.gmra.mxu2 %v747_v15  ;;  %v1912_v14 = vld [vmem:[%s2750_s10 + $0xa0] sm:$0xff]  ;;  %v753_v15 = vpack.c.bf16 %v657_v4, %v653_v2  ;;  %v755_v20 = vpack.c.bf16 %v659_v10, %v655_v9 }
  0x7f   : > { %1377 = vmatmul.bf16.gmra.mxu3 %v748_v16  ;;  %v1913_v16 = vld [vmem:[%s2750_s10 + $0xa8] sm:$0xff]  ;;  %v756_v21 = vpack.c.bf16 %v660_v13, %v656_v12  ;;  %v1922_v13 = vld [vmem:[%s2750_s10 + $0xf0] sm:$0xff] }
  0x80   : > { %v1921_v12 = vld [vmem:[%s2750_s10 + $0xe8] sm:$0xff] }
  0x83   : > { %1986 = vperm.xlu2 %2477, %v1904_v23  }
  0x84   : > { %1981 = vperm.xlu1 %2476, %v1903_v22  }
  0x85   : > { %1976 = vperm.xlu0 %2475, %v1902_v26   ;;  %v2793_v35 = vpop.permute.xlu2 %1621  ;;  %v2836_v26 = vld [vmem:[%s2652_s18 + $0x88] sm:$0xff] }
  0x86   : > { %v2795_v36 = vpop.permute.xlu1 %1576  ;;  %v534_v34 = vunpack.c.0.s8 %v2836_v26  ;;  %v538_v37 = vunpack.c.1.s8 %v2836_v26 }
  0x87   : > { %v2797_v41 = vpop.permute.xlu0 %1566 }
  0x8b   : > { %2001 = vperm.xlu2 %2477, %v1907_v46  }
  0x8c   : > { %1996 = vperm.xlu1 %2476, %v1906_v44   ;;  %v665_v44 = vcvt.s32.f32 %v537_v32  ;;  %v544_v32 = vunpack.c.2.s8 %v2842_v28 }
  0x8d   : > { %1991 = vperm.xlu0 %2475, %v1905_v47   ;;  %1115 = vmatmul.bf16.gmra.mxu0 %v749_v45  ;;  %v2802_v51 = vpop.permute.xlu2 %1636  ;;  %v662_v47 = vcvt.s32.f32 %v534_v34 }
  0x8e   : > { %v2804_v52 = vpop.permute.xlu1 %1581  ;;  %1204 = vmatmul.bf16.gmra.mxu1 %v750_v48  ;;  %1293 = vmatmul.bf16.gmra.mxu2 %v751_v49  ;;  %v666_v48 = vcvt.s32.f32 %v538_v37  ;;  %v663_v49 = vcvt.s32.f32 %v535_v38  ;;  %v1756_v37 = vld [vmem:[%s2879_s11] sm:$0xff] }
  0x8f   : > { %v2806_v54 = vpop.permute.xlu0 %1571  ;;  %1382 = vmatmul.bf16.gmra.mxu3 %v752_v50  ;;  %v667_v50 = vcvt.s32.f32 %v539_v39 }
  0x90   : > { %v758_v63 = vpack.c.bf16 %v666_v48, %v662_v47  ;;  %v675_v47 = vcvt.s32.f32 %v547_v31 }
  0x91   : > { %v759_v0 = vpack.c.bf16 %v667_v50, %v663_v49  ;;  %v672_v49 = vcvt.s32.f32 %v544_v32 }
  0x93   : > { %2016 = vperm.xlu2 %2477, %v1910_v56   ;;  %v664_v56 = vcvt.s32.f32 %v536_v40 }
  0x94   : > { %2011 = vperm.xlu1 %2476, %v1909_v55  }
  0x95   : > { %2006 = vperm.xlu0 %2475, %v1908_v59   ;;  %v2817_v5 = vpop.permute.xlu2 %1651  ;;  %v757_v59 = vpack.c.bf16 %v665_v44, %v661_v43  ;;  %v760_v2 = vpack.c.bf16 %v668_v57, %v664_v56  ;;  %v2900_v43 = vld [vmem:[%s3200_s5] ss:$0 sm:$0xff] }
  0x96   : > { %v2819_v6 = vpop.permute.xlu1 %1601  ;;  %v2907_v57 = vld [vmem:[%s3201_s6] ss:$0 sm:$0xff] }
  0x97   : > { %v2821_v11 = vpop.permute.xlu0 %1596 }
  0x9b   : > { %2031 = vperm.xlu2 %2477, %v1913_v16   ;;  %v542_v16 = vunpack.c.2.s8 %v2836_v26 }
  0x9c   : > { %2026 = vperm.xlu1 %2476, %v1912_v14   ;;  %v541_v14 = vunpack.c.2.s8 %v2831_v24 }
  0x9d   : > { %2021 = vperm.xlu0 %2475, %v1911_v18   ;;  %1120 = vmatmul.bf16.gmra.mxu0 %v753_v15  ;;  %v2826_v22 = vpop.permute.xlu2 %1666  ;;  %v545_v15 = vunpack.c.3.s8 %v2831_v24  ;;  %v670_v40 = vcvt.s32.f32 %v542_v16  ;;  %v2926_v16 = vld [vmem:[%s2652_s18 + $0xa8] sm:$0xff] }
  0x9e   : > { %v2828_v23 = vpop.permute.xlu1 %1616  ;;  %1209 = vmatmul.bf16.gmra.mxu1 %v754_v19  ;;  %1298 = vmatmul.bf16.gmra.mxu2 %v755_v20  ;;  %v669_v38 = vcvt.s32.f32 %v541_v14 }
  0x9f   : > { %v2833_v25 = vpop.permute.xlu0 %1611  ;;  %1387 = vmatmul.bf16.gmra.mxu3 %v756_v21  ;;  %v1920_v21 = vld [vmem:[%s2750_s10 + $0xe0] sm:$0xff]  ;;  %v673_v39 = vcvt.s32.f32 %v545_v15 }
  0xa3   : > { %2046 = vperm.xlu2 %2477, %v1916_v30   ;;  %v543_v30 = vunpack.c.2.s8 %v2839_v27 }
  0xa4   : > { %2041 = vperm.xlu1 %2476, %v1915_v29   ;;  %v546_v29 = vunpack.c.3.s8 %v2836_v26 }
  0xa5   : > { %2036 = vperm.xlu0 %2475, %v1914_v33   ;;  %v2855_v45 = vpop.permute.xlu2 %1681  ;;  %v548_v33 = vunpack.c.3.s8 %v2842_v28  ;;  %v671_v44 = vcvt.s32.f32 %v543_v30 }
  0xa6   : > { %v2857_v46 = vpop.permute.xlu1 %1631  ;;  %v674_v28 = vcvt.s32.f32 %v546_v29 }
  0xa7   : > { %v2859_v55 = vpop.permute.xlu0 %1626  ;;  %v676_v50 = vcvt.s32.f32 %v548_v33  ;;  %v550_v33 = vunpack.c.0.s8 %v2926_v16 }
  0xaa   : > { %v1086_v61 = vpop.f32.mrf.mxu0 }
  0xab   : > { %v1175_v1 = vpop.f32.mrf.mxu1  ;;  %2061 = vperm.xlu2 %2477, %v1919_v60  }
  0xac   : > { %2056 = vperm.xlu1 %2476, %v1918_v58   ;;  %v1176_v4 = vadd.f32 %v1175_v1, %v1086_v61  ;;  %v761_v58 = vpack.c.bf16 %v673_v39, %v669_v38  ;;  %v1923_v61 = vld [vmem:[%s2750_s10 + $0xf8] sm:$0xff] }
  0xad   : > { %2051 = vperm.xlu0 %2475, %v1917_v62   ;;  %1125 = vmatmul.bf16.gmra.mxu0 %v757_v59  ;;  %v2864_v7 = vpop.permute.xlu2 %1696 }
  0xae   : > { %3204 = vst [vmem:[#allocation3_spill] sm:$0xff] %v2864_v7  ;;  %v2866_v8 = vpop.permute.xlu1 %1646  ;;  %1214 = vmatmul.bf16.gmra.mxu1 %v758_v63  ;;  %1303 = vmatmul.bf16.gmra.mxu2 %v759_v0  ;;  %v762_v63 = vpack.c.bf16 %v674_v28, %v670_v40  ;;  %v763_v0 = vpack.c.bf16 %v675_v47, %v671_v44 }
  0xaf   : > { %v2868_v9 = vpop.permute.xlu0 %1641  ;;  %1392 = vmatmul.bf16.gmra.mxu3 %v760_v2  ;;  %v764_v2 = vpack.c.bf16 %v676_v50, %v672_v49  ;;  %v678_v50 = vcvt.s32.f32 %v550_v33 }
  0xb1   : > { %v1264_v10 = vpop.f32.mrf.mxu2 }
  0xb2   : > { %v1265_v18 = vadd.f32 %v1264_v10, %v1176_v4  ;;  %v1353_v19 = vpop.f32.mrf.mxu3  ;;  %v2881_v20 = vpop.f32.mrf.mxu0 }
  0xb3   : > { %v2887_v24 = vpop.f32.mrf.mxu1  ;;  %2076 = vperm.xlu2 %2477, %v1922_v13   ;;  %v2921_v13 = vld [vmem:[%s2652_s18 + $0xa0] sm:$0xff] }
  0xb4   : > { %v1354_v34 = vadd.f32 %v1353_v19, %v1265_v18  ;;  %2071 = vperm.xlu1 %2476, %v1921_v12   ;;  %v2929_v18 = vld [vmem:[%s2652_s18 + $0xb0] sm:$0xff]  ;;  %v2932_v19 = vld [vmem:[%s2652_s18 + $0xb8] sm:$0xff]  ;;  %v549_v29 = vunpack.c.0.s8 %v2921_v13  ;;  %v553_v30 = vunpack.c.1.s8 %v2921_v13 }
  0xb5   : > { %2066 = vperm.xlu0 %2475, %v1920_v21   ;;  %v2893_v42 = vpop.permute.xlu2 %1711  ;;  %v555_v38 = vunpack.c.1.s8 %v2929_v18  ;;  %v552_v40 = vunpack.c.0.s8 %v2932_v19 }
  0xb6   : > { %v1724_v26 = vmul.f32 %v2797_v41, %v1354_v34  ;;  %3205 = vst [vmem:[#allocation4_spill] sm:$0xff] %v2893_v42  ;;  %v2895_v27 = vpop.permute.xlu1 %1661  ;;  %v554_v34 = vunpack.c.1.s8 %v2926_v16  ;;  %v677_v44 = vcvt.s32.f32 %v549_v29  ;;  %v681_v47 = vcvt.s32.f32 %v553_v30 }
  0xb7   : > { %v2902_v48 = vpop.permute.xlu0 %1656 }
  0xb8   : > { %v1788_v56 = vadd.f32 %v1756_v37, %v1724_v26  ;;  %v551_v37 = vunpack.c.0.s8 %v2929_v18  ;;  %v556_v26 = vunpack.c.1.s8 %v2932_v19 }
  0xb9   : > { %v1266_v41 = vpop.f32.mrf.mxu2 }
  0xba   : > { %v1355_v59 = vpop.f32.mrf.mxu3  ;;  %v1091_v60 = vpop.f32.mrf.mxu0  ;;  %v1824_v62 = vmul.f32 %v2900_v43, %v1788_v56  ;;  %v682_v56 = vcvt.s32.f32 %v554_v34 }
  0xbb   : > { %v1180_v1 = vpop.f32.mrf.mxu1 }
  0xbc   : > { %v1860_v4 = vadd.f32 %v2907_v57, %v1824_v62  ;;  %v1181_v28 = vadd.f32 %v1180_v1, %v1091_v60  ;;  %v1178_v62 = vadd.f32 %v2887_v24, %v2881_v20  ;;  %v765_v1 = vpack.c.bf16 %v681_v47, %v677_v44  ;;  %v1759_v24 = vld [vmem:[%s2879_s11 + $0x18] sm:$0xff]  ;;  %v1758_v47 = vld [vmem:[%s2879_s11 + $0x10] sm:$0xff] }
  0xbd   : > { %2081 = vperm.xlu0 %2475, %v1923_v61   ;;  %1130 = vmatmul.bf16.gmra.mxu0 %v761_v58  ;;  %v1927_v10 = vpop.permute.xlu2 %1926  ;;  %v679_v58 = vcvt.s32.f32 %v551_v37  ;;  %v683_v61 = vcvt.s32.f32 %v555_v38  ;;  %v766_v33 = vpack.c.bf16 %v682_v56, %v678_v50 }
  0xbe   : > { %v2918_v12 = vpop.permute.xlu1 %1676  ;;  %1219 = vmatmul.bf16.gmra.mxu1 %v762_v63  ;;  %1308 = vmatmul.bf16.gmra.mxu2 %v763_v0  ;;  %v2084_v14 = vmul.f32 %v1927_v10, %v1860_v4  ;;  %v680_v0 = vcvt.s32.f32 %v552_v40  ;;  %v1267_v10 = vadd.f32 %v1266_v41, %v1178_v62  ;;  %v559_v62 = vunpack.c.2.s8 %v2929_v18 }
  0xbf   : > { %v2923_v15 = vpop.permute.xlu0 %1671  ;;  %1397 = vmatmul.bf16.gmra.mxu3 %v764_v2  ;;  %v684_v2 = vcvt.s32.f32 %v556_v26  ;;  %v767_v34 = vpack.c.bf16 %v683_v61, %v679_v58  ;;  %v557_v26 = vunpack.c.2.s8 %v2921_v13 }
  0xc0   : > { %2116 = vst [vmem:[%s2916_s20] sm:$0xff] %v2084_v14 }
  0xc1   : > { %v1269_v21 = vpop.f32.mrf.mxu2  ;;  %v768_v38 = vpack.c.bf16 %v684_v2, %v680_v0 }
  0xc2   : > { %v1358_v31 = vpop.f32.mrf.mxu3  ;;  %v1093_v32 = vpop.f32.mrf.mxu0  ;;  %v1270_v14 = vadd.f32 %v1269_v21, %v1181_v28 }
  0xc3   : > { %v1182_v39 = vpop.f32.mrf.mxu1 }
  0xc4   : > { %v1183_v4 = vadd.f32 %v1182_v39, %v1093_v32  ;;  %v1359_v20 = vadd.f32 %v1358_v31, %v1270_v14 }
  0xc5   : > { %v1942_v14 = vpop.permute.xlu2 %1941 }
  0xc6   : > { %v2943_v49 = vpop.permute.xlu1 %1691  ;;  %v1726_v28 = vmul.f32 %v2795_v36, %v1359_v20  ;;  %v564_v36 = vunpack.c.3.s8 %v2932_v19 }
  0xc7   : > { %3206 = vst [vmem:[#allocation5_spill] sm:$0xff] %v2943_v49  ;;  %v2947_v63 = vpop.permute.xlu0 %1686  ;;  %v1356_v49 = vadd.f32 %v1355_v59, %v1267_v10  ;;  %v561_v59 = vunpack.c.3.s8 %v2921_v13  ;;  %v563_v13 = vunpack.c.3.s8 %v2929_v18  ;;  %v687_v18 = vcvt.s32.f32 %v559_v62  ;;  %v2982_v62 = vld [vmem:[%s2652_s18 + $0xc0] sm:$0xff] }
  0xc8   : > { %v1790_v10 = vadd.f32 %v1758_v47, %v1726_v28 }
  0xc9   : > { %v1271_v60 = vpop.f32.mrf.mxu2  ;;  %v1725_v31 = vmul.f32 %v2806_v54, %v1356_v49  ;;  %v560_v54 = vunpack.c.2.s8 %v2932_v19  ;;  %v689_v2 = vcvt.s32.f32 %v561_v59 }
  0xca   : > { %v1272_v29 = vadd.f32 %v1271_v60, %v1183_v4  ;;  %v1360_v30 = vpop.f32.mrf.mxu3  ;;  %v1096_v42 = vpop.f32.mrf.mxu0 }
  0xcb   : > { %v1185_v37 = vpop.f32.mrf.mxu1  ;;  %v688_v19 = vcvt.s32.f32 %v560_v54 }
  0xcc   : > { %v1361_v7 = vadd.f32 %v1360_v30, %v1272_v29  ;;  %v1186_v41 = vadd.f32 %v1185_v37, %v1096_v42  ;;  %v1757_v42 = vld [vmem:[%s2879_s11 + $0x8] sm:$0xff] }
  0xcd   : > { %1135 = vmatmul.bf16.gmra.mxu0 %v765_v1  ;;  %v1789_v4 = vadd.f32 %v1757_v42, %v1725_v31 }
  0xce   : > { %v1727_v40 = vmul.f32 %v2804_v52, %v1361_v7  ;;  %v2951_v21 = vpop.permute.xlu1 %1706  ;;  %1224 = vmatmul.bf16.gmra.mxu1 %v766_v33  ;;  %1313 = vmatmul.bf16.gmra.mxu2 %v767_v34  ;;  %v558_v52 = vunpack.c.2.s8 %v2926_v16  ;;  %v562_v7 = vunpack.c.3.s8 %v2926_v16  ;;  %v685_v16 = vcvt.s32.f32 %v557_v26 }
  0xcf   : > { %v2953_v32 = vpop.permute.xlu0 %1701  ;;  %1402 = vmatmul.bf16.gmra.mxu3 %v768_v38  ;;  %v691_v34 = vcvt.s32.f32 %v563_v13  ;;  %v692_v38 = vcvt.s32.f32 %v564_v36  ;;  %v2986_v36 = vld [vmem:[%s2652_s18 + $0xc8] sm:$0xff] }
  0xd0   : > { %v1791_v39 = vadd.f32 %v1759_v24, %v1727_v40  ;;  %v686_v60 = vcvt.s32.f32 %v558_v52  ;;  %v690_v1 = vcvt.s32.f32 %v562_v7  ;;  %v1826_v40 = vmul.f32 %v2900_v43, %v1790_v10  ;;  %v1760_v7 = vld [vmem:[%s2879_s11 + $0x20] sm:$0xff] }
  0xd1   : > { %v1274_v44 = vpop.f32.mrf.mxu2  ;;  %v771_v52 = vpack.c.bf16 %v691_v34, %v687_v18  ;;  %v772_v47 = vpack.c.bf16 %v692_v38, %v688_v19 }
  0xd2   : > { %v1827_v50 = vmul.f32 %v2900_v43, %v1791_v39  ;;  %v1275_v56 = vadd.f32 %v1274_v44, %v1186_v41  ;;  %v1363_v58 = vpop.f32.mrf.mxu3  ;;  %v1098_v61 = vpop.f32.mrf.mxu0  ;;  %v1825_v41 = vmul.f32 %v2900_v43, %v1789_v4  ;;  %v769_v39 = vpack.c.bf16 %v689_v2, %v685_v16 }
  0xd3   : > { %v1187_v0 = vpop.f32.mrf.mxu1  ;;  %v770_v44 = vpack.c.bf16 %v690_v1, %v686_v60  ;;  %v2993_v60 = vld [vmem:[%s2652_s18 + $0xd8] sm:$0xff]  ;;  %v569_v1 = vunpack.c.1.s8 %v2982_v62 }
  0xd4   : > { %v1863_v49 = vadd.f32 %v2907_v57, %v1827_v50  ;;  %v1364_v30 = vadd.f32 %v1363_v58, %v1275_v56  ;;  %v1188_v20 = vadd.f32 %v1187_v0, %v1098_v61  ;;  %v1761_v56 = vld [vmem:[%s2879_s11 + $0x28] sm:$0xff]  ;;  %v1862_v58 = vadd.f32 %v2907_v57, %v1826_v40 }
  0xd5   : > { %v1861_v61 = vadd.f32 %v2907_v57, %v1825_v41 }
  0xd6   : > { %v2087_v29 = vmul.f32 %v1942_v14, %v1863_v49  ;;  %v2969_v33 = vpop.permute.xlu1 %1721  ;;  %v1728_v26 = vmul.f32 %v2762_v53, %v1364_v30  ;;  %v2989_v49 = vld [vmem:[%s2652_s18 + $0xd0] sm:$0xff]  ;;  %v565_v14 = vunpack.c.0.s8 %v2982_v62  ;;  %v570_v30 = vunpack.c.1.s8 %v2986_v36 }
  0xd7   : > { %v2971_v37 = vpop.permute.xlu0 %1716  ;;  %v567_v18 = vunpack.c.0.s8 %v2989_v49  ;;  %v571_v40 = vunpack.c.1.s8 %v2989_v49 }
  0xd8   : > { %2119 = vst [vmem:[%s2916_s20 + $0x18] sm:$0xff] %v2087_v29  ;;  %v1792_v53 = vadd.f32 %v1760_v7, %v1728_v26  ;;  %v566_v29 = vunpack.c.0.s8 %v2986_v36  ;;  %v572_v26 = vunpack.c.1.s8 %v2993_v60 }
  0xd9   : > { %v1276_v24 = vpop.f32.mrf.mxu2 }
  0xda   : > { %v1277_v59 = vadd.f32 %v1276_v24, %v1188_v20  ;;  %v1365_v31 = vpop.f32.mrf.mxu3  ;;  %v1101_v28 = vpop.f32.mrf.mxu0  ;;  %v1828_v24 = vmul.f32 %v2900_v43, %v1792_v53  ;;  %v694_v7 = vcvt.s32.f32 %v566_v29 }
  0xdb   : > { %v1190_v42 = vpop.f32.mrf.mxu1 }
  0xdc   : > { %v1366_v50 = vadd.f32 %v1365_v31, %v1277_v59  ;;  %v1191_v0 = vadd.f32 %v1190_v42, %v1101_v28  ;;  %v693_v31 = vcvt.s32.f32 %v565_v14  ;;  %v1762_v28 = vld [vmem:[%s2879_s11 + $0x30] sm:$0xff]  ;;  %v698_v42 = vcvt.s32.f32 %v570_v30 }
  0xdd   : > { %1140 = vmatmul.bf16.gmra.mxu0 %v769_v39  ;;  %v568_v39 = vunpack.c.0.s8 %v2993_v60 }
  0xde   : > { %v1729_v13 = vmul.f32 %v2767_v3, %v1366_v50  ;;  %v1937_v54 = vpop.permute.xlu1 %1936  ;;  %1229 = vmatmul.bf16.gmra.mxu1 %v770_v44  ;;  %1318 = vmatmul.bf16.gmra.mxu2 %v771_v52  ;;  %v697_v52 = vcvt.s32.f32 %v569_v1  ;;  %v774_v30 = vpack.c.bf16 %v698_v42, %v694_v7  ;;  %v578_v7 = vunpack.c.3.s8 %v2986_v36 }
  0xdf   : > { %v2086_v16 = vmul.f32 %v1937_v54, %v1862_v58  ;;  %v1932_v2 = vpop.permute.xlu0 %1931  ;;  %1407 = vmatmul.bf16.gmra.mxu3 %v772_v47  ;;  %v695_v58 = vcvt.s32.f32 %v567_v18  ;;  %v700_v54 = vcvt.s32.f32 %v572_v26 }
  0xe0   : > { %v1793_v4 = vadd.f32 %v1761_v56, %v1729_v13  ;;  %v2085_v10 = vmul.f32 %v1932_v2, %v1861_v61  ;;  %v1864_v56 = vadd.f32 %v2907_v57, %v1828_v24  ;;  %v699_v61 = vcvt.s32.f32 %v571_v40  ;;  %v1763_v40 = vld [vmem:[%s2879_s11 + $0x38] sm:$0xff] }
  0xe1   : > { %2118 = vst [vmem:[%s2916_s20 + $0x10] sm:$0xff] %v2086_v16  ;;  %v1279_v3 = vpop.f32.mrf.mxu2  ;;  %v773_v14 = vpack.c.bf16 %v697_v52, %v693_v31  ;;  %v574_v52 = vunpack.c.2.s8 %v2986_v36  ;;  %v1764_v36 = vld [vmem:[%s2879_s11 + $0x40] sm:$0xff] }
  0xe2   : > { %2117 = vst [vmem:[%s2916_s20 + $0x8] sm:$0xff] %v2085_v10  ;;  %v1280_v34 = vadd.f32 %v1279_v3, %v1191_v0  ;;  %v1368_v19 = vpop.f32.mrf.mxu3  ;;  %v1103_v38 = vpop.f32.mrf.mxu0  ;;  %v1829_v20 = vmul.f32 %v2900_v43, %v1793_v4  ;;  %v696_v0 = vcvt.s32.f32 %v568_v39  ;;  %v775_v18 = vpack.c.bf16 %v699_v61, %v695_v58 }
  0xe3   : > { %v1192_v41 = vpop.f32.mrf.mxu1  ;;  %v579_v58 = vunpack.c.3.s8 %v2989_v49 }
  0xe4   : > { %v1369_v59 = vadd.f32 %v1368_v19, %v1280_v34  ;;  %v1865_v44 = vadd.f32 %v2907_v57, %v1829_v20  ;;  %v1193_v2 = vadd.f32 %v1192_v41, %v1103_v38  ;;  %v776_v19 = vpack.c.bf16 %v700_v54, %v696_v0  ;;  %v1957_v38 = vpop.permute.xlu2 %1956 }
  0xe6   : > { %v1730_v47 = vmul.f32 %v2821_v11, %v1369_v59  ;;  %v1952_v50 = vpop.permute.xlu1 %1951 }
  0xe7   : > { %v2089_v53 = vmul.f32 %v1952_v50, %v1865_v44  ;;  %v1947_v13 = vpop.permute.xlu0 %1946  ;;  %v577_v44 = vunpack.c.3.s8 %v2982_v62 }
  0xe8   : > { %v1794_v16 = vadd.f32 %v1762_v28, %v1730_v47  ;;  %v2088_v4 = vmul.f32 %v1947_v13, %v1864_v56  ;;  %v573_v28 = vunpack.c.2.s8 %v2982_v62  ;;  %v575_v56 = vunpack.c.2.s8 %v2989_v49 }
  0xe9   : > { %2121 = vst [vmem:[%s2916_s20 + $0x28] sm:$0xff] %v2089_v53  ;;  %v1281_v10 = vpop.f32.mrf.mxu2  ;;  %v576_v53 = vunpack.c.2.s8 %v2993_v60  ;;  %v580_v13 = vunpack.c.3.s8 %v2993_v60  ;;  %v707_v49 = vcvt.s32.f32 %v579_v58 }
  0xea   : > { %v1830_v3 = vmul.f32 %v2900_v43, %v1794_v16  ;;  %2120 = vst [vmem:[%s2916_s20 + $0x20] sm:$0xff] %v2088_v4  ;;  %v1282_v11 = vadd.f32 %v1281_v10, %v1193_v2  ;;  %v1370_v1 = vpop.f32.mrf.mxu3  ;;  %v1106_v29 = vpop.f32.mrf.mxu0  ;;  %v701_v16 = vcvt.s32.f32 %v573_v28  ;;  %v705_v2 = vcvt.s32.f32 %v577_v44  ;;  %v1765_v28 = vld [vmem:[%s2879_s11 + $0x48] sm:$0xff] }
  0xeb   : > { %v1195_v34 = vpop.f32.mrf.mxu1  ;;  %v702_v4 = vcvt.s32.f32 %v574_v52  ;;  %v706_v10 = vcvt.s32.f32 %v578_v7 }
  0xec   : > { %v1866_v20 = vadd.f32 %v2907_v57, %v1830_v3  ;;  %v1371_v24 = vadd.f32 %v1370_v1, %v1282_v11  ;;  %v1196_v26 = vadd.f32 %v1195_v34, %v1106_v29  ;;  %v703_v11 = vcvt.s32.f32 %v575_v56  ;;  %v3045_v56 = vld [vmem:[%s2652_s18 + $0xf8] sm:$0xff] }
  0xed   : > { %1145 = vmatmul.bf16.gmra.mxu0 %v773_v14  ;;  %v704_v1 = vcvt.s32.f32 %v576_v53  ;;  %v708_v29 = vcvt.s32.f32 %v580_v13  ;;  %v777_v34 = vpack.c.bf16 %v705_v2, %v701_v16 }
  0xee   : > { %v2090_v41 = vmul.f32 %v1957_v38, %v1866_v20  ;;  %v1731_v39 = vmul.f32 %v2819_v6, %v1371_v24  ;;  %1234 = vmatmul.bf16.gmra.mxu1 %v774_v30  ;;  %1323 = vmatmul.bf16.gmra.mxu2 %v775_v18 }
  0xef   : > { %1412 = vmatmul.bf16.gmra.mxu3 %v776_v19  ;;  %v1962_v54 = vpop.permute.xlu0 %1961 }
  0xf0   : > { %2122 = vst [vmem:[%s2916_s20 + $0x30] sm:$0xff] %v2090_v41  ;;  %v1795_v59 = vadd.f32 %v1763_v40, %v1731_v39  ;;  %v778_v40 = vpack.c.bf16 %v706_v10, %v702_v4  ;;  %v779_v41 = vpack.c.bf16 %v707_v49, %v703_v11  ;;  %v780_v39 = vpack.c.bf16 %v708_v29, %v704_v1  ;;  %v1972_v49 = vpop.permute.xlu2 %1971  ;;  %v1766_v1 = vld [vmem:[%s2879_s11 + $0x50] sm:$0xff] }
  0xf1   : > { %v1284_v31 = vpop.f32.mrf.mxu2  ;;  %v584_v10 = vunpack.c.0.s8 %v3045_v56 }
  0xf2   : > { %v1831_v42 = vmul.f32 %v2900_v43, %v1795_v59  ;;  %v1285_v47 = vadd.f32 %v1284_v31, %v1196_v26  ;;  %v1373_v6 = vpop.f32.mrf.mxu3  ;;  %v1108_v50 = vpop.f32.mrf.mxu0 }
  0xf3   : > { %v1197_v61 = vpop.f32.mrf.mxu1  ;;  %v1967_v31 = vpop.permute.xlu1 %1966 }
  0xf4   : > { %v1867_v62 = vadd.f32 %v2907_v57, %v1831_v42  ;;  %v1374_v0 = vadd.f32 %v1373_v6, %v1285_v47  ;;  %v1198_v60 = vadd.f32 %v1197_v61, %v1108_v50  ;;  %v3035_v42 = vld [vmem:[%s2652_s18 + $0xe0] sm:$0xff]  ;;  %v3038_v47 = vld [vmem:[%s2652_s18 + $0xe8] sm:$0xff]  ;;  %v3041_v6 = vld [vmem:[%s2652_s18 + $0xf0] sm:$0xff] }
  0xf5   : > { %v581_v61 = vunpack.c.0.s8 %v3035_v42  ;;  %v582_v53 = vunpack.c.0.s8 %v3038_v47  ;;  %v586_v13 = vunpack.c.1.s8 %v3038_v47  ;;  %v583_v16 = vunpack.c.0.s8 %v3041_v6 }
  0xf6   : > { %v2091_v14 = vmul.f32 %v1962_v54, %v1867_v62  ;;  %v1732_v3 = vmul.f32 %v2772_v17, %v1374_v0  ;;  %v587_v2 = vunpack.c.1.s8 %v3041_v6 }
  0xf7   : > { %v709_v29 = vcvt.s32.f32 %v581_v61 }
  0xf8   : > { %2123 = vst [vmem:[%s2916_s20 + $0x38] sm:$0xff] %v2091_v14  ;;  %v1796_v30 = vadd.f32 %v1764_v36, %v1732_v3  ;;  %v588_v14 = vunpack.c.1.s8 %v3045_v56 }
  0xf9   : > { %v1286_v18 = vpop.f32.mrf.mxu2 }
  0xfa   : > { %v1832_v19 = vmul.f32 %v2900_v43, %v1796_v30  ;;  %v1287_v20 = vadd.f32 %v1286_v18, %v1198_v60  ;;  %v1375_v24 = vpop.f32.mrf.mxu3  ;;  %v1111_v38 = vpop.f32.mrf.mxu0  ;;  %v710_v60 = vcvt.s32.f32 %v582_v53  ;;  %v714_v18 = vcvt.s32.f32 %v586_v13  ;;  %v1767_v53 = vld [vmem:[%s2879_s11 + $0x58] sm:$0xff] }
  0xfb   : > { %v1200_v17 = vpop.f32.mrf.mxu1 }
  0xfc   : > { %v1868_v26 = vadd.f32 %v2907_v57, %v1832_v19  ;;  %v1376_v59 = vadd.f32 %v1375_v24, %v1287_v20  ;;  %v1201_v7 = vadd.f32 %v1200_v17, %v1111_v38  ;;  %v711_v20 = vcvt.s32.f32 %v583_v16 }
  0xfd   : > { %1150 = vmatmul.bf16.gmra.mxu0 %v777_v34  ;;  %v715_v24 = vcvt.s32.f32 %v587_v2  ;;  %v712_v38 = vcvt.s32.f32 %v584_v10  ;;  %v589_v16 = vunpack.c.2.s8 %v3035_v42  ;;  %v593_v2 = vunpack.c.3.s8 %v3035_v42 }
  0xfe   : > { %v2092_v44 = vmul.f32 %v1967_v31, %v1868_v26  ;;  %v1733_v52 = vmul.f32 %v2833_v25, %v1376_v59  ;;  %1239 = vmatmul.bf16.gmra.mxu1 %v778_v40  ;;  %1328 = vmatmul.bf16.gmra.mxu2 %v779_v41  ;;  %v585_v25 = vunpack.c.1.s8 %v3035_v42  ;;  %v716_v40 = vcvt.s32.f32 %v588_v14 }
  0xff   : > { %1417 = vmatmul.bf16.gmra.mxu3 %v780_v39  ;;  %v594_v10 = vunpack.c.3.s8 %v3038_v47 }
 0x100   : > { %2124 = vst [vmem:[%s2916_s20 + $0x40] sm:$0xff] %v2092_v44  ;;  %v1797_v50 = vadd.f32 %v1765_v28, %v1733_v52  ;;  %v713_v30 = vcvt.s32.f32 %v585_v25  ;;  %v782_v52 = vpack.c.bf16 %v714_v18, %v710_v60  ;;  %v1977_v25 = vpop.permute.xlu0 %1976  ;;  %v596_v60 = vunpack.c.3.s8 %v3045_v56 }
 0x101   : > { %v1289_v58 = vpop.f32.mrf.mxu2 }
 0x102   : > { %v1833_v62 = vmul.f32 %v2900_v43, %v1797_v50  ;;  %v1290_v0 = vadd.f32 %v1289_v58, %v1201_v7  ;;  %v1378_v54 = vpop.f32.mrf.mxu3  ;;  %v1113_v36 = vpop.f32.mrf.mxu0  ;;  %v781_v26 = vpack.c.bf16 %v713_v30, %v709_v29  ;;  %v783_v7 = vpack.c.bf16 %v715_v24, %v711_v20 }
 0x103   : > { %v1202_v4 = vpop.f32.mrf.mxu1  ;;  %v592_v30 = vunpack.c.2.s8 %v3045_v56  ;;  %v721_v20 = vcvt.s32.f32 %v593_v2 }
 0x104   : > { %v1869_v3 = vadd.f32 %v2907_v57, %v1833_v62  ;;  %v1379_v11 = vadd.f32 %v1378_v54, %v1290_v0  ;;  %v1203_v17 = vadd.f32 %v1202_v4, %v1113_v36  ;;  %v590_v4 = vunpack.c.2.s8 %v3038_v47  ;;  %v1768_v47 = vld [vmem:[%s2879_s11 + $0x60] sm:$0xff] }
 0x106   : > { %v2093_v34 = vmul.f32 %v1972_v49, %v1869_v3  ;;  %v1734_v19 = vmul.f32 %v2828_v23, %v1379_v11  ;;  %v784_v23 = vpack.c.bf16 %v716_v40, %v712_v38  ;;  %v591_v49 = vunpack.c.2.s8 %v3041_v6 }
 0x107   : > { %v718_v24 = vcvt.s32.f32 %v590_v4  ;;  %v722_v38 = vcvt.s32.f32 %v594_v10 }
 0x108   : > { %2125 = vst [vmem:[%s2916_s20 + $0x48] sm:$0xff] %v2093_v34  ;;  %v1798_v41 = vadd.f32 %v1766_v1, %v1734_v19  ;;  %v595_v1 = vunpack.c.3.s8 %v3041_v6  ;;  %v1982_v34 = vpop.permute.xlu1 %1981  ;;  %v717_v19 = vcvt.s32.f32 %v589_v16 }
 0x109   : > { %v1291_v39 = vpop.f32.mrf.mxu2 }
 0x10a   : > { %v1834_v59 = vmul.f32 %v2900_v43, %v1798_v41  ;;  %v1292_v31 = vadd.f32 %v1291_v39, %v1203_v17  ;;  %v1380_v28 = vpop.f32.mrf.mxu3  ;;  %v1116_v44 = vpop.f32.mrf.mxu0  ;;  %v719_v17 = vcvt.s32.f32 %v591_v49  ;;  %v723_v6 = vcvt.s32.f32 %v595_v1 }
 0x10b   : > { %v1205_v50 = vpop.f32.mrf.mxu1  ;;  %v720_v39 = vcvt.s32.f32 %v592_v30  ;;  %v1992_v1 = vpop.permute.xlu0 %1991 }
 0x10c   : > { %v1870_v58 = vadd.f32 %v2907_v57, %v1834_v59  ;;  %v1381_v61 = vadd.f32 %v1380_v28, %v1292_v31  ;;  %v1206_v0 = vadd.f32 %v1205_v50, %v1116_v44  ;;  %v785_v28 = vpack.c.bf16 %v721_v20, %v717_v19 }
 0x10d   : > { %1155 = vmatmul.bf16.gmra.mxu0 %v781_v26  ;;  %v724_v26 = vcvt.s32.f32 %v596_v60 }
 0x10e   : > { %v2094_v13 = vmul.f32 %v1977_v25, %v1870_v58  ;;  %v1735_v62 = vmul.f32 %v2793_v35, %v1381_v61  ;;  %1244 = vmatmul.bf16.gmra.mxu1 %v782_v52  ;;  %1333 = vmatmul.bf16.gmra.mxu2 %v783_v7  ;;  %v787_v58 = vpack.c.bf16 %v723_v6, %v719_v17  ;;  %v1771_v17 = vld [vmem:[%s2879_s11 + $0x78] sm:$0xff] }
 0x10f   : > { %1422 = vmatmul.bf16.gmra.mxu3 %v784_v23  ;;  %v786_v23 = vpack.c.bf16 %v722_v38, %v718_v24 }
 0x110   : > { %2126 = vst [vmem:[%s2916_s20 + $0x50] sm:$0xff] %v2094_v13  ;;  %v1799_v54 = vadd.f32 %v1767_v53, %v1735_v62  ;;  %v1987_v13 = vpop.permute.xlu2 %1986  ;;  %v1769_v62 = vld [vmem:[%s2879_s11 + $0x68] sm:$0xff] }
 0x111   : > { %v1294_v36 = vpop.f32.mrf.mxu2 }
 0x112   : > { %v1835_v14 = vmul.f32 %v2900_v43, %v1799_v54  ;;  %v1295_v3 = vadd.f32 %v1294_v36, %v1206_v0  ;;  %v1383_v35 = vpop.f32.mrf.mxu3  ;;  %v1118_v11 = vpop.f32.mrf.mxu0 }
 0x113   : > { %v1207_v29 = vpop.f32.mrf.mxu1 }
 0x114   : > { %v1871_v42 = vadd.f32 %v2907_v57, %v1835_v14  ;;  %v1384_v18 = vadd.f32 %v1383_v35, %v1295_v3  ;;  %v1208_v56 = vadd.f32 %v1207_v29, %v1118_v11 }
 0x116   : > { %v2095_v40 = vmul.f32 %v1982_v34, %v1871_v42  ;;  %v1736_v41 = vmul.f32 %v2859_v55, %v1384_v18  ;;  %v788_v55 = vpack.c.bf16 %v724_v26, %v720_v39 }
 0x118   : > { %2127 = vst [vmem:[%s2916_s20 + $0x58] sm:$0xff] %v2095_v40  ;;  %v1800_v59 = vadd.f32 %v1768_v47, %v1736_v41  ;;  %v1997_v41 = vpop.permute.xlu1 %1996 }
 0x119   : > { %v1296_v31 = vpop.f32.mrf.mxu2 }
 0x11a   : > { %v1836_v44 = vmul.f32 %v2900_v43, %v1800_v59  ;;  %v1297_v52 = vadd.f32 %v1296_v31, %v1208_v56  ;;  %v1385_v7 = vpop.f32.mrf.mxu3  ;;  %v1121_v50 = vpop.f32.mrf.mxu0 }
 0x11b   : > { %v1210_v61 = vpop.f32.mrf.mxu1 }
 0x11c   : > { %v1872_v25 = vadd.f32 %v2907_v57, %v1836_v44  ;;  %v1386_v53 = vadd.f32 %v1385_v7, %v1297_v52  ;;  %v1211_v36 = vadd.f32 %v1210_v61, %v1121_v50 }
 0x11d   : > { %1160 = vmatmul.bf16.gmra.mxu0 %v785_v28 }
 0x11e   : > { %v2096_v0 = vmul.f32 %v1987_v13, %v1872_v25  ;;  %v1737_v54 = vmul.f32 %v2857_v46, %v1386_v53  ;;  %1249 = vmatmul.bf16.gmra.mxu1 %v786_v23  ;;  %1338 = vmatmul.bf16.gmra.mxu2 %v787_v58  ;;  %v1770_v46 = vld [vmem:[%s2879_s11 + $0x70] sm:$0xff]  ;;  %v2002_v23 = vpop.permute.xlu2 %2001  ;;  %v1772_v58 = vld [vmem:[%s2879_s11 + $0x80] sm:$0xff] }
 0x11f   : > { %1427 = vmatmul.bf16.gmra.mxu3 %v788_v55 }
 0x120   : > { %2128 = vst [vmem:[%s2916_s20 + $0x60] sm:$0xff] %v2096_v0  ;;  %v1801_v16 = vadd.f32 %v1769_v62, %v1737_v54 }
 0x121   : > { %v1299_v2 = vpop.f32.mrf.mxu2 }
 0x122   : > { %v1837_v4 = vmul.f32 %v2900_v43, %v1801_v16  ;;  %v1300_v10 = vadd.f32 %v1299_v2, %v1211_v36  ;;  %v1388_v14 = vpop.f32.mrf.mxu3  ;;  %v1123_v3 = vpop.f32.mrf.mxu0 }
 0x123   : > { %v1212_v35 = vpop.f32.mrf.mxu1 }
 0x124   : > { %v1873_v11 = vadd.f32 %v2907_v57, %v1837_v4  ;;  %v1389_v49 = vadd.f32 %v1388_v14, %v1300_v10  ;;  %v1213_v42 = vadd.f32 %v1212_v35, %v1123_v3  ;;  %v2007_v4 = vpop.permute.xlu0 %2006  ;;  %v1773_v10 = vld [vmem:[%s2879_s11 + $0x88] sm:$0xff] }
 0x126   : > { %v2097_v29 = vmul.f32 %v1992_v1, %v1873_v11  ;;  %v1738_v30 = vmul.f32 %v2802_v51, %v1389_v49 }
 0x128   : > { %2129 = vst [vmem:[%s2916_s20 + $0x68] sm:$0xff] %v2097_v29  ;;  %v1802_v60 = vadd.f32 %v1770_v46, %v1738_v30 }
 0x129   : > { %v1301_v18 = vpop.f32.mrf.mxu2 }
 0x12a   : > { %v1838_v34 = vmul.f32 %v2900_v43, %v1802_v60  ;;  %v1302_v47 = vadd.f32 %v1301_v18, %v1213_v42  ;;  %v1390_v19 = vpop.f32.mrf.mxu3  ;;  %v1126_v20 = vpop.f32.mrf.mxu0 }
 0x12b   : > { %v1215_v24 = vpop.f32.mrf.mxu1  ;;  %v2012_v18 = vpop.permute.xlu1 %2011 }
 0x12c   : > { %v1874_v38 = vadd.f32 %v2907_v57, %v1838_v34  ;;  %v1391_v40 = vadd.f32 %v1390_v19, %v1302_v47  ;;  %v1216_v39 = vadd.f32 %v1215_v24, %v1126_v20  ;;  %v1774_v34 = vld [vmem:[%s2879_s11 + $0x90] sm:$0xff] }
 0x12e   : > { %v2098_v6 = vmul.f32 %v1997_v41, %v1874_v38  ;;  %v1739_v51 = vmul.f32 %v2868_v9, %v1391_v40 }
 0x130   : > { %2130 = vst [vmem:[%s2916_s20 + $0x70] sm:$0xff] %v2098_v6  ;;  %v1803_v26 = vadd.f32 %v1771_v17, %v1739_v51 }
 0x131   : > { %v1304_v59 = vpop.f32.mrf.mxu2 }
 0x132   : > { %v1839_v56 = vmul.f32 %v2900_v43, %v1803_v26  ;;  %v1305_v31 = vadd.f32 %v1304_v59, %v1216_v39  ;;  %v1393_v28 = vpop.f32.mrf.mxu3  ;;  %v1128_v44 = vpop.f32.mrf.mxu0  ;;  %v1775_v59 = vld [vmem:[%s2879_s11 + $0x98] sm:$0xff] }
 0x133   : > { %v1217_v52 = vpop.f32.mrf.mxu1  ;;  %v2017_v26 = vpop.permute.xlu2 %2016 }
 0x134   : > { %v1875_v7 = vadd.f32 %v2907_v57, %v1839_v56  ;;  %v1394_v50 = vadd.f32 %v1393_v28, %v1305_v31  ;;  %v1218_v25 = vadd.f32 %v1217_v52, %v1128_v44 }
 0x136   : > { %v2099_v61 = vmul.f32 %v2002_v23, %v1875_v7  ;;  %v1740_v9 = vmul.f32 %v2866_v8, %v1394_v50 }
 0x138   : > { %2131 = vst [vmem:[%s2916_s20 + $0x78] sm:$0xff] %v2099_v61  ;;  %v1804_v55 = vadd.f32 %v1772_v58, %v1740_v9 }
 0x139   : > { %v1306_v53 = vpop.f32.mrf.mxu2 }
 0x13a   : > { %v1840_v13 = vmul.f32 %v2900_v43, %v1804_v55  ;;  %v1307_v62 = vadd.f32 %v1306_v53, %v1218_v25  ;;  %v1395_v0 = vpop.f32.mrf.mxu3  ;;  %v1131_v54 = vpop.f32.mrf.mxu0  ;;  %v1776_v25 = vld [vmem:[%s2879_s11 + $0xa0] sm:$0xff] }
 0x13b   : > { %v1220_v36 = vpop.f32.mrf.mxu1  ;;  %v2022_v55 = vpop.permute.xlu0 %2021 }
 0x13c   : > { %v1876_v16 = vadd.f32 %v2907_v57, %v1840_v13  ;;  %v1396_v2 = vadd.f32 %v1395_v0, %v1307_v62  ;;  %v1221_v3 = vadd.f32 %v1220_v36, %v1131_v54 }
 0x13e   : > { %v2100_v14 = vmul.f32 %v2007_v4, %v1876_v16  ;;  %v1741_v8 = vmul.f32 %v2817_v5, %v1396_v2 }
 0x140   : > { %2132 = vst [vmem:[%s2916_s20 + $0x80] sm:$0xff] %v2100_v14  ;;  %v1805_v35 = vadd.f32 %v1773_v10, %v1741_v8  ;;  %v2027_v8 = vpop.permute.xlu1 %2026 }
 0x141   : > { %v1309_v11 = vpop.f32.mrf.mxu2 }
 0x142   : > { %v1841_v49 = vmul.f32 %v2900_v43, %v1805_v35  ;;  %v1310_v1 = vadd.f32 %v1309_v11, %v1221_v3  ;;  %v1398_v46 = vpop.f32.mrf.mxu3  ;;  %v1133_v29 = vpop.f32.mrf.mxu0  ;;  %v1777_v3 = vld [vmem:[%s2879_s11 + $0xa8] sm:$0xff] }
 0x143   : > { %v1222_v30 = vpop.f32.mrf.mxu1 }
 0x144   : > { %v1877_v60 = vadd.f32 %v2907_v57, %v1841_v49  ;;  %v1399_v42 = vadd.f32 %v1398_v46, %v1310_v1  ;;  %v1223_v20 = vadd.f32 %v1222_v30, %v1133_v29 }
 0x146   : > { %v2101_v47 = vmul.f32 %v2012_v18, %v1877_v60  ;;  %v1742_v5 = vmul.f32 %v2902_v48, %v1399_v42 }
 0x148   : > { %2133 = vst [vmem:[%s2916_s20 + $0x88] sm:$0xff] %v2101_v47  ;;  %v1806_v19 = vadd.f32 %v1774_v34, %v1742_v5  ;;  %v2032_v47 = vpop.permute.xlu2 %2031  ;;  %v1778_v5 = vld [vmem:[%s2879_s11 + $0xb0] sm:$0xff] }
 0x149   : > { %v1311_v24 = vpop.f32.mrf.mxu2 }
 0x14a   : > { %v1842_v38 = vmul.f32 %v2900_v43, %v1806_v19  ;;  %v1312_v40 = vadd.f32 %v1311_v24, %v1223_v20  ;;  %v1400_v41 = vpop.f32.mrf.mxu3  ;;  %v1136_v17 = vpop.f32.mrf.mxu0 }
 0x14b   : > { %v1225_v6 = vpop.f32.mrf.mxu1 }
 0x14c   : > { %v1878_v51 = vadd.f32 %v2907_v57, %v1842_v38  ;;  %v1401_v39 = vadd.f32 %v1400_v41, %v1312_v40  ;;  %v1226_v31 = vadd.f32 %v1225_v6, %v1136_v17 }
 0x14e   : > { %v2102_v56 = vmul.f32 %v2017_v26, %v1878_v51  ;;  %v1743_v48 = vmul.f32 %v2895_v27, %v1401_v39  ;;  %v2037_v26 = vpop.permute.xlu0 %2036 }
 0x150   : > { %2134 = vst [vmem:[%s2916_s20 + $0x90] sm:$0xff] %v2102_v56  ;;  %v1807_v28 = vadd.f32 %v1775_v59, %v1743_v48  ;;  %v1779_v59 = vld [vmem:[%s2879_s11 + $0xb8] sm:$0xff] }
 0x151   : > { %v1314_v44 = vpop.f32.mrf.mxu2 }
 0x152   : > { %v1843_v52 = vmul.f32 %v2900_v43, %v1807_v28  ;;  %v1315_v7 = vadd.f32 %v1314_v44, %v1226_v31  ;;  %v1403_v50 = vpop.f32.mrf.mxu3  ;;  %v1138_v23 = vpop.f32.mrf.mxu0 }
 0x153   : > { %v1227_v58 = vpop.f32.mrf.mxu1 }
 0x154   : > { %v1879_v61 = vadd.f32 %v2907_v57, %v1843_v52  ;;  %v1404_v9 = vadd.f32 %v1403_v50, %v1315_v7  ;;  %v1228_v62 = vadd.f32 %v1227_v58, %v1138_v23 }
 0x156   : > { %v2103_v53 = vmul.f32 %v2022_v55, %v1879_v61  ;;  %v1744_v27 = vmul.f32 %v2826_v22, %v1404_v9  ;;  %v2042_v55 = vpop.permute.xlu1 %2041 }
 0x158   : > { %2135 = vst [vmem:[%s2916_s20 + $0x98] sm:$0xff] %v2103_v53  ;;  %v1808_v13 = vadd.f32 %v1776_v25, %v1744_v27  ;;  %v1780_v25 = vld [vmem:[%s2879_s11 + $0xc0] sm:$0xff] }
 0x159   : > { %v1316_v0 = vpop.f32.mrf.mxu2 }
 0x15a   : > { %v1844_v54 = vmul.f32 %v2900_v43, %v1808_v13  ;;  %v1317_v36 = vadd.f32 %v1316_v0, %v1228_v62  ;;  %v1405_v16 = vpop.f32.mrf.mxu3  ;;  %v1141_v2 = vpop.f32.mrf.mxu0 }
 0x15b   : > { %v1230_v4 = vpop.f32.mrf.mxu1 }
 0x15c   : > { %v1880_v10 = vadd.f32 %v2907_v57, %v1844_v54  ;;  %v1406_v14 = vadd.f32 %v1405_v16, %v1317_v36  ;;  %v1231_v11 = vadd.f32 %v1230_v4, %v1141_v2 }
 0x15e   : > { %v2104_v35 = vmul.f32 %v2027_v8, %v1880_v10  ;;  %v1745_v22 = vmul.f32 %v2923_v15, %v1406_v14  ;;  %v2047_v14 = vpop.permute.xlu2 %2046  ;;  %v1781_v8 = vld [vmem:[%s2879_s11 + $0xc8] sm:$0xff] }
 0x160   : > { %2136 = vst [vmem:[%s2916_s20 + $0xa0] sm:$0xff] %v2104_v35  ;;  %v1809_v49 = vadd.f32 %v1777_v3, %v1745_v22  ;;  %v3207_v35 = vld [vmem:[#allocation5_spill] sm:$0xff] }
 0x161   : > { %v1319_v1 = vpop.f32.mrf.mxu2 }
 0x162   : > { %v1845_v46 = vmul.f32 %v2900_v43, %v1809_v49  ;;  %v1320_v29 = vadd.f32 %v1319_v1, %v1231_v11  ;;  %v1408_v30 = vpop.f32.mrf.mxu3  ;;  %v1143_v60 = vpop.f32.mrf.mxu0  ;;  %v3131_v43 = vld [vmem:[%s3200_s5] ss:$0 sm:$0xff] }
 0x163   : > { %v1232_v42 = vpop.f32.mrf.mxu1 }
 0x164   : > { %v1881_v18 = vadd.f32 %v2907_v57, %v1845_v46  ;;  %v1409_v34 = vadd.f32 %v1408_v30, %v1320_v29  ;;  %v1233_v24 = vadd.f32 %v1232_v42, %v1143_v60 }
 0x166   : > { %v2105_v19 = vmul.f32 %v2032_v47, %v1881_v18  ;;  %v1746_v15 = vmul.f32 %v2918_v12, %v1409_v34  ;;  %v3137_v12 = vld [vmem:[%s3201_s6] ss:$0 sm:$0xff]  ;;  %v2052_v34 = vpop.permute.xlu0 %2051  ;;  %v1782_v47 = vld [vmem:[%s2879_s11 + $0xd0] sm:$0xff] }
 0x168   : > { %2137 = vst [vmem:[%s2916_s20 + $0xa8] sm:$0xff] %v2105_v19  ;;  %v1810_v20 = vadd.f32 %v1778_v5, %v1746_v15  ;;  %v3208_v19 = vld [vmem:[#allocation3_spill] sm:$0xff] }
 0x169   : > { %v1321_v38 = vpop.f32.mrf.mxu2 }
 0x16a   : > { %v1846_v40 = vmul.f32 %v3131_v43, %v1810_v20  ;;  %v1322_v57 = vadd.f32 %v1321_v38, %v1233_v24  ;;  %v1410_v41 = vpop.f32.mrf.mxu3  ;;  %v1146_v17 = vpop.f32.mrf.mxu0 }
 0x16b   : > { %v1235_v6 = vpop.f32.mrf.mxu1 }
 0x16c   : > { %v1882_v51 = vadd.f32 %v3137_v12, %v1846_v40  ;;  %v1411_v39 = vadd.f32 %v1410_v41, %v1322_v57  ;;  %v1236_v31 = vadd.f32 %v1235_v6, %v1146_v17 }
 0x16e   : > { %v2106_v56 = vmul.f32 %v2037_v26, %v1882_v51  ;;  %v1747_v48 = vmul.f32 %v2855_v45, %v1411_v39  ;;  %v2057_v26 = vpop.permute.xlu1 %2056 }
 0x170   : > { %2138 = vst [vmem:[%s2916_s20 + $0xb0] sm:$0xff] %v2106_v56  ;;  %v1811_v28 = vadd.f32 %v1779_v59, %v1747_v48  ;;  %v1783_v59 = vld [vmem:[%s2879_s11 + $0xd8] sm:$0xff] }
 0x171   : > { %v1324_v44 = vpop.f32.mrf.mxu2 }
 0x172   : > { %v1847_v52 = vmul.f32 %v3131_v43, %v1811_v28  ;;  %v1325_v7 = vadd.f32 %v1324_v44, %v1236_v31  ;;  %v1413_v50 = vpop.f32.mrf.mxu3  ;;  %v1148_v23 = vpop.f32.mrf.mxu0 }
 0x173   : > { %v1237_v58 = vpop.f32.mrf.mxu1 }
 0x174   : > { %v1883_v61 = vadd.f32 %v3137_v12, %v1847_v52  ;;  %v1414_v9 = vadd.f32 %v1413_v50, %v1325_v7  ;;  %v1238_v13 = vadd.f32 %v1237_v58, %v1148_v23 }
 0x176   : > { %v2107_v53 = vmul.f32 %v2042_v55, %v1883_v61  ;;  %v1748_v45 = vmul.f32 %v2947_v63, %v1414_v9  ;;  %v2062_v55 = vpop.permute.xlu2 %2061 }
 0x178   : > { %2139 = vst [vmem:[%s2916_s20 + $0xb8] sm:$0xff] %v2107_v53  ;;  %v1812_v27 = vadd.f32 %v1780_v25, %v1748_v45  ;;  %v1784_v25 = vld [vmem:[%s2879_s11 + $0xe0] sm:$0xff] }
 0x179   : > { %v1326_v62 = vpop.f32.mrf.mxu2 }
 0x17a   : > { %v1848_v0 = vmul.f32 %v3131_v43, %v1812_v27  ;;  %v1327_v54 = vadd.f32 %v1326_v62, %v1238_v13  ;;  %v1415_v36 = vpop.f32.mrf.mxu3  ;;  %v1151_v16 = vpop.f32.mrf.mxu0 }
 0x17b   : > { %v1240_v2 = vpop.f32.mrf.mxu1 }
 0x17c   : > { %v1884_v4 = vadd.f32 %v3137_v12, %v1848_v0  ;;  %v1416_v10 = vadd.f32 %v1415_v36, %v1327_v54  ;;  %v1241_v22 = vadd.f32 %v1240_v2, %v1151_v16 }
 0x17e   : > { %v2108_v3 = vmul.f32 %v2047_v14, %v1884_v4  ;;  %v1749_v63 = vmul.f32 %v3207_v35, %v1416_v10  ;;  %v2067_v10 = vpop.permute.xlu0 %2066  ;;  %v1785_v14 = vld [vmem:[%s2879_s11 + $0xe8] sm:$0xff] }
 0x180   : > { %2140 = vst [vmem:[%s2916_s20 + $0xc0] sm:$0xff] %v2108_v3  ;;  %v1813_v11 = vadd.f32 %v1781_v8, %v1749_v63  ;;  %v3209_v3 = vld [vmem:[#allocation4_spill] sm:$0xff] }
 0x181   : > { %v1329_v49 = vpop.f32.mrf.mxu2 }
 0x182   : > { %v1849_v1 = vmul.f32 %v3131_v43, %v1813_v11  ;;  %v1330_v46 = vadd.f32 %v1329_v49, %v1241_v22  ;;  %v1418_v29 = vpop.f32.mrf.mxu3  ;;  %v1153_v30 = vpop.f32.mrf.mxu0 }
 0x183   : > { %v1242_v60 = vpop.f32.mrf.mxu1 }
 0x184   : > { %v1885_v42 = vadd.f32 %v3137_v12, %v1849_v1  ;;  %v1419_v18 = vadd.f32 %v1418_v29, %v1330_v46  ;;  %v1243_v24 = vadd.f32 %v1242_v60, %v1153_v30  ;;  %v2072_v46 = vpop.permute.xlu1 %2071  ;;  %v1786_v60 = vld [vmem:[%s2879_s11 + $0xf0] sm:$0xff] }
 0x186   : > { %v2109_v5 = vmul.f32 %v2052_v34, %v1885_v42  ;;  %v1750_v15 = vmul.f32 %v3208_v19, %v1419_v18 }
 0x188   : > { %2141 = vst [vmem:[%s2916_s20 + $0xc8] sm:$0xff] %v2109_v5  ;;  %v1814_v20 = vadd.f32 %v1782_v47, %v1750_v15 }
 0x189   : > { %v1331_v38 = vpop.f32.mrf.mxu2 }
 0x18a   : > { %v1850_v40 = vmul.f32 %v3131_v43, %v1814_v20  ;;  %v1332_v57 = vadd.f32 %v1331_v38, %v1243_v24  ;;  %v1420_v41 = vpop.f32.mrf.mxu3  ;;  %v1156_v17 = vpop.f32.mrf.mxu0 }
 0x18b   : > { %v1245_v6 = vpop.f32.mrf.mxu1 }
 0x18c   : > { %v1886_v51 = vadd.f32 %v3137_v12, %v1850_v40  ;;  %v1421_v39 = vadd.f32 %v1420_v41, %v1332_v57  ;;  %v1246_v31 = vadd.f32 %v1245_v6, %v1156_v17  ;;  %v2077_v41 = vpop.permute.xlu2 %2076  ;;  %v1787_v17 = vld [vmem:[%s2879_s11 + $0xf8] sm:$0xff] }
 0x18e   : > { %v2110_v56 = vmul.f32 %v2057_v26, %v1886_v51  ;;  %v1751_v48 = vmul.f32 %v2953_v32, %v1421_v39 }
 0x190   : > { %2142 = vst [vmem:[%s2916_s20 + $0xd0] sm:$0xff] %v2110_v56  ;;  %v1815_v28 = vadd.f32 %v1783_v59, %v1751_v48  ;;  %v2082_v59 = vpop.permute.xlu0 %2081 }
 0x191   : > { %v1334_v44 = vpop.f32.mrf.mxu2 }
 0x192   : > { %v1851_v52 = vmul.f32 %v3131_v43, %v1815_v28  ;;  %v1335_v7 = vadd.f32 %v1334_v44, %v1246_v31  ;;  %v1423_v50 = vpop.f32.mrf.mxu3  ;;  %v1158_v23 = vpop.f32.mrf.mxu0 }
 0x193   : > { %v1247_v58 = vpop.f32.mrf.mxu1 }
 0x194   : > { %v1887_v61 = vadd.f32 %v3137_v12, %v1851_v52  ;;  %v1424_v9 = vadd.f32 %v1423_v50, %v1335_v7  ;;  %v1248_v27 = vadd.f32 %v1247_v58, %v1158_v23 }
 0x196   : > { %v2111_v53 = vmul.f32 %v2062_v55, %v1887_v61  ;;  %v1752_v32 = vmul.f32 %v2951_v21, %v1424_v9 }
 0x198   : > { %2143 = vst [vmem:[%s2916_s20 + $0xd8] sm:$0xff] %v2111_v53  ;;  %v1816_v45 = vadd.f32 %v1784_v25, %v1752_v32 }
 0x199   : > { %v1336_v13 = vpop.f32.mrf.mxu2 }
 0x19a   : > { %v1852_v62 = vmul.f32 %v3131_v43, %v1816_v45  ;;  %v1337_v0 = vadd.f32 %v1336_v13, %v1248_v27  ;;  %v1425_v54 = vpop.f32.mrf.mxu3  ;;  %v1161_v36 = vpop.f32.mrf.mxu0 }
 0x19b   : > { %v1250_v16 = vpop.f32.mrf.mxu1 }
 0x19c   : > { %v1888_v2 = vadd.f32 %v3137_v12, %v1852_v62  ;;  %v1426_v4 = vadd.f32 %v1425_v54, %v1337_v0  ;;  %v1251_v35 = vadd.f32 %v1250_v16, %v1161_v36 }
 0x19e   : > { %v2112_v8 = vmul.f32 %v2067_v10, %v1888_v2  ;;  %v1753_v21 = vmul.f32 %v3209_v3, %v1426_v4 }
 0x1a0   : > { %2144 = vst [vmem:[%s2916_s20 + $0xe0] sm:$0xff] %v2112_v8  ;;  %v1817_v63 = vadd.f32 %v1785_v14, %v1753_v21 }
 0x1a1   : > { %v1339_v22 = vpop.f32.mrf.mxu2 }
 0x1a2   : > { %v1853_v11 = vmul.f32 %v3131_v43, %v1817_v63  ;;  %v1340_v49 = vadd.f32 %v1339_v22, %v1251_v35  ;;  %v1428_v1 = vpop.f32.mrf.mxu3  ;;  %v1163_v42 = vpop.f32.mrf.mxu0 }
 0x1a3   : > { %v1252_v18 = vpop.f32.mrf.mxu1 }
 0x1a4   : > { %v1889_v29 = vadd.f32 %v3137_v12, %v1853_v11  ;;  %v1429_v30 = vadd.f32 %v1428_v1, %v1340_v49  ;;  %v1253_v19 = vadd.f32 %v1252_v18, %v1163_v42 }
 0x1a6   : > { %v2113_v34 = vmul.f32 %v2072_v46, %v1889_v29  ;;  %v1754_v47 = vmul.f32 %v2971_v37, %v1429_v30 }
 0x1a8   : > { %2145 = vst [vmem:[%s2916_s20 + $0xe8] sm:$0xff] %v2113_v34  ;;  %v1818_v5 = vadd.f32 %v1786_v60, %v1754_v47 }
 0x1a9   : > { %v1341_v15 = vpop.f32.mrf.mxu2 }
 0x1aa   : > { %v1854_v20 = vmul.f32 %v3131_v43, %v1818_v5  ;;  %v1342_v24 = vadd.f32 %v1341_v15, %v1253_v19  ;;  %v1430_v38 = vpop.f32.mrf.mxu3 }
 0x1ac   : > { %v1890_v40 = vadd.f32 %v3137_v12, %v1854_v20  ;;  %v1431_v57 = vadd.f32 %v1430_v38, %v1342_v24 }
 0x1ae   : > { %v2114_v6 = vmul.f32 %v2077_v41, %v1890_v40  ;;  %v1755_v51 = vmul.f32 %v2969_v33, %v1431_v57 }
 0x1b0   : > { %2146 = vst [vmem:[%s2916_s20 + $0xf0] sm:$0xff] %v2114_v6  ;;  %v1819_v39 = vadd.f32 %v1787_v17, %v1755_v51 }
 0x1b2   : > { %v1855_v37 = vmul.f32 %v3131_v43, %v1819_v39 }
 0x1b4   : > { %v1891_v26 = vadd.f32 %v3137_v12, %v1855_v37 }
 0x1b6   : > { %v2115_v56 = vmul.f32 %v2082_v59, %v1891_v26 }
 0x1b8   : > { %2147 = vst [vmem:[%s2916_s20 + $0xf8] sm:$0xff] %v2115_v56 }
 0x1b9 PF: > { %s17_s26 = sadd.s32 1, %s2504_s26   ;;  %s3210_s24 = smov %s2500_s25 }
 0x1ba   : > { %p14_p6 = scmp.ge.s32.totalorder %s17_s26, 4   ;;  %s3211_s25 = smov %s3213_s27 }
 0x1bc   :  { %16 = sbr.rel (!%p14_p6) target bundleno = 2 (0x2), region = 98 }

</bundles_post_ra>
